<compile_context>
chip_gen: v7x
topology: tpu7x:2x2x1
jax: 0.10.0
libtpu: 0.0.40
codegen_flags: <defaults>
</compile_context>

<pallas_src>
import jax
import jax.numpy as jnp
from jax import lax
from jax.experimental import pallas as pl
from jax.experimental.pallas import tpu as pltpu
import numpy as np


# ----------------------------- Pallas kernel ------------------------------ #

def _make_bilstm_kernel(hidden: int, tt: int):
    """Fused forward+backward LSTM layer; grid iterates over time tiles."""
    H = hidden

    def lstm_cell(x_t, h, c, wih_ref, whh_ref, b_ref):
        # x_t: (B, D) bf16; h, c: (B, H) f32; weights bf16; bias f32.
        gates = (jnp.dot(x_t, wih_ref[...], preferred_element_type=jnp.float32)
                 + jnp.dot(h.astype(jnp.bfloat16), whh_ref[...],
                           preferred_element_type=jnp.float32)
                 + b_ref[...])                       # (B, 4H) f32; order i,f,g,o
        i_g = jax.nn.sigmoid(gates[:, 0 * H:1 * H])
        f_g = jax.nn.sigmoid(gates[:, 1 * H:2 * H])
        g_g = jnp.tanh(gates[:, 2 * H:3 * H])
        o_g = jax.nn.sigmoid(gates[:, 3 * H:4 * H])
        c_new = f_g * c + i_g * g_g
        h_new = o_g * jnp.tanh(c_new)
        return h_new, c_new

    def kernel(mask_f_ref, mask_b_ref, x_f_ref, x_b_ref,
               wih_f_ref, whh_f_ref, b_f_ref,
               wih_b_ref, whh_b_ref, b_b_ref,
               y_f_ref, y_b_ref, hfin_ref, cfin_ref):
        j = pl.program_id(0)

        # Recurrent state is kept in the constant-index output blocks
        # (VMEM-resident across the whole sequential grid).
        @pl.when(j == 0)
        def _():
            hfin_ref[...] = jnp.zeros_like(hfin_ref)
            cfin_ref[...] = jnp.zeros_like(cfin_ref)

        h_f = hfin_ref[0]
        c_f = cfin_ref[0]
        h_b = hfin_ref[1]
        c_b = cfin_ref[1]

        # Fully unrolled recurrence over the TT-step time tile.
        for s in range(tt):
            # ---- forward direction: global time t = j*TT + s ----
            keep = mask_f_ref[s] > 0.5                       # (B, 1) bool
            h_new, c_new = lstm_cell(x_f_ref[s], h_f, c_f,
                                     wih_f_ref, whh_f_ref, b_f_ref)
            y_f_ref[s] = jnp.where(keep, h_new, 0.0).astype(y_f_ref.dtype)
            h_f = jnp.where(keep, h_new, h_f)                # freeze past length
            c_f = jnp.where(keep, c_new, c_f)

            # ---- backward direction: global time t = (nc-1-j)*TT + (TT-1-s) ----
            r = tt - 1 - s
            keep = mask_b_ref[r] > 0.5
            h_new, c_new = lstm_cell(x_b_ref[r], h_b, c_b,
                                     wih_b_ref, whh_b_ref, b_b_ref)
            y_b_ref[r] = jnp.where(keep, h_new, 0.0).astype(y_b_ref.dtype)
            h_b = jnp.where(keep, h_new, h_b)
            c_b = jnp.where(keep, c_new, c_b)

        # Write carried state back once per tile (not once per step).
        hfin_ref[0] = h_f
        hfin_ref[1] = h_b
        cfin_ref[0] = c_f
        cfin_ref[1] = c_b

    return kernel


def bilstm_layer_pallas(x, mask, p_fwd, p_bwd, tt):
    """One bidirectional LSTM layer, both directions fused in one pallas_call.

    x:    (T_pad, B, D) bf16, time-major (T_pad a multiple of tt)
    mask: (T_pad, B, 1) f32 validity mask (1.0 where t < length[b])
    p_*:  dict(wih_t=(D,4H) bf16, whh_t=(H,4H) bf16, bias=(1,4H) f32)
    Returns y_fwd, y_bwd (T_pad,B,H) f32 and h_final, c_final (2,B,H) f32
    (index 0 = forward, 1 = backward).
    """
    T_pad, B, D = x.shape
    H = p_fwd["whh_t"].shape[0]
    assert T_pad % tt == 0
    nc = T_pad // tt

    fwd_map = lambda j: (j, 0, 0)
    bwd_map = lambda j: (nc - 1 - j, 0, 0)
    const2 = lambda j: (0, 0)
    const3 = lambda j: (0, 0, 0)

    grid_spec = pltpu.PrefetchScalarGridSpec(
        num_scalar_prefetch=0,
        grid=(nc,),
        in_specs=[
            pl.BlockSpec((tt, B, 1), fwd_map),       # mask, forward tile
            pl.BlockSpec((tt, B, 1), bwd_map),       # mask, backward tile
            pl.BlockSpec((tt, B, D), fwd_map),       # x, forward tile
            pl.BlockSpec((tt, B, D), bwd_map),       # x, backward tile
            pl.BlockSpec((D, 4 * H), const2),        # W_ih^T fwd (bf16)
            pl.BlockSpec((H, 4 * H), const2),        # W_hh^T fwd (bf16)
            pl.BlockSpec((1, 4 * H), const2),        # bias fwd (f32)
            pl.BlockSpec((D, 4 * H), const2),        # W_ih^T bwd
            pl.BlockSpec((H, 4 * H), const2),        # W_hh^T bwd
            pl.BlockSpec((1, 4 * H), const2),        # bias bwd
        ],
        out_specs=[
            pl.BlockSpec((tt, B, H), fwd_map),       # y fwd
            pl.BlockSpec((tt, B, H), bwd_map),       # y bwd
            pl.BlockSpec((2, B, H), const3),         # h_final (state carrier)
            pl.BlockSpec((2, B, H), const3),         # c_final (state carrier)
        ],
    )
    out_shape = (
        jax.ShapeDtypeStruct((T_pad, B, H), jnp.float32),
        jax.ShapeDtypeStruct((T_pad, B, H), jnp.float32),
        jax.ShapeDtypeStruct((2, B, H), jnp.float32),
        jax.ShapeDtypeStruct((2, B, H), jnp.float32),
    )

    return pl.pallas_call(
        _make_bilstm_kernel(H, tt),
        out_shape=out_shape,
        grid_spec=grid_spec,
        compiler_params=pltpu.CompilerParams(
            dimension_semantics=("arbitrary",),      # sequential time recurrence
            vmem_limit_bytes=32 * 1024 * 1024,       # explicit, fits all gens
        ),
    )(mask, mask, x, x,
      p_fwd["wih_t"], p_fwd["whh_t"], p_fwd["bias"],
      p_bwd["wih_t"], p_bwd["whh_t"], p_bwd["bias"])


# ------------------------- pure-JAX reference (check) ---------------------- #

def _lstm_dir_ref(x, mask, p, reverse):
    T_pad, B, D = x.shape
    H = p["whh_t"].shape[0]
    wih, whh, b = p["wih_t"], p["whh_t"], p["bias"]
    ts = jnp.arange(T_pad)
    if reverse:
        ts = ts[::-1]

    def step(carry, t):
        h, c = carry
        gates = (jnp.dot(x[t], wih, preferred_element_type=jnp.float32)
                 + jnp.dot(h.astype(jnp.bfloat16), whh,
                           preferred_element_type=jnp.float32)
                 + b)
        i_g = jax.nn.sigmoid(gates[:, :H])
        f_g = jax.nn.sigmoid(gates[:, H:2 * H])
        g_g = jnp.tanh(gates[:, 2 * H:3 * H])
        o_g = jax.nn.sigmoid(gates[:, 3 * H:])
        c_new = f_g * c + i_g * g_g
        h_new = o_g * jnp.tanh(c_new)
        keep = mask[t] > 0.5
        h2 = jnp.where(keep, h_new, h)
        c2 = jnp.where(keep, c_new, c)
        return (h2, c2), jnp.where(keep, h_new, 0.0)

    init = (jnp.zeros((B, H), jnp.float32), jnp.zeros((B, H), jnp.float32))
    (hf, cf), ys = lax.scan(step, init, ts)
    if reverse:
        ys = ys[::-1]
    return ys, hf, cf


def bilstm_layer_ref(x, mask, p_fwd, p_bwd, tt):
    del tt
    yf, hff, cff = _lstm_dir_ref(x, mask, p_fwd, reverse=False)
    yb, hfb, cfb = _lstm_dir_ref(x, mask, p_bwd, reverse=True)
    return yf, yb, jnp.stack([hff, hfb]), jnp.stack([cff, cfb])


# ------------------------------ forward glue ------------------------------- #

def sent_encoder_forward(seq, emb_table, params, padding_idx, layer_fn, tt=4):
    """Mirrors SentEncoder.forward: sort by length, pad, embed, 2-layer bi-LSTM,
    then recover original batch order."""
    # _sort_and_pad (host-side glue, same as the PyTorch module)
    seq_info = [(s, len(s), i) for i, s in enumerate(seq)]
    sorted_seq, sorted_len, reverse_map = zip(
        *sorted(seq_info, key=lambda x: x[1], reverse=True))
    _, sorted_map = zip(*sorted([(x, i) for i, x in enumerate(reverse_map)],
                                key=lambda x: x[0]))
    T = sorted_len[0]
    T_pad = ((T + tt - 1) // tt) * tt                 # pad time to the tile size
    padded = [list(s) + [padding_idx] * (T_pad - len(s)) for s in sorted_seq]
    tokens = jnp.asarray(padded, dtype=jnp.int32)     # (B, T_pad)
    lengths = jnp.asarray(sorted_len, dtype=jnp.int32)

    # embedding lookup (glue gather), time-major
    emb = jnp.take(emb_table, tokens, axis=0)         # (B, T_pad, D)
    x = jnp.transpose(emb, (1, 0, 2))                 # (T_pad, B, D)

    # pack_padded_sequence semantics: valid iff t < length[b]
    mask = (jnp.arange(T_pad)[:, None] < lengths[None, :]
            ).astype(jnp.float32)[..., None]          # (T_pad, B, 1)

    layer_in = x.astype(jnp.bfloat16)
    hs, cs = [], []
    ctx = None
    for layer in range(2):
        yf, yb, hfin, cfin = layer_fn(layer_in, mask,
                                      params[(layer, 0)], params[(layer, 1)], tt)
        hs.append(hfin)
        cs.append(cfin)
        ctx = jnp.concatenate([yf, yb], axis=-1)      # (T_pad, B, 2H) f32
        layer_in = ctx.astype(jnp.bfloat16)

    context_vec = ctx[:T]                             # drop time padding
    ht = jnp.concatenate(hs, axis=0)                  # (4, B, H), torch order
    ct = jnp.concatenate(cs, axis=0)

    m = jnp.asarray(sorted_map, dtype=jnp.int32)      # _recover: un-sort batch
    return context_vec[:, m, :], (ht[:, m, :], ct[:, m, :])


# --------------------------------- main ------------------------------------ #

if __name__ == "__main__":
    # small, deterministic synthetic setup (hardware-aligned shapes)
    VOCAB_NUM = 30
    DIM = 64          # vocab.dim (embedding size / LSTM input size, layer 0)
    HIDDEN = 128      # multiple of 128 -> lane-aligned gate slices
    PADDING_IDX = 0
    NUM_LAYERS = 2
    TT = 4            # timesteps per sequential grid step (time tile)

    key = jax.random.PRNGKey(0)

    def uinit(k, shape, bound):
        return jax.random.uniform(k, shape, jnp.float32, -bound, bound)

    # embedding table (vocab.i2v stand-in); padding row zeroed
    key, k_emb = jax.random.split(key)
    emb_table = uinit(k_emb, (VOCAB_NUM, DIM), 1.0)
    emb_table = emb_table.at[PADDING_IDX].set(0.0)

    # LSTM parameters, PyTorch layout (4H, in)/(4H, H), gate order i,f,g,o.
    # Stored pre-transposed, bf16 weights + combined f32 bias for the kernel.
    bound = 1.0 / np.sqrt(HIDDEN)
    params = {}
    for layer in range(NUM_LAYERS):
        in_size = DIM if layer == 0 else 2 * HIDDEN
        for d in range(2):  # 0 = forward, 1 = backward
            key, k1, k2, k3, k4 = jax.random.split(key, 5)
            w_ih = uinit(k1, (4 * HIDDEN, in_size), bound)
            w_hh = uinit(k2, (4 * HIDDEN, HIDDEN), bound)
            b_ih = uinit(k3, (4 * HIDDEN,), bound)
            b_hh = uinit(k4, (4 * HIDDEN,), bound)
            params[(layer, d)] = dict(
                wih_t=jnp.transpose(w_ih).astype(jnp.bfloat16),   # (in, 4H)
                whh_t=jnp.transpose(w_hh).astype(jnp.bfloat16),   # (H, 4H)
                bias=(b_ih + b_hh).reshape(1, 4 * HIDDEN),        # (1, 4H) f32
            )

    # variable-length token sequences (the `seq` argument of forward())
    rng = np.random.RandomState(0)
    seq_lens = [5, 9, 3, 7, 9, 2, 6, 4]               # B = 8 (full sublane tile)
    seq = [list(rng.randint(1, VOCAB_NUM, size=L).astype(np.int32)) for L in seq_lens]

    # Pallas forward
    ctx, (ht, ct) = sent_encoder_forward(seq, emb_table, params, PADDING_IDX,
                                         bilstm_layer_pallas, tt=TT)
    jax.block_until_ready((ctx, ht, ct))

    # pure-JAX reference check (same bf16-matmul / f32-state precision)
    ctx_r, (ht_r, ct_r) = sent_encoder_forward(seq, emb_table, params, PADDING_IDX,
                                               bilstm_layer_ref, tt=TT)
    np.testing.assert_allclose(np.asarray(ctx), np.asarray(ctx_r), atol=2e-3, rtol=2e-3)
    np.testing.assert_allclose(np.asarray(ht), np.asarray(ht_r), atol=2e-3, rtol=2e-3)
    np.testing.assert_allclose(np.asarray(ct), np.asarray(ct_r), atol=2e-3, rtol=2e-3)

    T = max(seq_lens)
    B = len(seq)
    assert ctx.shape == (T, B, 2 * HIDDEN)
    assert ht.shape == (NUM_LAYERS * 2, B, HIDDEN)
    assert ct.shape == (NUM_LAYERS * 2, B, HIDDEN)

    print("KERNEL_OK")
</pallas_src>

<mosaic_0001>
module attributes {stable_mosaic.version = 11 : i64} {
  func.func @kernel(%arg0: i32, %arg1: memref<4x8x1xf32, #tpu.memory_space<vmem>>, %arg2: memref<4x8x1xf32, #tpu.memory_space<vmem>>, %arg3: memref<4x8x64xbf16, #tpu.memory_space<vmem>>, %arg4: memref<4x8x64xbf16, #tpu.memory_space<vmem>>, %arg5: memref<64x512xbf16, #tpu.memory_space<vmem>>, %arg6: memref<128x512xbf16, #tpu.memory_space<vmem>>, %arg7: memref<1x512xf32, #tpu.memory_space<vmem>>, %arg8: memref<64x512xbf16, #tpu.memory_space<vmem>>, %arg9: memref<128x512xbf16, #tpu.memory_space<vmem>>, %arg10: memref<1x512xf32, #tpu.memory_space<vmem>>, %arg11: memref<4x8x128xf32, #tpu.memory_space<vmem>>, %arg12: memref<4x8x128xf32, #tpu.memory_space<vmem>>, %arg13: memref<2x8x128xf32, #tpu.memory_space<vmem>>, %arg14: memref<2x8x128xf32, #tpu.memory_space<vmem>>) attributes {dimension_semantics = [#tpu.dimension_semantics<arbitrary>], iteration_bounds = array<i64: 3>, scalar_prefetch = 0 : i64, scratch_operands = 0 : i64, tpu.core_type = #tpu.core_type<tc>, window_params = [{transform_indices = @transform_0, window_bounds = array<i64: 4, 8, 1>}, {transform_indices = @transform_1, window_bounds = array<i64: 4, 8, 1>}, {transform_indices = @transform_2, window_bounds = array<i64: 4, 8, 64>}, {transform_indices = @transform_3, window_bounds = array<i64: 4, 8, 64>}, {pipeline_mode = #tpu.pipeline_mode<synchronous>, transform_indices = @transform_4, window_bounds = array<i64: 64, 512>}, {pipeline_mode = #tpu.pipeline_mode<synchronous>, transform_indices = @transform_5, window_bounds = array<i64: 128, 512>}, {pipeline_mode = #tpu.pipeline_mode<synchronous>, transform_indices = @transform_6, window_bounds = array<i64: 1, 512>}, {pipeline_mode = #tpu.pipeline_mode<synchronous>, transform_indices = @transform_7, window_bounds = array<i64: 64, 512>}, {pipeline_mode = #tpu.pipeline_mode<synchronous>, transform_indices = @transform_8, window_bounds = array<i64: 128, 512>}, {pipeline_mode = #tpu.pipeline_mode<synchronous>, transform_indices = @transform_9, window_bounds = array<i64: 1, 512>}, {transform_indices = @transform_10, window_bounds = array<i64: 4, 8, 128>}, {transform_indices = @transform_11, window_bounds = array<i64: 4, 8, 128>}, {pipeline_mode = #tpu.pipeline_mode<synchronous>, transform_indices = @transform_12, window_bounds = array<i64: 2, 8, 128>}, {pipeline_mode = #tpu.pipeline_mode<synchronous>, transform_indices = @transform_13, window_bounds = array<i64: 2, 8, 128>}]} {
    %c0_i32 = arith.constant 0 : i32
    %0 = arith.cmpi eq, %arg0, %c0_i32 : i32
    %1 = arith.extui %0 : i1 to i32
    %c0_i32_0 = arith.constant 0 : i32
    %2 = arith.cmpi ne, %1, %c0_i32_0 : i32
    scf.if %2 {
      %cst_196 = arith.constant 0.000000e+00 : f32
      %447 = vector.broadcast %cst_196 : f32 to vector<2x8x128xf32>
      %c0_197 = arith.constant 0 : index
      %c0_198 = arith.constant 0 : index
      %c0_199 = arith.constant 0 : index
      %448 = vector.load %arg13[%c0_197, %c0_198, %c0_199] : memref<2x8x128xf32, #tpu.memory_space<vmem>>, vector<2x8x128xf32>
      tpu.vector_store %arg13[%c0_197, %c0_198, %c0_199], %447 {strides = array<i32>} : memref<2x8x128xf32, #tpu.memory_space<vmem>>, vector<2x8x128xf32>,
      %cst_200 = arith.constant 0.000000e+00 : f32
      %449 = vector.broadcast %cst_200 : f32 to vector<2x8x128xf32>
      %c0_201 = arith.constant 0 : index
      %c0_202 = arith.constant 0 : index
      %c0_203 = arith.constant 0 : index
      %450 = vector.load %arg14[%c0_201, %c0_202, %c0_203] : memref<2x8x128xf32, #tpu.memory_space<vmem>>, vector<2x8x128xf32>
      tpu.vector_store %arg14[%c0_201, %c0_202, %c0_203], %449 {strides = array<i32>} : memref<2x8x128xf32, #tpu.memory_space<vmem>>, vector<2x8x128xf32>,
    } else {
    }
    %c0 = arith.constant 0 : index
    %c0_1 = arith.constant 0 : index
    %c0_2 = arith.constant 0 : index
    %3 = vector.load %arg13[%c0, %c0_1, %c0_2] : memref<2x8x128xf32, #tpu.memory_space<vmem>>, vector<1x8x128xf32>
    %4 = vector.shape_cast %3 : vector<1x8x128xf32> to vector<8x128xf32>
    %c0_3 = arith.constant 0 : index
    %c0_4 = arith.constant 0 : index
    %c0_5 = arith.constant 0 : index
    %5 = vector.load %arg14[%c0_3, %c0_4, %c0_5] : memref<2x8x128xf32, #tpu.memory_space<vmem>>, vector<1x8x128xf32>
    %6 = vector.shape_cast %5 : vector<1x8x128xf32> to vector<8x128xf32>
    %c1 = arith.constant 1 : index
    %c0_6 = arith.constant 0 : index
    %c0_7 = arith.constant 0 : index
    %7 = vector.load %arg13[%c1, %c0_6, %c0_7] : memref<2x8x128xf32, #tpu.memory_space<vmem>>, vector<1x8x128xf32>
    %8 = vector.shape_cast %7 : vector<1x8x128xf32> to vector<8x128xf32>
    %c1_8 = arith.constant 1 : index
    %c0_9 = arith.constant 0 : index
    %c0_10 = arith.constant 0 : index
    %9 = vector.load %arg14[%c1_8, %c0_9, %c0_10] : memref<2x8x128xf32, #tpu.memory_space<vmem>>, vector<1x8x128xf32>
    %10 = vector.shape_cast %9 : vector<1x8x128xf32> to vector<8x128xf32>
    %c0_11 = arith.constant 0 : index
    %c0_12 = arith.constant 0 : index
    %c0_13 = arith.constant 0 : index
    %11 = vector.load %arg1[%c0_11, %c0_12, %c0_13] : memref<4x8x1xf32, #tpu.memory_space<vmem>>, vector<1x8x1xf32>
    %12 = vector.shape_cast %11 : vector<1x8x1xf32> to vector<8x1xf32>
    %cst = arith.constant 5.000000e-01 : f32
    %13 = vector.broadcast %cst : f32 to vector<8x1xf32>
    %14 = arith.cmpf ogt, %12, %13 : vector<8x1xf32>
    %c0_14 = arith.constant 0 : index
    %c0_15 = arith.constant 0 : index
    %c0_16 = arith.constant 0 : index
    %15 = vector.load %arg3[%c0_14, %c0_15, %c0_16] : memref<4x8x64xbf16, #tpu.memory_space<vmem>>, vector<1x8x64xbf16>
    %16 = vector.shape_cast %15 : vector<1x8x64xbf16> to vector<8x64xbf16>
    %c0_17 = arith.constant 0 : index
    %c0_18 = arith.constant 0 : index
    %17 = vector.load %arg5[%c0_17, %c0_18] : memref<64x512xbf16, #tpu.memory_space<vmem>>, vector<64x512xbf16>
    %cst_19 = arith.constant dense<0.000000e+00> : vector<8x512xf32>
    %18 = tpu.matmul %16, %17, %cst_19 {dimension_numbers = #tpu.dot_dimension_numbers<[1], [0], [0], [1], [0, 0, 1, 1], [], []>} : vector<8x64xbf16>, vector<64x512xbf16>, vector<8x512xf32> -> vector<8x512xf32>
    %19 = arith.truncf %4 : vector<8x128xf32> to vector<8x128xbf16>
    %c0_20 = arith.constant 0 : index
    %c0_21 = arith.constant 0 : index
    %20 = vector.load %arg6[%c0_20, %c0_21] : memref<128x512xbf16, #tpu.memory_space<vmem>>, vector<128x512xbf16>
    %cst_22 = arith.constant dense<0.000000e+00> : vector<8x512xf32>
    %21 = tpu.matmul %19, %20, %cst_22 {dimension_numbers = #tpu.dot_dimension_numbers<[1], [0], [0], [1], [0, 0, 1, 1], [], []>} : vector<8x128xbf16>, vector<128x512xbf16>, vector<8x512xf32> -> vector<8x512xf32>
    %22 = arith.addf %18, %21 : vector<8x512xf32>
    %c0_23 = arith.constant 0 : index
    %c0_24 = arith.constant 0 : index
    %23 = vector.load %arg7[%c0_23, %c0_24] : memref<1x512xf32, #tpu.memory_space<vmem>>, vector<1x512xf32>
    %24 = vector.broadcast %23 : vector<1x512xf32> to vector<8x512xf32>
    %25 = arith.addf %22, %24 : vector<8x512xf32>
    %26 = vector.extract_strided_slice %25 {offsets = [0, 0], sizes = [8, 128], strides = [1, 1]} : vector<8x512xf32> to vector<8x128xf32>
    %27 = arith.negf %26 : vector<8x128xf32>
    %28 = math.exp %27 : vector<8x128xf32>
    %cst_25 = arith.constant 1.000000e+00 : f32
    %29 = vector.broadcast %cst_25 : f32 to vector<8x128xf32>
    %30 = arith.addf %29, %28 : vector<8x128xf32>
    %31 = arith.divf %29, %30 : vector<8x128xf32>
    %32 = vector.extract_strided_slice %25 {offsets = [0, 128], sizes = [8, 128], strides = [1, 1]} : vector<8x512xf32> to vector<8x128xf32>
    %33 = arith.negf %32 : vector<8x128xf32>
    %34 = math.exp %33 : vector<8x128xf32>
    %cst_26 = arith.constant 1.000000e+00 : f32
    %35 = vector.broadcast %cst_26 : f32 to vector<8x128xf32>
    %36 = arith.addf %35, %34 : vector<8x128xf32>
    %37 = arith.divf %35, %36 : vector<8x128xf32>
    %38 = vector.extract_strided_slice %25 {offsets = [0, 256], sizes = [8, 128], strides = [1, 1]} : vector<8x512xf32> to vector<8x128xf32>
    %39 = math.tanh %38 : vector<8x128xf32>
    %40 = vector.extract_strided_slice %25 {offsets = [0, 384], sizes = [8, 128], strides = [1, 1]} : vector<8x512xf32> to vector<8x128xf32>
    %41 = arith.negf %40 : vector<8x128xf32>
    %42 = math.exp %41 : vector<8x128xf32>
    %cst_27 = arith.constant 1.000000e+00 : f32
    %43 = vector.broadcast %cst_27 : f32 to vector<8x128xf32>
    %44 = arith.addf %43, %42 : vector<8x128xf32>
    %45 = arith.divf %43, %44 : vector<8x128xf32>
    %46 = arith.mulf %37, %6 : vector<8x128xf32>
    %47 = arith.mulf %31, %39 : vector<8x128xf32>
    %48 = arith.addf %46, %47 : vector<8x128xf32>
    %49 = math.tanh %48 : vector<8x128xf32>
    %50 = arith.mulf %45, %49 : vector<8x128xf32>
    %cst_28 = arith.constant 0.000000e+00 : f32
    %51 = vector.shape_cast %14 : vector<8x1xi1> to vector<8x1xi1>
    %52 = vector.broadcast %51 : vector<8x1xi1> to vector<8x128xi1>
    %53 = vector.broadcast %cst_28 : f32 to vector<8x128xf32>
    %54 = arith.select %52, %50, %53 : vector<8x128xi1>, vector<8x128xf32>
    %c0_29 = arith.constant 0 : index
    %c0_30 = arith.constant 0 : index
    %c0_31 = arith.constant 0 : index
    %55 = vector.load %arg11[%c0_29, %c0_30, %c0_31] : memref<4x8x128xf32, #tpu.memory_space<vmem>>, vector<1x8x128xf32>
    %56 = vector.shape_cast %55 : vector<1x8x128xf32> to vector<8x128xf32>
    %57 = vector.shape_cast %54 : vector<8x128xf32> to vector<1x8x128xf32>
    tpu.vector_store %arg11[%c0_29, %c0_30, %c0_31], %57 {strides = array<i32>} : memref<4x8x128xf32, #tpu.memory_space<vmem>>, vector<1x8x128xf32>,
    %58 = vector.shape_cast %14 : vector<8x1xi1> to vector<8x1xi1>
    %59 = vector.broadcast %58 : vector<8x1xi1> to vector<8x128xi1>
    %60 = arith.select %59, %50, %4 : vector<8x128xi1>, vector<8x128xf32>
    %61 = vector.shape_cast %14 : vector<8x1xi1> to vector<8x1xi1>
    %62 = vector.broadcast %61 : vector<8x1xi1> to vector<8x128xi1>
    %63 = arith.select %62, %48, %6 : vector<8x128xi1>, vector<8x128xf32>
    %c3 = arith.constant 3 : index
    %c0_32 = arith.constant 0 : index
    %c0_33 = arith.constant 0 : index
    %64 = vector.load %arg2[%c3, %c0_32, %c0_33] : memref<4x8x1xf32, #tpu.memory_space<vmem>>, vector<1x8x1xf32>
    %65 = vector.shape_cast %64 : vector<1x8x1xf32> to vector<8x1xf32>
    %cst_34 = arith.constant 5.000000e-01 : f32
    %66 = vector.broadcast %cst_34 : f32 to vector<8x1xf32>
    %67 = arith.cmpf ogt, %65, %66 : vector<8x1xf32>
    %c3_35 = arith.constant 3 : index
    %c0_36 = arith.constant 0 : index
    %c0_37 = arith.constant 0 : index
    %68 = vector.load %arg4[%c3_35, %c0_36, %c0_37] : memref<4x8x64xbf16, #tpu.memory_space<vmem>>, vector<1x8x64xbf16>
    %69 = vector.shape_cast %68 : vector<1x8x64xbf16> to vector<8x64xbf16>
    %c0_38 = arith.constant 0 : index
    %c0_39 = arith.constant 0 : index
    %70 = vector.load %arg8[%c0_38, %c0_39] : memref<64x512xbf16, #tpu.memory_space<vmem>>, vector<64x512xbf16>
    %cst_40 = arith.constant dense<0.000000e+00> : vector<8x512xf32>
    %71 = tpu.matmul %69, %70, %cst_40 {dimension_numbers = #tpu.dot_dimension_numbers<[1], [0], [0], [1], [0, 0, 1, 1], [], []>} : vector<8x64xbf16>, vector<64x512xbf16>, vector<8x512xf32> -> vector<8x512xf32>
    %72 = arith.truncf %8 : vector<8x128xf32> to vector<8x128xbf16>
    %c0_41 = arith.constant 0 : index
    %c0_42 = arith.constant 0 : index
    %73 = vector.load %arg9[%c0_41, %c0_42] : memref<128x512xbf16, #tpu.memory_space<vmem>>, vector<128x512xbf16>
    %cst_43 = arith.constant dense<0.000000e+00> : vector<8x512xf32>
    %74 = tpu.matmul %72, %73, %cst_43 {dimension_numbers = #tpu.dot_dimension_numbers<[1], [0], [0], [1], [0, 0, 1, 1], [], []>} : vector<8x128xbf16>, vector<128x512xbf16>, vector<8x512xf32> -> vector<8x512xf32>
    %75 = arith.addf %71, %74 : vector<8x512xf32>
    %c0_44 = arith.constant 0 : index
    %c0_45 = arith.constant 0 : index
    %76 = vector.load %arg10[%c0_44, %c0_45] : memref<1x512xf32, #tpu.memory_space<vmem>>, vector<1x512xf32>
    %77 = vector.broadcast %76 : vector<1x512xf32> to vector<8x512xf32>
    %78 = arith.addf %75, %77 : vector<8x512xf32>
    %79 = vector.extract_strided_slice %78 {offsets = [0, 0], sizes = [8, 128], strides = [1, 1]} : vector<8x512xf32> to vector<8x128xf32>
    %80 = arith.negf %79 : vector<8x128xf32>
    %81 = math.exp %80 : vector<8x128xf32>
    %cst_46 = arith.constant 1.000000e+00 : f32
    %82 = vector.broadcast %cst_46 : f32 to vector<8x128xf32>
    %83 = arith.addf %82, %81 : vector<8x128xf32>
    %84 = arith.divf %82, %83 : vector<8x128xf32>
    %85 = vector.extract_strided_slice %78 {offsets = [0, 128], sizes = [8, 128], strides = [1, 1]} : vector<8x512xf32> to vector<8x128xf32>
    %86 = arith.negf %85 : vector<8x128xf32>
    %87 = math.exp %86 : vector<8x128xf32>
    %cst_47 = arith.constant 1.000000e+00 : f32
    %88 = vector.broadcast %cst_47 : f32 to vector<8x128xf32>
    %89 = arith.addf %88, %87 : vector<8x128xf32>
    %90 = arith.divf %88, %89 : vector<8x128xf32>
    %91 = vector.extract_strided_slice %78 {offsets = [0, 256], sizes = [8, 128], strides = [1, 1]} : vector<8x512xf32> to vector<8x128xf32>
    %92 = math.tanh %91 : vector<8x128xf32>
    %93 = vector.extract_strided_slice %78 {offsets = [0, 384], sizes = [8, 128], strides = [1, 1]} : vector<8x512xf32> to vector<8x128xf32>
    %94 = arith.negf %93 : vector<8x128xf32>
    %95 = math.exp %94 : vector<8x128xf32>
    %cst_48 = arith.constant 1.000000e+00 : f32
    %96 = vector.broadcast %cst_48 : f32 to vector<8x128xf32>
    %97 = arith.addf %96, %95 : vector<8x128xf32>
    %98 = arith.divf %96, %97 : vector<8x128xf32>
    %99 = arith.mulf %90, %10 : vector<8x128xf32>
    %100 = arith.mulf %84, %92 : vector<8x128xf32>
    %101 = arith.addf %99, %100 : vector<8x128xf32>
    %102 = math.tanh %101 : vector<8x128xf32>
    %103 = arith.mulf %98, %102 : vector<8x128xf32>
    %cst_49 = arith.constant 0.000000e+00 : f32
    %104 = vector.shape_cast %67 : vector<8x1xi1> to vector<8x1xi1>
    %105 = vector.broadcast %104 : vector<8x1xi1> to vector<8x128xi1>
    %106 = vector.broadcast %cst_49 : f32 to vector<8x128xf32>
    %107 = arith.select %105, %103, %106 : vector<8x128xi1>, vector<8x128xf32>
    %c3_50 = arith.constant 3 : index
    %c0_51 = arith.constant 0 : index
    %c0_52 = arith.constant 0 : index
    %108 = vector.load %arg12[%c3_50, %c0_51, %c0_52] : memref<4x8x128xf32, #tpu.memory_space<vmem>>, vector<1x8x128xf32>
    %109 = vector.shape_cast %108 : vector<1x8x128xf32> to vector<8x128xf32>
    %110 = vector.shape_cast %107 : vector<8x128xf32> to vector<1x8x128xf32>
    tpu.vector_store %arg12[%c3_50, %c0_51, %c0_52], %110 {strides = array<i32>} : memref<4x8x128xf32, #tpu.memory_space<vmem>>, vector<1x8x128xf32>,
    %111 = vector.shape_cast %67 : vector<8x1xi1> to vector<8x1xi1>
    %112 = vector.broadcast %111 : vector<8x1xi1> to vector<8x128xi1>
    %113 = arith.select %112, %103, %8 : vector<8x128xi1>, vector<8x128xf32>
    %114 = vector.shape_cast %67 : vector<8x1xi1> to vector<8x1xi1>
    %115 = vector.broadcast %114 : vector<8x1xi1> to vector<8x128xi1>
    %116 = arith.select %115, %101, %10 : vector<8x128xi1>, vector<8x128xf32>
    %c1_53 = arith.constant 1 : index
    %c0_54 = arith.constant 0 : index
    %c0_55 = arith.constant 0 : index
    %117 = vector.load %arg1[%c1_53, %c0_54, %c0_55] : memref<4x8x1xf32, #tpu.memory_space<vmem>>, vector<1x8x1xf32>
    %118 = vector.shape_cast %117 : vector<1x8x1xf32> to vector<8x1xf32>
    %cst_56 = arith.constant 5.000000e-01 : f32
    %119 = vector.broadcast %cst_56 : f32 to vector<8x1xf32>
    %120 = arith.cmpf ogt, %118, %119 : vector<8x1xf32>
    %c1_57 = arith.constant 1 : index
    %c0_58 = arith.constant 0 : index
    %c0_59 = arith.constant 0 : index
    %121 = vector.load %arg3[%c1_57, %c0_58, %c0_59] : memref<4x8x64xbf16, #tpu.memory_space<vmem>>, vector<1x8x64xbf16>
    %122 = vector.shape_cast %121 : vector<1x8x64xbf16> to vector<8x64xbf16>
    %c0_60 = arith.constant 0 : index
    %c0_61 = arith.constant 0 : index
    %123 = vector.load %arg5[%c0_60, %c0_61] : memref<64x512xbf16, #tpu.memory_space<vmem>>, vector<64x512xbf16>
    %cst_62 = arith.constant dense<0.000000e+00> : vector<8x512xf32>
    %124 = tpu.matmul %122, %123, %cst_62 {dimension_numbers = #tpu.dot_dimension_numbers<[1], [0], [0], [1], [0, 0, 1, 1], [], []>} : vector<8x64xbf16>, vector<64x512xbf16>, vector<8x512xf32> -> vector<8x512xf32>
    %125 = arith.truncf %60 : vector<8x128xf32> to vector<8x128xbf16>
    %c0_63 = arith.constant 0 : index
    %c0_64 = arith.constant 0 : index
    %126 = vector.load %arg6[%c0_63, %c0_64] : memref<128x512xbf16, #tpu.memory_space<vmem>>, vector<128x512xbf16>
    %cst_65 = arith.constant dense<0.000000e+00> : vector<8x512xf32>
    %127 = tpu.matmul %125, %126, %cst_65 {dimension_numbers = #tpu.dot_dimension_numbers<[1], [0], [0], [1], [0, 0, 1, 1], [], []>} : vector<8x128xbf16>, vector<128x512xbf16>, vector<8x512xf32> -> vector<8x512xf32>
    %128 = arith.addf %124, %127 : vector<8x512xf32>
    %c0_66 = arith.constant 0 : index
    %c0_67 = arith.constant 0 : index
    %129 = vector.load %arg7[%c0_66, %c0_67] : memref<1x512xf32, #tpu.memory_space<vmem>>, vector<1x512xf32>
    %130 = vector.broadcast %129 : vector<1x512xf32> to vector<8x512xf32>
    %131 = arith.addf %128, %130 : vector<8x512xf32>
    %132 = vector.extract_strided_slice %131 {offsets = [0, 0], sizes = [8, 128], strides = [1, 1]} : vector<8x512xf32> to vector<8x128xf32>
    %133 = arith.negf %132 : vector<8x128xf32>
    %134 = math.exp %133 : vector<8x128xf32>
    %cst_68 = arith.constant 1.000000e+00 : f32
    %135 = vector.broadcast %cst_68 : f32 to vector<8x128xf32>
    %136 = arith.addf %135, %134 : vector<8x128xf32>
    %137 = arith.divf %135, %136 : vector<8x128xf32>
    %138 = vector.extract_strided_slice %131 {offsets = [0, 128], sizes = [8, 128], strides = [1, 1]} : vector<8x512xf32> to vector<8x128xf32>
    %139 = arith.negf %138 : vector<8x128xf32>
    %140 = math.exp %139 : vector<8x128xf32>
    %cst_69 = arith.constant 1.000000e+00 : f32
    %141 = vector.broadcast %cst_69 : f32 to vector<8x128xf32>
    %142 = arith.addf %141, %140 : vector<8x128xf32>
    %143 = arith.divf %141, %142 : vector<8x128xf32>
    %144 = vector.extract_strided_slice %131 {offsets = [0, 256], sizes = [8, 128], strides = [1, 1]} : vector<8x512xf32> to vector<8x128xf32>
    %145 = math.tanh %144 : vector<8x128xf32>
    %146 = vector.extract_strided_slice %131 {offsets = [0, 384], sizes = [8, 128], strides = [1, 1]} : vector<8x512xf32> to vector<8x128xf32>
    %147 = arith.negf %146 : vector<8x128xf32>
    %148 = math.exp %147 : vector<8x128xf32>
    %cst_70 = arith.constant 1.000000e+00 : f32
    %149 = vector.broadcast %cst_70 : f32 to vector<8x128xf32>
    %150 = arith.addf %149, %148 : vector<8x128xf32>
    %151 = arith.divf %149, %150 : vector<8x128xf32>
    %152 = arith.mulf %143, %63 : vector<8x128xf32>
    %153 = arith.mulf %137, %145 : vector<8x128xf32>
    %154 = arith.addf %152, %153 : vector<8x128xf32>
    %155 = math.tanh %154 : vector<8x128xf32>
    %156 = arith.mulf %151, %155 : vector<8x128xf32>
    %cst_71 = arith.constant 0.000000e+00 : f32
    %157 = vector.shape_cast %120 : vector<8x1xi1> to vector<8x1xi1>
    %158 = vector.broadcast %157 : vector<8x1xi1> to vector<8x128xi1>
    %159 = vector.broadcast %cst_71 : f32 to vector<8x128xf32>
    %160 = arith.select %158, %156, %159 : vector<8x128xi1>, vector<8x128xf32>
    %c1_72 = arith.constant 1 : index
    %c0_73 = arith.constant 0 : index
    %c0_74 = arith.constant 0 : index
    %161 = vector.load %arg11[%c1_72, %c0_73, %c0_74] : memref<4x8x128xf32, #tpu.memory_space<vmem>>, vector<1x8x128xf32>
    %162 = vector.shape_cast %161 : vector<1x8x128xf32> to vector<8x128xf32>
    %163 = vector.shape_cast %160 : vector<8x128xf32> to vector<1x8x128xf32>
    tpu.vector_store %arg11[%c1_72, %c0_73, %c0_74], %163 {strides = array<i32>} : memref<4x8x128xf32, #tpu.memory_space<vmem>>, vector<1x8x128xf32>,
    %164 = vector.shape_cast %120 : vector<8x1xi1> to vector<8x1xi1>
    %165 = vector.broadcast %164 : vector<8x1xi1> to vector<8x128xi1>
    %166 = arith.select %165, %156, %60 : vector<8x128xi1>, vector<8x128xf32>
    %167 = vector.shape_cast %120 : vector<8x1xi1> to vector<8x1xi1>
    %168 = vector.broadcast %167 : vector<8x1xi1> to vector<8x128xi1>
    %169 = arith.select %168, %154, %63 : vector<8x128xi1>, vector<8x128xf32>
    %c2 = arith.constant 2 : index
    %c0_75 = arith.constant 0 : index
    %c0_76 = arith.constant 0 : index
    %170 = vector.load %arg2[%c2, %c0_75, %c0_76] : memref<4x8x1xf32, #tpu.memory_space<vmem>>, vector<1x8x1xf32>
    %171 = vector.shape_cast %170 : vector<1x8x1xf32> to vector<8x1xf32>
    %cst_77 = arith.constant 5.000000e-01 : f32
    %172 = vector.broadcast %cst_77 : f32 to vector<8x1xf32>
    %173 = arith.cmpf ogt, %171, %172 : vector<8x1xf32>
    %c2_78 = arith.constant 2 : index
    %c0_79 = arith.constant 0 : index
    %c0_80 = arith.constant 0 : index
    %174 = vector.load %arg4[%c2_78, %c0_79, %c0_80] : memref<4x8x64xbf16, #tpu.memory_space<vmem>>, vector<1x8x64xbf16>
    %175 = vector.shape_cast %174 : vector<1x8x64xbf16> to vector<8x64xbf16>
    %c0_81 = arith.constant 0 : index
    %c0_82 = arith.constant 0 : index
    %176 = vector.load %arg8[%c0_81, %c0_82] : memref<64x512xbf16, #tpu.memory_space<vmem>>, vector<64x512xbf16>
    %cst_83 = arith.constant dense<0.000000e+00> : vector<8x512xf32>
    %177 = tpu.matmul %175, %176, %cst_83 {dimension_numbers = #tpu.dot_dimension_numbers<[1], [0], [0], [1], [0, 0, 1, 1], [], []>} : vector<8x64xbf16>, vector<64x512xbf16>, vector<8x512xf32> -> vector<8x512xf32>
    %178 = arith.truncf %113 : vector<8x128xf32> to vector<8x128xbf16>
    %c0_84 = arith.constant 0 : index
    %c0_85 = arith.constant 0 : index
    %179 = vector.load %arg9[%c0_84, %c0_85] : memref<128x512xbf16, #tpu.memory_space<vmem>>, vector<128x512xbf16>
    %cst_86 = arith.constant dense<0.000000e+00> : vector<8x512xf32>
    %180 = tpu.matmul %178, %179, %cst_86 {dimension_numbers = #tpu.dot_dimension_numbers<[1], [0], [0], [1], [0, 0, 1, 1], [], []>} : vector<8x128xbf16>, vector<128x512xbf16>, vector<8x512xf32> -> vector<8x512xf32>
    %181 = arith.addf %177, %180 : vector<8x512xf32>
    %c0_87 = arith.constant 0 : index
    %c0_88 = arith.constant 0 : index
    %182 = vector.load %arg10[%c0_87, %c0_88] : memref<1x512xf32, #tpu.memory_space<vmem>>, vector<1x512xf32>
    %183 = vector.broadcast %182 : vector<1x512xf32> to vector<8x512xf32>
    %184 = arith.addf %181, %183 : vector<8x512xf32>
    %185 = vector.extract_strided_slice %184 {offsets = [0, 0], sizes = [8, 128], strides = [1, 1]} : vector<8x512xf32> to vector<8x128xf32>
    %186 = arith.negf %185 : vector<8x128xf32>
    %187 = math.exp %186 : vector<8x128xf32>
    %cst_89 = arith.constant 1.000000e+00 : f32
    %188 = vector.broadcast %cst_89 : f32 to vector<8x128xf32>
    %189 = arith.addf %188, %187 : vector<8x128xf32>
    %190 = arith.divf %188, %189 : vector<8x128xf32>
    %191 = vector.extract_strided_slice %184 {offsets = [0, 128], sizes = [8, 128], strides = [1, 1]} : vector<8x512xf32> to vector<8x128xf32>
    %192 = arith.negf %191 : vector<8x128xf32>
    %193 = math.exp %192 : vector<8x128xf32>
    %cst_90 = arith.constant 1.000000e+00 : f32
    %194 = vector.broadcast %cst_90 : f32 to vector<8x128xf32>
    %195 = arith.addf %194, %193 : vector<8x128xf32>
    %196 = arith.divf %194, %195 : vector<8x128xf32>
    %197 = vector.extract_strided_slice %184 {offsets = [0, 256], sizes = [8, 128], strides = [1, 1]} : vector<8x512xf32> to vector<8x128xf32>
    %198 = math.tanh %197 : vector<8x128xf32>
    %199 = vector.extract_strided_slice %184 {offsets = [0, 384], sizes = [8, 128], strides = [1, 1]} : vector<8x512xf32> to vector<8x128xf32>
    %200 = arith.negf %199 : vector<8x128xf32>
    %201 = math.exp %200 : vector<8x128xf32>
    %cst_91 = arith.constant 1.000000e+00 : f32
    %202 = vector.broadcast %cst_91 : f32 to vector<8x128xf32>
    %203 = arith.addf %202, %201 : vector<8x128xf32>
    %204 = arith.divf %202, %203 : vector<8x128xf32>
    %205 = arith.mulf %196, %116 : vector<8x128xf32>
    %206 = arith.mulf %190, %198 : vector<8x128xf32>
    %207 = arith.addf %205, %206 : vector<8x128xf32>
    %208 = math.tanh %207 : vector<8x128xf32>
    %209 = arith.mulf %204, %208 : vector<8x128xf32>
    %cst_92 = arith.constant 0.000000e+00 : f32
    %210 = vector.shape_cast %173 : vector<8x1xi1> to vector<8x1xi1>
    %211 = vector.broadcast %210 : vector<8x1xi1> to vector<8x128xi1>
    %212 = vector.broadcast %cst_92 : f32 to vector<8x128xf32>
    %213 = arith.select %211, %209, %212 : vector<8x128xi1>, vector<8x128xf32>
    %c2_93 = arith.constant 2 : index
    %c0_94 = arith.constant 0 : index
    %c0_95 = arith.constant 0 : index
    %214 = vector.load %arg12[%c2_93, %c0_94, %c0_95] : memref<4x8x128xf32, #tpu.memory_space<vmem>>, vector<1x8x128xf32>
    %215 = vector.shape_cast %214 : vector<1x8x128xf32> to vector<8x128xf32>
    %216 = vector.shape_cast %213 : vector<8x128xf32> to vector<1x8x128xf32>
    tpu.vector_store %arg12[%c2_93, %c0_94, %c0_95], %216 {strides = array<i32>} : memref<4x8x128xf32, #tpu.memory_space<vmem>>, vector<1x8x128xf32>,
    %217 = vector.shape_cast %173 : vector<8x1xi1> to vector<8x1xi1>
    %218 = vector.broadcast %217 : vector<8x1xi1> to vector<8x128xi1>
    %219 = arith.select %218, %209, %113 : vector<8x128xi1>, vector<8x128xf32>
    %220 = vector.shape_cast %173 : vector<8x1xi1> to vector<8x1xi1>
    %221 = vector.broadcast %220 : vector<8x1xi1> to vector<8x128xi1>
    %222 = arith.select %221, %207, %116 : vector<8x128xi1>, vector<8x128xf32>
    %c2_96 = arith.constant 2 : index
    %c0_97 = arith.constant 0 : index
    %c0_98 = arith.constant 0 : index
    %223 = vector.load %arg1[%c2_96, %c0_97, %c0_98] : memref<4x8x1xf32, #tpu.memory_space<vmem>>, vector<1x8x1xf32>
    %224 = vector.shape_cast %223 : vector<1x8x1xf32> to vector<8x1xf32>
    %cst_99 = arith.constant 5.000000e-01 : f32
    %225 = vector.broadcast %cst_99 : f32 to vector<8x1xf32>
    %226 = arith.cmpf ogt, %224, %225 : vector<8x1xf32>
    %c2_100 = arith.constant 2 : index
    %c0_101 = arith.constant 0 : index
    %c0_102 = arith.constant 0 : index
    %227 = vector.load %arg3[%c2_100, %c0_101, %c0_102] : memref<4x8x64xbf16, #tpu.memory_space<vmem>>, vector<1x8x64xbf16>
    %228 = vector.shape_cast %227 : vector<1x8x64xbf16> to vector<8x64xbf16>
    %c0_103 = arith.constant 0 : index
    %c0_104 = arith.constant 0 : index
    %229 = vector.load %arg5[%c0_103, %c0_104] : memref<64x512xbf16, #tpu.memory_space<vmem>>, vector<64x512xbf16>
    %cst_105 = arith.constant dense<0.000000e+00> : vector<8x512xf32>
    %230 = tpu.matmul %228, %229, %cst_105 {dimension_numbers = #tpu.dot_dimension_numbers<[1], [0], [0], [1], [0, 0, 1, 1], [], []>} : vector<8x64xbf16>, vector<64x512xbf16>, vector<8x512xf32> -> vector<8x512xf32>
    %231 = arith.truncf %166 : vector<8x128xf32> to vector<8x128xbf16>
    %c0_106 = arith.constant 0 : index
    %c0_107 = arith.constant 0 : index
    %232 = vector.load %arg6[%c0_106, %c0_107] : memref<128x512xbf16, #tpu.memory_space<vmem>>, vector<128x512xbf16>
    %cst_108 = arith.constant dense<0.000000e+00> : vector<8x512xf32>
    %233 = tpu.matmul %231, %232, %cst_108 {dimension_numbers = #tpu.dot_dimension_numbers<[1], [0], [0], [1], [0, 0, 1, 1], [], []>} : vector<8x128xbf16>, vector<128x512xbf16>, vector<8x512xf32> -> vector<8x512xf32>
    %234 = arith.addf %230, %233 : vector<8x512xf32>
    %c0_109 = arith.constant 0 : index
    %c0_110 = arith.constant 0 : index
    %235 = vector.load %arg7[%c0_109, %c0_110] : memref<1x512xf32, #tpu.memory_space<vmem>>, vector<1x512xf32>
    %236 = vector.broadcast %235 : vector<1x512xf32> to vector<8x512xf32>
    %237 = arith.addf %234, %236 : vector<8x512xf32>
    %238 = vector.extract_strided_slice %237 {offsets = [0, 0], sizes = [8, 128], strides = [1, 1]} : vector<8x512xf32> to vector<8x128xf32>
    %239 = arith.negf %238 : vector<8x128xf32>
    %240 = math.exp %239 : vector<8x128xf32>
    %cst_111 = arith.constant 1.000000e+00 : f32
    %241 = vector.broadcast %cst_111 : f32 to vector<8x128xf32>
    %242 = arith.addf %241, %240 : vector<8x128xf32>
    %243 = arith.divf %241, %242 : vector<8x128xf32>
    %244 = vector.extract_strided_slice %237 {offsets = [0, 128], sizes = [8, 128], strides = [1, 1]} : vector<8x512xf32> to vector<8x128xf32>
    %245 = arith.negf %244 : vector<8x128xf32>
    %246 = math.exp %245 : vector<8x128xf32>
    %cst_112 = arith.constant 1.000000e+00 : f32
    %247 = vector.broadcast %cst_112 : f32 to vector<8x128xf32>
    %248 = arith.addf %247, %246 : vector<8x128xf32>
    %249 = arith.divf %247, %248 : vector<8x128xf32>
    %250 = vector.extract_strided_slice %237 {offsets = [0, 256], sizes = [8, 128], strides = [1, 1]} : vector<8x512xf32> to vector<8x128xf32>
    %251 = math.tanh %250 : vector<8x128xf32>
    %252 = vector.extract_strided_slice %237 {offsets = [0, 384], sizes = [8, 128], strides = [1, 1]} : vector<8x512xf32> to vector<8x128xf32>
    %253 = arith.negf %252 : vector<8x128xf32>
    %254 = math.exp %253 : vector<8x128xf32>
    %cst_113 = arith.constant 1.000000e+00 : f32
    %255 = vector.broadcast %cst_113 : f32 to vector<8x128xf32>
    %256 = arith.addf %255, %254 : vector<8x128xf32>
    %257 = arith.divf %255, %256 : vector<8x128xf32>
    %258 = arith.mulf %249, %169 : vector<8x128xf32>
    %259 = arith.mulf %243, %251 : vector<8x128xf32>
    %260 = arith.addf %258, %259 : vector<8x128xf32>
    %261 = math.tanh %260 : vector<8x128xf32>
    %262 = arith.mulf %257, %261 : vector<8x128xf32>
    %cst_114 = arith.constant 0.000000e+00 : f32
    %263 = vector.shape_cast %226 : vector<8x1xi1> to vector<8x1xi1>
    %264 = vector.broadcast %263 : vector<8x1xi1> to vector<8x128xi1>
    %265 = vector.broadcast %cst_114 : f32 to vector<8x128xf32>
    %266 = arith.select %264, %262, %265 : vector<8x128xi1>, vector<8x128xf32>
    %c2_115 = arith.constant 2 : index
    %c0_116 = arith.constant 0 : index
    %c0_117 = arith.constant 0 : index
    %267 = vector.load %arg11[%c2_115, %c0_116, %c0_117] : memref<4x8x128xf32, #tpu.memory_space<vmem>>, vector<1x8x128xf32>
    %268 = vector.shape_cast %267 : vector<1x8x128xf32> to vector<8x128xf32>
    %269 = vector.shape_cast %266 : vector<8x128xf32> to vector<1x8x128xf32>
    tpu.vector_store %arg11[%c2_115, %c0_116, %c0_117], %269 {strides = array<i32>} : memref<4x8x128xf32, #tpu.memory_space<vmem>>, vector<1x8x128xf32>,
    %270 = vector.shape_cast %226 : vector<8x1xi1> to vector<8x1xi1>
    %271 = vector.broadcast %270 : vector<8x1xi1> to vector<8x128xi1>
    %272 = arith.select %271, %262, %166 : vector<8x128xi1>, vector<8x128xf32>
    %273 = vector.shape_cast %226 : vector<8x1xi1> to vector<8x1xi1>
    %274 = vector.broadcast %273 : vector<8x1xi1> to vector<8x128xi1>
    %275 = arith.select %274, %260, %169 : vector<8x128xi1>, vector<8x128xf32>
    %c1_118 = arith.constant 1 : index
    %c0_119 = arith.constant 0 : index
    %c0_120 = arith.constant 0 : index
    %276 = vector.load %arg2[%c1_118, %c0_119, %c0_120] : memref<4x8x1xf32, #tpu.memory_space<vmem>>, vector<1x8x1xf32>
    %277 = vector.shape_cast %276 : vector<1x8x1xf32> to vector<8x1xf32>
    %cst_121 = arith.constant 5.000000e-01 : f32
    %278 = vector.broadcast %cst_121 : f32 to vector<8x1xf32>
    %279 = arith.cmpf ogt, %277, %278 : vector<8x1xf32>
    %c1_122 = arith.constant 1 : index
    %c0_123 = arith.constant 0 : index
    %c0_124 = arith.constant 0 : index
    %280 = vector.load %arg4[%c1_122, %c0_123, %c0_124] : memref<4x8x64xbf16, #tpu.memory_space<vmem>>, vector<1x8x64xbf16>
    %281 = vector.shape_cast %280 : vector<1x8x64xbf16> to vector<8x64xbf16>
    %c0_125 = arith.constant 0 : index
    %c0_126 = arith.constant 0 : index
    %282 = vector.load %arg8[%c0_125, %c0_126] : memref<64x512xbf16, #tpu.memory_space<vmem>>, vector<64x512xbf16>
    %cst_127 = arith.constant dense<0.000000e+00> : vector<8x512xf32>
    %283 = tpu.matmul %281, %282, %cst_127 {dimension_numbers = #tpu.dot_dimension_numbers<[1], [0], [0], [1], [0, 0, 1, 1], [], []>} : vector<8x64xbf16>, vector<64x512xbf16>, vector<8x512xf32> -> vector<8x512xf32>
    %284 = arith.truncf %219 : vector<8x128xf32> to vector<8x128xbf16>
    %c0_128 = arith.constant 0 : index
    %c0_129 = arith.constant 0 : index
    %285 = vector.load %arg9[%c0_128, %c0_129] : memref<128x512xbf16, #tpu.memory_space<vmem>>, vector<128x512xbf16>
    %cst_130 = arith.constant dense<0.000000e+00> : vector<8x512xf32>
    %286 = tpu.matmul %284, %285, %cst_130 {dimension_numbers = #tpu.dot_dimension_numbers<[1], [0], [0], [1], [0, 0, 1, 1], [], []>} : vector<8x128xbf16>, vector<128x512xbf16>, vector<8x512xf32> -> vector<8x512xf32>
    %287 = arith.addf %283, %286 : vector<8x512xf32>
    %c0_131 = arith.constant 0 : index
    %c0_132 = arith.constant 0 : index
    %288 = vector.load %arg10[%c0_131, %c0_132] : memref<1x512xf32, #tpu.memory_space<vmem>>, vector<1x512xf32>
    %289 = vector.broadcast %288 : vector<1x512xf32> to vector<8x512xf32>
    %290 = arith.addf %287, %289 : vector<8x512xf32>
    %291 = vector.extract_strided_slice %290 {offsets = [0, 0], sizes = [8, 128], strides = [1, 1]} : vector<8x512xf32> to vector<8x128xf32>
    %292 = arith.negf %291 : vector<8x128xf32>
    %293 = math.exp %292 : vector<8x128xf32>
    %cst_133 = arith.constant 1.000000e+00 : f32
    %294 = vector.broadcast %cst_133 : f32 to vector<8x128xf32>
    %295 = arith.addf %294, %293 : vector<8x128xf32>
    %296 = arith.divf %294, %295 : vector<8x128xf32>
    %297 = vector.extract_strided_slice %290 {offsets = [0, 128], sizes = [8, 128], strides = [1, 1]} : vector<8x512xf32> to vector<8x128xf32>
    %298 = arith.negf %297 : vector<8x128xf32>
    %299 = math.exp %298 : vector<8x128xf32>
    %cst_134 = arith.constant 1.000000e+00 : f32
    %300 = vector.broadcast %cst_134 : f32 to vector<8x128xf32>
    %301 = arith.addf %300, %299 : vector<8x128xf32>
    %302 = arith.divf %300, %301 : vector<8x128xf32>
    %303 = vector.extract_strided_slice %290 {offsets = [0, 256], sizes = [8, 128], strides = [1, 1]} : vector<8x512xf32> to vector<8x128xf32>
    %304 = math.tanh %303 : vector<8x128xf32>
    %305 = vector.extract_strided_slice %290 {offsets = [0, 384], sizes = [8, 128], strides = [1, 1]} : vector<8x512xf32> to vector<8x128xf32>
    %306 = arith.negf %305 : vector<8x128xf32>
    %307 = math.exp %306 : vector<8x128xf32>
    %cst_135 = arith.constant 1.000000e+00 : f32
    %308 = vector.broadcast %cst_135 : f32 to vector<8x128xf32>
    %309 = arith.addf %308, %307 : vector<8x128xf32>
    %310 = arith.divf %308, %309 : vector<8x128xf32>
    %311 = arith.mulf %302, %222 : vector<8x128xf32>
    %312 = arith.mulf %296, %304 : vector<8x128xf32>
    %313 = arith.addf %311, %312 : vector<8x128xf32>
    %314 = math.tanh %313 : vector<8x128xf32>
    %315 = arith.mulf %310, %314 : vector<8x128xf32>
    %cst_136 = arith.constant 0.000000e+00 : f32
    %316 = vector.shape_cast %279 : vector<8x1xi1> to vector<8x1xi1>
    %317 = vector.broadcast %316 : vector<8x1xi1> to vector<8x128xi1>
    %318 = vector.broadcast %cst_136 : f32 to vector<8x128xf32>
    %319 = arith.select %317, %315, %318 : vector<8x128xi1>, vector<8x128xf32>
    %c1_137 = arith.constant 1 : index
    %c0_138 = arith.constant 0 : index
    %c0_139 = arith.constant 0 : index
    %320 = vector.load %arg12[%c1_137, %c0_138, %c0_139] : memref<4x8x128xf32, #tpu.memory_space<vmem>>, vector<1x8x128xf32>
    %321 = vector.shape_cast %320 : vector<1x8x128xf32> to vector<8x128xf32>
    %322 = vector.shape_cast %319 : vector<8x128xf32> to vector<1x8x128xf32>
    tpu.vector_store %arg12[%c1_137, %c0_138, %c0_139], %322 {strides = array<i32>} : memref<4x8x128xf32, #tpu.memory_space<vmem>>, vector<1x8x128xf32>,
    %323 = vector.shape_cast %279 : vector<8x1xi1> to vector<8x1xi1>
    %324 = vector.broadcast %323 : vector<8x1xi1> to vector<8x128xi1>
    %325 = arith.select %324, %315, %219 : vector<8x128xi1>, vector<8x128xf32>
    %326 = vector.shape_cast %279 : vector<8x1xi1> to vector<8x1xi1>
    %327 = vector.broadcast %326 : vector<8x1xi1> to vector<8x128xi1>
    %328 = arith.select %327, %313, %222 : vector<8x128xi1>, vector<8x128xf32>
    %c3_140 = arith.constant 3 : index
    %c0_141 = arith.constant 0 : index
    %c0_142 = arith.constant 0 : index
    %329 = vector.load %arg1[%c3_140, %c0_141, %c0_142] : memref<4x8x1xf32, #tpu.memory_space<vmem>>, vector<1x8x1xf32>
    %330 = vector.shape_cast %329 : vector<1x8x1xf32> to vector<8x1xf32>
    %cst_143 = arith.constant 5.000000e-01 : f32
    %331 = vector.broadcast %cst_143 : f32 to vector<8x1xf32>
    %332 = arith.cmpf ogt, %330, %331 : vector<8x1xf32>
    %c3_144 = arith.constant 3 : index
    %c0_145 = arith.constant 0 : index
    %c0_146 = arith.constant 0 : index
    %333 = vector.load %arg3[%c3_144, %c0_145, %c0_146] : memref<4x8x64xbf16, #tpu.memory_space<vmem>>, vector<1x8x64xbf16>
    %334 = vector.shape_cast %333 : vector<1x8x64xbf16> to vector<8x64xbf16>
    %c0_147 = arith.constant 0 : index
    %c0_148 = arith.constant 0 : index
    %335 = vector.load %arg5[%c0_147, %c0_148] : memref<64x512xbf16, #tpu.memory_space<vmem>>, vector<64x512xbf16>
    %cst_149 = arith.constant dense<0.000000e+00> : vector<8x512xf32>
    %336 = tpu.matmul %334, %335, %cst_149 {dimension_numbers = #tpu.dot_dimension_numbers<[1], [0], [0], [1], [0, 0, 1, 1], [], []>} : vector<8x64xbf16>, vector<64x512xbf16>, vector<8x512xf32> -> vector<8x512xf32>
    %337 = arith.truncf %272 : vector<8x128xf32> to vector<8x128xbf16>
    %c0_150 = arith.constant 0 : index
    %c0_151 = arith.constant 0 : index
    %338 = vector.load %arg6[%c0_150, %c0_151] : memref<128x512xbf16, #tpu.memory_space<vmem>>, vector<128x512xbf16>
    %cst_152 = arith.constant dense<0.000000e+00> : vector<8x512xf32>
    %339 = tpu.matmul %337, %338, %cst_152 {dimension_numbers = #tpu.dot_dimension_numbers<[1], [0], [0], [1], [0, 0, 1, 1], [], []>} : vector<8x128xbf16>, vector<128x512xbf16>, vector<8x512xf32> -> vector<8x512xf32>
    %340 = arith.addf %336, %339 : vector<8x512xf32>
    %c0_153 = arith.constant 0 : index
    %c0_154 = arith.constant 0 : index
    %341 = vector.load %arg7[%c0_153, %c0_154] : memref<1x512xf32, #tpu.memory_space<vmem>>, vector<1x512xf32>
    %342 = vector.broadcast %341 : vector<1x512xf32> to vector<8x512xf32>
    %343 = arith.addf %340, %342 : vector<8x512xf32>
    %344 = vector.extract_strided_slice %343 {offsets = [0, 0], sizes = [8, 128], strides = [1, 1]} : vector<8x512xf32> to vector<8x128xf32>
    %345 = arith.negf %344 : vector<8x128xf32>
    %346 = math.exp %345 : vector<8x128xf32>
    %cst_155 = arith.constant 1.000000e+00 : f32
    %347 = vector.broadcast %cst_155 : f32 to vector<8x128xf32>
    %348 = arith.addf %347, %346 : vector<8x128xf32>
    %349 = arith.divf %347, %348 : vector<8x128xf32>
    %350 = vector.extract_strided_slice %343 {offsets = [0, 128], sizes = [8, 128], strides = [1, 1]} : vector<8x512xf32> to vector<8x128xf32>
    %351 = arith.negf %350 : vector<8x128xf32>
    %352 = math.exp %351 : vector<8x128xf32>
    %cst_156 = arith.constant 1.000000e+00 : f32
    %353 = vector.broadcast %cst_156 : f32 to vector<8x128xf32>
    %354 = arith.addf %353, %352 : vector<8x128xf32>
    %355 = arith.divf %353, %354 : vector<8x128xf32>
    %356 = vector.extract_strided_slice %343 {offsets = [0, 256], sizes = [8, 128], strides = [1, 1]} : vector<8x512xf32> to vector<8x128xf32>
    %357 = math.tanh %356 : vector<8x128xf32>
    %358 = vector.extract_strided_slice %343 {offsets = [0, 384], sizes = [8, 128], strides = [1, 1]} : vector<8x512xf32> to vector<8x128xf32>
    %359 = arith.negf %358 : vector<8x128xf32>
    %360 = math.exp %359 : vector<8x128xf32>
    %cst_157 = arith.constant 1.000000e+00 : f32
    %361 = vector.broadcast %cst_157 : f32 to vector<8x128xf32>
    %362 = arith.addf %361, %360 : vector<8x128xf32>
    %363 = arith.divf %361, %362 : vector<8x128xf32>
    %364 = arith.mulf %355, %275 : vector<8x128xf32>
    %365 = arith.mulf %349, %357 : vector<8x128xf32>
    %366 = arith.addf %364, %365 : vector<8x128xf32>
    %367 = math.tanh %366 : vector<8x128xf32>
    %368 = arith.mulf %363, %367 : vector<8x128xf32>
    %cst_158 = arith.constant 0.000000e+00 : f32
    %369 = vector.shape_cast %332 : vector<8x1xi1> to vector<8x1xi1>
    %370 = vector.broadcast %369 : vector<8x1xi1> to vector<8x128xi1>
    %371 = vector.broadcast %cst_158 : f32 to vector<8x128xf32>
    %372 = arith.select %370, %368, %371 : vector<8x128xi1>, vector<8x128xf32>
    %c3_159 = arith.constant 3 : index
    %c0_160 = arith.constant 0 : index
    %c0_161 = arith.constant 0 : index
    %373 = vector.load %arg11[%c3_159, %c0_160, %c0_161] : memref<4x8x128xf32, #tpu.memory_space<vmem>>, vector<1x8x128xf32>
    %374 = vector.shape_cast %373 : vector<1x8x128xf32> to vector<8x128xf32>
    %375 = vector.shape_cast %372 : vector<8x128xf32> to vector<1x8x128xf32>
    tpu.vector_store %arg11[%c3_159, %c0_160, %c0_161], %375 {strides = array<i32>} : memref<4x8x128xf32, #tpu.memory_space<vmem>>, vector<1x8x128xf32>,
    %376 = vector.shape_cast %332 : vector<8x1xi1> to vector<8x1xi1>
    %377 = vector.broadcast %376 : vector<8x1xi1> to vector<8x128xi1>
    %378 = arith.select %377, %368, %272 : vector<8x128xi1>, vector<8x128xf32>
    %379 = vector.shape_cast %332 : vector<8x1xi1> to vector<8x1xi1>
    %380 = vector.broadcast %379 : vector<8x1xi1> to vector<8x128xi1>
    %381 = arith.select %380, %366, %275 : vector<8x128xi1>, vector<8x128xf32>
    %c0_162 = arith.constant 0 : index
    %c0_163 = arith.constant 0 : index
    %c0_164 = arith.constant 0 : index
    %382 = vector.load %arg2[%c0_162, %c0_163, %c0_164] : memref<4x8x1xf32, #tpu.memory_space<vmem>>, vector<1x8x1xf32>
    %383 = vector.shape_cast %382 : vector<1x8x1xf32> to vector<8x1xf32>
    %cst_165 = arith.constant 5.000000e-01 : f32
    %384 = vector.broadcast %cst_165 : f32 to vector<8x1xf32>
    %385 = arith.cmpf ogt, %383, %384 : vector<8x1xf32>
    %c0_166 = arith.constant 0 : index
    %c0_167 = arith.constant 0 : index
    %c0_168 = arith.constant 0 : index
    %386 = vector.load %arg4[%c0_166, %c0_167, %c0_168] : memref<4x8x64xbf16, #tpu.memory_space<vmem>>, vector<1x8x64xbf16>
    %387 = vector.shape_cast %386 : vector<1x8x64xbf16> to vector<8x64xbf16>
    %c0_169 = arith.constant 0 : index
    %c0_170 = arith.constant 0 : index
    %388 = vector.load %arg8[%c0_169, %c0_170] : memref<64x512xbf16, #tpu.memory_space<vmem>>, vector<64x512xbf16>
    %cst_171 = arith.constant dense<0.000000e+00> : vector<8x512xf32>
    %389 = tpu.matmul %387, %388, %cst_171 {dimension_numbers = #tpu.dot_dimension_numbers<[1], [0], [0], [1], [0, 0, 1, 1], [], []>} : vector<8x64xbf16>, vector<64x512xbf16>, vector<8x512xf32> -> vector<8x512xf32>
    %390 = arith.truncf %325 : vector<8x128xf32> to vector<8x128xbf16>
    %c0_172 = arith.constant 0 : index
    %c0_173 = arith.constant 0 : index
    %391 = vector.load %arg9[%c0_172, %c0_173] : memref<128x512xbf16, #tpu.memory_space<vmem>>, vector<128x512xbf16>
    %cst_174 = arith.constant dense<0.000000e+00> : vector<8x512xf32>
    %392 = tpu.matmul %390, %391, %cst_174 {dimension_numbers = #tpu.dot_dimension_numbers<[1], [0], [0], [1], [0, 0, 1, 1], [], []>} : vector<8x128xbf16>, vector<128x512xbf16>, vector<8x512xf32> -> vector<8x512xf32>
    %393 = arith.addf %389, %392 : vector<8x512xf32>
    %c0_175 = arith.constant 0 : index
    %c0_176 = arith.constant 0 : index
    %394 = vector.load %arg10[%c0_175, %c0_176] : memref<1x512xf32, #tpu.memory_space<vmem>>, vector<1x512xf32>
    %395 = vector.broadcast %394 : vector<1x512xf32> to vector<8x512xf32>
    %396 = arith.addf %393, %395 : vector<8x512xf32>
    %397 = vector.extract_strided_slice %396 {offsets = [0, 0], sizes = [8, 128], strides = [1, 1]} : vector<8x512xf32> to vector<8x128xf32>
    %398 = arith.negf %397 : vector<8x128xf32>
    %399 = math.exp %398 : vector<8x128xf32>
    %cst_177 = arith.constant 1.000000e+00 : f32
    %400 = vector.broadcast %cst_177 : f32 to vector<8x128xf32>
    %401 = arith.addf %400, %399 : vector<8x128xf32>
    %402 = arith.divf %400, %401 : vector<8x128xf32>
    %403 = vector.extract_strided_slice %396 {offsets = [0, 128], sizes = [8, 128], strides = [1, 1]} : vector<8x512xf32> to vector<8x128xf32>
    %404 = arith.negf %403 : vector<8x128xf32>
    %405 = math.exp %404 : vector<8x128xf32>
    %cst_178 = arith.constant 1.000000e+00 : f32
    %406 = vector.broadcast %cst_178 : f32 to vector<8x128xf32>
    %407 = arith.addf %406, %405 : vector<8x128xf32>
    %408 = arith.divf %406, %407 : vector<8x128xf32>
    %409 = vector.extract_strided_slice %396 {offsets = [0, 256], sizes = [8, 128], strides = [1, 1]} : vector<8x512xf32> to vector<8x128xf32>
    %410 = math.tanh %409 : vector<8x128xf32>
    %411 = vector.extract_strided_slice %396 {offsets = [0, 384], sizes = [8, 128], strides = [1, 1]} : vector<8x512xf32> to vector<8x128xf32>
    %412 = arith.negf %411 : vector<8x128xf32>
    %413 = math.exp %412 : vector<8x128xf32>
    %cst_179 = arith.constant 1.000000e+00 : f32
    %414 = vector.broadcast %cst_179 : f32 to vector<8x128xf32>
    %415 = arith.addf %414, %413 : vector<8x128xf32>
    %416 = arith.divf %414, %415 : vector<8x128xf32>
    %417 = arith.mulf %408, %328 : vector<8x128xf32>
    %418 = arith.mulf %402, %410 : vector<8x128xf32>
    %419 = arith.addf %417, %418 : vector<8x128xf32>
    %420 = math.tanh %419 : vector<8x128xf32>
    %421 = arith.mulf %416, %420 : vector<8x128xf32>
    %cst_180 = arith.constant 0.000000e+00 : f32
    %422 = vector.shape_cast %385 : vector<8x1xi1> to vector<8x1xi1>
    %423 = vector.broadcast %422 : vector<8x1xi1> to vector<8x128xi1>
    %424 = vector.broadcast %cst_180 : f32 to vector<8x128xf32>
    %425 = arith.select %423, %421, %424 : vector<8x128xi1>, vector<8x128xf32>
    %c0_181 = arith.constant 0 : index
    %c0_182 = arith.constant 0 : index
    %c0_183 = arith.constant 0 : index
    %426 = vector.load %arg12[%c0_181, %c0_182, %c0_183] : memref<4x8x128xf32, #tpu.memory_space<vmem>>, vector<1x8x128xf32>
    %427 = vector.shape_cast %426 : vector<1x8x128xf32> to vector<8x128xf32>
    %428 = vector.shape_cast %425 : vector<8x128xf32> to vector<1x8x128xf32>
    tpu.vector_store %arg12[%c0_181, %c0_182, %c0_183], %428 {strides = array<i32>} : memref<4x8x128xf32, #tpu.memory_space<vmem>>, vector<1x8x128xf32>,
    %429 = vector.shape_cast %385 : vector<8x1xi1> to vector<8x1xi1>
    %430 = vector.broadcast %429 : vector<8x1xi1> to vector<8x128xi1>
    %431 = arith.select %430, %421, %325 : vector<8x128xi1>, vector<8x128xf32>
    %432 = vector.shape_cast %385 : vector<8x1xi1> to vector<8x1xi1>
    %433 = vector.broadcast %432 : vector<8x1xi1> to vector<8x128xi1>
    %434 = arith.select %433, %419, %328 : vector<8x128xi1>, vector<8x128xf32>
    %c0_184 = arith.constant 0 : index
    %c0_185 = arith.constant 0 : index
    %c0_186 = arith.constant 0 : index
    %435 = vector.load %arg13[%c0_184, %c0_185, %c0_186] : memref<2x8x128xf32, #tpu.memory_space<vmem>>, vector<1x8x128xf32>
    %436 = vector.shape_cast %435 : vector<1x8x128xf32> to vector<8x128xf32>
    %437 = vector.shape_cast %378 : vector<8x128xf32> to vector<1x8x128xf32>
    tpu.vector_store %arg13[%c0_184, %c0_185, %c0_186], %437 {strides = array<i32>} : memref<2x8x128xf32, #tpu.memory_space<vmem>>, vector<1x8x128xf32>,
    %c1_187 = arith.constant 1 : index
    %c0_188 = arith.constant 0 : index
    %c0_189 = arith.constant 0 : index
    %438 = vector.load %arg13[%c1_187, %c0_188, %c0_189] : memref<2x8x128xf32, #tpu.memory_space<vmem>>, vector<1x8x128xf32>
    %439 = vector.shape_cast %438 : vector<1x8x128xf32> to vector<8x128xf32>
    %440 = vector.shape_cast %431 : vector<8x128xf32> to vector<1x8x128xf32>
    tpu.vector_store %arg13[%c1_187, %c0_188, %c0_189], %440 {strides = array<i32>} : memref<2x8x128xf32, #tpu.memory_space<vmem>>, vector<1x8x128xf32>,
    %c0_190 = arith.constant 0 : index
    %c0_191 = arith.constant 0 : index
    %c0_192 = arith.constant 0 : index
    %441 = vector.load %arg14[%c0_190, %c0_191, %c0_192] : memref<2x8x128xf32, #tpu.memory_space<vmem>>, vector<1x8x128xf32>
    %442 = vector.shape_cast %441 : vector<1x8x128xf32> to vector<8x128xf32>
    %443 = vector.shape_cast %381 : vector<8x128xf32> to vector<1x8x128xf32>
    tpu.vector_store %arg14[%c0_190, %c0_191, %c0_192], %443 {strides = array<i32>} : memref<2x8x128xf32, #tpu.memory_space<vmem>>, vector<1x8x128xf32>,
    %c1_193 = arith.constant 1 : index
    %c0_194 = arith.constant 0 : index
    %c0_195 = arith.constant 0 : index
    %444 = vector.load %arg14[%c1_193, %c0_194, %c0_195] : memref<2x8x128xf32, #tpu.memory_space<vmem>>, vector<1x8x128xf32>
    %445 = vector.shape_cast %444 : vector<1x8x128xf32> to vector<8x128xf32>
    %446 = vector.shape_cast %434 : vector<8x128xf32> to vector<1x8x128xf32>
    tpu.vector_store %arg14[%c1_193, %c0_194, %c0_195], %446 {strides = array<i32>} : memref<2x8x128xf32, #tpu.memory_space<vmem>>, vector<1x8x128xf32>,
    return
  }
  func.func @transform_0(%arg0: i32) -> (i32, i32, i32) {
    %c0_i32 = arith.constant 0 : i32
    %c0_i32_0 = arith.constant 0 : i32
    %c0_i32_1 = arith.constant 0 : i32
    return %arg0, %c0_i32, %c0_i32_0 : i32, i32, i32
  }
  func.func @transform_1(%arg0: i32) -> (i32, i32, i32) {
    %c2_i32 = arith.constant 2 : i32
    %0 = arith.subi %c2_i32, %arg0 : i32
    %c0_i32 = arith.constant 0 : i32
    %c0_i32_0 = arith.constant 0 : i32
    %c0_i32_1 = arith.constant 0 : i32
    return %0, %c0_i32, %c0_i32_0 : i32, i32, i32
  }
  func.func @transform_2(%arg0: i32) -> (i32, i32, i32) {
    %c0_i32 = arith.constant 0 : i32
    %c0_i32_0 = arith.constant 0 : i32
    %c0_i32_1 = arith.constant 0 : i32
    return %arg0, %c0_i32, %c0_i32_0 : i32, i32, i32
  }
  func.func @transform_3(%arg0: i32) -> (i32, i32, i32) {
    %c2_i32 = arith.constant 2 : i32
    %0 = arith.subi %c2_i32, %arg0 : i32
    %c0_i32 = arith.constant 0 : i32
    %c0_i32_0 = arith.constant 0 : i32
    %c0_i32_1 = arith.constant 0 : i32
    return %0, %c0_i32, %c0_i32_0 : i32, i32, i32
  }
  func.func @transform_4(%arg0: i32) -> (i32, i32) {
    %c0_i32 = arith.constant 0 : i32
    %c0_i32_0 = arith.constant 0 : i32
    %c0_i32_1 = arith.constant 0 : i32
    return %c0_i32, %c0_i32_0 : i32, i32
  }
  func.func @transform_5(%arg0: i32) -> (i32, i32) {
    %c0_i32 = arith.constant 0 : i32
    %c0_i32_0 = arith.constant 0 : i32
    %c0_i32_1 = arith.constant 0 : i32
    return %c0_i32, %c0_i32_0 : i32, i32
  }
  func.func @transform_6(%arg0: i32) -> (i32, i32) {
    %c0_i32 = arith.constant 0 : i32
    %c0_i32_0 = arith.constant 0 : i32
    %c0_i32_1 = arith.constant 0 : i32
    return %c0_i32, %c0_i32_0 : i32, i32
  }
  func.func @transform_7(%arg0: i32) -> (i32, i32) {
    %c0_i32 = arith.constant 0 : i32
    %c0_i32_0 = arith.constant 0 : i32
    %c0_i32_1 = arith.constant 0 : i32
    return %c0_i32, %c0_i32_0 : i32, i32
  }
  func.func @transform_8(%arg0: i32) -> (i32, i32) {
    %c0_i32 = arith.constant 0 : i32
    %c0_i32_0 = arith.constant 0 : i32
    %c0_i32_1 = arith.constant 0 : i32
    return %c0_i32, %c0_i32_0 : i32, i32
  }
  func.func @transform_9(%arg0: i32) -> (i32, i32) {
    %c0_i32 = arith.constant 0 : i32
    %c0_i32_0 = arith.constant 0 : i32
    %c0_i32_1 = arith.constant 0 : i32
    return %c0_i32, %c0_i32_0 : i32, i32
  }
  func.func @transform_10(%arg0: i32) -> (i32, i32, i32) {
    %c0_i32 = arith.constant 0 : i32
    %c0_i32_0 = arith.constant 0 : i32
    %c0_i32_1 = arith.constant 0 : i32
    return %arg0, %c0_i32, %c0_i32_0 : i32, i32, i32
  }
  func.func @transform_11(%arg0: i32) -> (i32, i32, i32) {
    %c2_i32 = arith.constant 2 : i32
    %0 = arith.subi %c2_i32, %arg0 : i32
    %c0_i32 = arith.constant 0 : i32
    %c0_i32_0 = arith.constant 0 : i32
    %c0_i32_1 = arith.constant 0 : i32
    return %0, %c0_i32, %c0_i32_0 : i32, i32, i32
  }
  func.func @transform_12(%arg0: i32) -> (i32, i32, i32) {
    %c0_i32 = arith.constant 0 : i32
    %c0_i32_0 = arith.constant 0 : i32
    %c0_i32_1 = arith.constant 0 : i32
    %c0_i32_2 = arith.constant 0 : i32
    return %c0_i32, %c0_i32_0, %c0_i32_1 : i32, i32, i32
  }
  func.func @transform_13(%arg0: i32) -> (i32, i32, i32) {
    %c0_i32 = arith.constant 0 : i32
    %c0_i32_0 = arith.constant 0 : i32
    %c0_i32_1 = arith.constant 0 : i32
    %c0_i32_2 = arith.constant 0 : i32
    return %c0_i32, %c0_i32_0, %c0_i32_1 : i32, i32, i32
  }
}

</mosaic_0001>

<bundles_post_ra>
// kernel: tpu_custom_call.1
= control target key start
LH: loop header
LB: loop body
LE: loop exit
PB: predicated region body
PF: predicated region fallthrough
CT: control target
= control target key end

     0   :  { %s7984_s0 = inlined_call_operand.vmem [shape: f32[12,8,1], index: 0, kind: input, shape index: {}]   ;;  %s7985_s1 = inlined_call_operand.vmem [shape: f32[12,8,1], index: 1, kind: input, shape index: {}]   ;;  %s7986_s2 = inlined_call_operand.vmem [shape: bf16[12,8,64], index: 2, kind: input, shape index: {}]   ;;  %s7987_s3 = inlined_call_operand.hbm [shape: bf16[12,8,64], index: 3, kind: input, shape index: {}]   ;;  %s7988_s4 = inlined_call_operand.vmem [shape: bf16[64,512], index: 4, kind: input, shape index: {}]   ;;  %s7989_s5 = inlined_call_operand.hbm [shape: bf16[128,512], index: 5, kind: input, shape index: {}]   ;;  %s7990_s6 = inlined_call_operand.vmem [shape: f32[1,512], index: 6, kind: input, shape index: {}]   ;;  %s7991_s7 = inlined_call_operand.hbm [shape: bf16[64,512], index: 7, kind: input, shape index: {}]   ;;  %s7992_s8 = inlined_call_operand.hbm [shape: bf16[128,512], index: 8, kind: input, shape index: {}]   ;;  %s7993_s9 = inlined_call_operand.vmem [shape: f32[1,512], index: 9, kind: input, shape index: {}]   ;;  %s7994_s10 = inlined_call_operand.hbm [shape: f32[12,8,128], index: 10, kind: output, shape index: {0}]   ;;  %s7995_s11 = inlined_call_operand.hbm [shape: f32[12,8,128], index: 11, kind: output, shape index: {1}]   ;;  %s7996_s12 = inlined_call_operand.hbm [shape: f32[2,8,128], index: 12, kind: output, shape index: {2}]   ;;  %s7997_s13 = inlined_call_operand.hbm [shape: f32[2,8,128], index: 13, kind: output, shape index: {3}]  }
   0x1   :  { %8098 = sst [smem:[#allocation69_spill]] %s7984_s0 }
   0x2   :  { %8099 = sst [smem:[#allocation70_spill]] %s7985_s1 }
   0x3   :  { %8100 = sst [smem:[#allocation71_spill]] %s7986_s2 }
   0x4   :  { %8101 = sst [smem:[#allocation72_spill]] %s7987_s3 }
   0x5   :  { %8102 = sst [smem:[#allocation73_spill]] %s7988_s4 }
   0x6   :  { %8103 = sst [smem:[#allocation74_spill]] %s7989_s5 }
   0x7   :  { %8104 = sst [smem:[#allocation75_spill]] %s7990_s6 }
   0x8   :  { %8105 = sst [smem:[#allocation76_spill]] %s7991_s7 }
   0x9   :  { %8106 = sst [smem:[#allocation77_spill]] %s7992_s8 }
   0xa   :  { %8107 = sst [smem:[#allocation78_spill]] %s7993_s9 }
   0xb   :  { %8108 = sst [smem:[#allocation79_spill]] %s7994_s10 }
   0xc   :  { %8109 = sst [smem:[#allocation80_spill]] %s7995_s11 }
   0xd   :  { %8110 = sst [smem:[#allocation81_spill]] %s7996_s12 }
   0xe   :  { %8111 = sst [smem:[#allocation82_spill]] %s7997_s13 }
   0xf   :  { %19 = vsyncpa [#allocation3], 0 }
  0x10   :  { %21 = vsyncpa [#allocation3 + $0x1], 0 }
  0x11   :  { %22 = vsyncpa [#allocation6], 0 }
  0x12   :  { %23 = vsyncpa [#allocation9], 0 }
  0x13   :  { %24 = vsyncpa [#allocation4], 0 }
  0x14   :  { %26 = vsyncpa [#allocation4 + $0x1], 0 }
  0x15   :  { %27 = vsyncpa [#allocation12], 0 }
  0x16   :  { %29 = vsyncpa [#allocation12 + $0x1], 0 }
  0x17   :  { %30 = vsyncpa [#allocation15], 0  ;;  %s6445_s25 = smov 0   ;;  %s6447_s26 = smov 0  }
  0x18   :  { %s6449_s27 = smov 0   ;;  %s6451_s28 = smov 0  }
  0x19   :  { %s6453_s29 = smov 0   ;;  %s6455_s30 = smov 0  }
  0x1a   :  { %s6457_s14 = smov 0  }
  0x1b LB: > { %8112 = sst [smem:[#allocation23_spill]] %s6333_s25  ;;  %s6479_s15 = sadd.s32 4294967295, %s6357_s14   ;;  %s6357_s14 = sphi %s6457_s14, %s8332_s14   ;;  %s6353_s30 = sphi %s6455_s30, %s8331_s30   ;;  %s6349_s29 = sphi %s6453_s29, %s8330_s29   ;;  %s6345_s28 = sphi %s6451_s28, %s8329_s28   ;;  %s6341_s27 = sphi %s6449_s27, %s8328_s27   ;;  %s6337_s26 = sphi %s6447_s26, %s8327_s26   ;;  %s6333_s25 = sphi %s6445_s25, %s8326_s25  }
  0x1c   : > { %s7998_s16 = sadd.s32 4294967294, %s6357_s14   ;;  %p138_p0 = scmp.ne.s32.totalorder %s6349_s29, %s6345_s28 }
  0x1d   : > { %p8007_p1 = scmp.eq.s32.totalorder %s6479_s15, 0  ;;  %p287_p2 = scmp.ne.s32.totalorder %s6341_s27, %s6337_s26 }
  0x1e   : > { %p8008_p3 = scmp.eq.s32.totalorder %s6479_s15, 2  ;;  %p293_p5 = scmp.ne.s32.totalorder %s6337_s26, %s6333_s25 }
  0x1f   : > { %p6489_p4 = por %p8007_p1, %p138_p0  ;;  %p294_p7 = scmp.eq.s32.totalorder %s7998_s16, 2 }
  0x20   : > { %p6497_p6 = por %p8008_p3, %p287_p2  ;;  %p5028_p8 = scmp.ge.s32.totalorder %s6357_s14, 1 }
  0x21   : > { %s8113_s17 = scalar_select %p6489_p4, 1, 0 }
  0x22   : > { %s8114_s18 = scalar_select %p6497_p6, 1, 0 }
  0x23   : > { %p371_p9 = scmp.lt.s32.totalorder %s6357_s14, 4  ;;  %p6505_p10 = por %p294_p7, %p293_p5 }
  0x24   : > { %8115 = sst [smem:[#allocation24_spill]] %s8114_s18  ;;  %p6509_p11 = por %p294_p7, %p138_p0 }
  0x25   : > { %s8116_s19 = scalar_select %p6505_p10, 1, 0 }
  0x26   : > { %s8118_s20 = scalar_select %p6509_p11, 1, 0 }
  0x27   : > { %8117 = sst [smem:[#allocation25_spill]] %s8116_s19  ;;  %p6513_p12 = pnand %p5028_p8, %p371_p9 }
  0x28   : > { %8119 = sst [smem:[#allocation26_spill]] %s8118_s20  ;;  %s6359_s22 = smov [#allocation5]  }
  0x29   : > { %s8120_s21 = scalar_select %p6513_p12, 1, 0 }
  0x2a   : > { %p5533_p2 = pneg %p6513_p12  ;;  %s386_s23 = sshll.u32 %s6359_s22, 4  ;;  %s387_s23 = int_to_ptr.vmem [resolvable:$true] %s386_s23 }
  0x2b   : > { %s6360_s28 = smov [#allocation7]   ;;  %s8122_s5 = sld [smem:[#allocation74_spill]] }
  0x2c   : > { %p6522_p5 = pnand %p5533_p2, %p8007_p1  ;;  %s402_s16 = sshll.u32 %s6360_s28, 4  ;;  %s403_s16 = int_to_ptr.vmem [resolvable:$true] %s402_s16 }
  0x2e   : > { %p6534_p7 = pneg %p6522_p5 }
  0x31   : > { %s6053_s25 = scalar_lea.hbm %s8122_s5, 4096 }
  0x32   : > { %p6054_p0 = scmp.ne.s32.totalorder %s8122_s5, %s6053_s25  ;;  %p6060_p2 = scmp.lt.u32.totalorder %s6053_s25, %s8122_s5 }
  0x34   : > { %p6056_p8 = pnand %p6534_p7, %p6054_p0 }
  0x36   : > { %p6057_p9 = pneg %p6056_p8 }
  0x38   : > { %p6062_p13 = pnand %p6060_p2, %p6057_p9 }
  0x3a   : > { %6065 = shalt.err (!%p6062_p13)
}
  0x3b   : > { %s6066_s19 = scalar_lea.vmem %s387_s23, 4096  ;;  %p6074_p10 = scmp.lt.s32.totalorder %s387_s23, %s387_s23 }
  0x3c   : > { %p6067_p1 = scmp.ne.s32.totalorder %s387_s23, %s6066_s19  ;;  %p6075_p6 = scmp.lt.s32.totalorder %s6066_s19, %s6066_s19 }
  0x3e   : > { %p6069_p3 = pnand %p6067_p1, %p6534_p7  ;;  %p6076_p4 = por %p6075_p6, %p6074_p10 }
  0x40   : > { %p6070_p11 = pneg %p6069_p3 }
  0x42   : > { %p6077_p12 = pnand %p6076_p4, %p6070_p11 }
  0x44   : > { %6080 = shalt.err (!%p6077_p12)
}
  0x45   : > { %s6361_s11 = smov 256   ;;  %s6362_s12 = smov 16  }
  0x46   : > { %5536 = dma.hbm_to_vmem [thread:$0]  (!%p6522_p5), %s8122_s5, 4096, %s387_s23, [#allocation6], %s6361_s11, %s6361_s11, %s6362_s12  }
  0x47   : > { %s6363_s18 = smov [#allocation8]   ;;  %s8124_s7 = sld [smem:[#allocation76_spill]] }
  0x48   : > { %s415_s20 = sshll.u32 %s6363_s18, 4  ;;  %s416_s20 = int_to_ptr.vmem [resolvable:$true] %s415_s20 }
  0x4d   : > { %s6081_s10 = scalar_lea.hbm %s8124_s7, 2048 }
  0x4e   : > { %p6082_p1 = scmp.ne.s32.totalorder %s8124_s7, %s6081_s10  ;;  %p6088_p6 = scmp.lt.u32.totalorder %s6081_s10, %s8124_s7 }
  0x50   : > { %p6084_p3 = pnand %p6082_p1, %p6534_p7 }
  0x52   : > { %p6085_p4 = pneg %p6084_p3 }
  0x54   : > { %p6090_p10 = pnand %p6088_p6, %p6085_p4 }
  0x56   : > { %6093 = shalt.err (!%p6090_p10)
}
  0x57   : > { %s6094_s23 = scalar_lea.vmem %s403_s16, 2048  ;;  %p6102_p0 = scmp.lt.s32.totalorder %s403_s16, %s403_s16 }
  0x58   : > { %p6095_p11 = scmp.ne.s32.totalorder %s403_s16, %s6094_s23  ;;  %p6103_p8 = scmp.lt.s32.totalorder %s6094_s23, %s6094_s23 }
  0x5a   : > { %p6097_p12 = pnand %p6095_p11, %p6534_p7  ;;  %p6104_p9 = por %p6103_p8, %p6102_p0 }
  0x5c   : > { %p6098_p13 = pneg %p6097_p12 }
  0x5e   : > { %p6105_p2 = pnand %p6104_p9, %p6098_p13 }
  0x60   : > { %6108 = shalt.err (!%p6105_p2)
}
  0x61   : > { %5539 = dma.hbm_to_vmem [thread:$0]  (!%p6522_p5), %s8124_s7, 2048, %s403_s16, [#allocation6], %s6361_s11, %s6361_s11, %s6362_s12  }
  0x62   : > { %s8125_s8 = sld [smem:[#allocation77_spill]] }
  0x68   : > { %s6109_s10 = scalar_lea.hbm %s8125_s8, 4096 }
  0x69   : > { %p6110_p1 = scmp.ne.s32.totalorder %s8125_s8, %s6109_s10  ;;  %p6116_p6 = scmp.lt.u32.totalorder %s6109_s10, %s8125_s8 }
  0x6b   : > { %p6112_p3 = pnand %p6110_p1, %p6534_p7 }
  0x6d   : > { %p6113_p4 = pneg %p6112_p3 }
  0x6f   : > { %p6118_p10 = pnand %p6116_p6, %p6113_p4 }
  0x71   : > { %6121 = shalt.err (!%p6118_p10)
}
  0x72   : > { %s6122_s19 = scalar_lea.vmem %s416_s20, 4096  ;;  %p6130_p0 = scmp.lt.s32.totalorder %s416_s20, %s416_s20 }
  0x73   : > { %p6123_p11 = scmp.ne.s32.totalorder %s416_s20, %s6122_s19  ;;  %p6131_p8 = scmp.lt.s32.totalorder %s6122_s19, %s6122_s19 }
  0x75   : > { %p6125_p12 = pnand %p6123_p11, %p6534_p7  ;;  %p6132_p9 = por %p6131_p8, %p6130_p0 }
  0x77   : > { %p6126_p13 = pneg %p6125_p12 }
  0x79   : > { %p6133_p2 = pnand %p6132_p9, %p6126_p13 }
  0x7b   : > { %6136 = shalt.err (!%p6133_p2)
}
  0x7c   : > { %5542 = dma.hbm_to_vmem [thread:$0]  (!%p6522_p5), %s8125_s8, 4096, %s416_s20, [#allocation9], %s6361_s11, %s6361_s11, %s6362_s12  }
  0x7d   : > { %s6596_s24 = sadd.s32 1, %s6357_s14   ;;  %s120_s22 = ssub.s32 2, %s6357_s14 }
  0x7e   : > { %s121_s1 = ssub.s32 2, %s6596_s24  ;;  %s125_s6 = sadd.s32 1, %s6353_s30 }
  0x7f   : > { %s122_s4 = ssub.s32 %s120_s22, %s121_s1  ;;  %p132_p1 = scmp.ne.s32.totalorder %s6353_s30, %s6349_s29 }
  0x80   : > { %p123_p7 = scmp.eq.s32.totalorder %s122_s4, 0  ;;  %p133_p3 = scmp.eq.s32.totalorder %s6357_s14, 0 }
  0x81   : > { %s274_s9 = ssub.s32 %s6357_s14, %s6596_s24  ;;  %s277_s11 = sadd.s32 1, %s6341_s27 }
  0x82   : > { %s6607_s10 = scalar_select %p123_p7, %s6353_s30, %s125_s6  }
  0x83   : > { %p6609_p4 = por %p133_p3, %p132_p1  ;;  %p275_p5 = scmp.eq.s32.totalorder %s274_s9, 0 }
  0x84   : > { %p8127_p6 = scmp.eq.s32.totalorder %s6479_s15, 2  ;;  %p5557_p11 = scmp.lt.s32.totalorder %s6357_s14, 3 }
  0x85   : > { %s6621_s20 = scalar_select %p275_p5, %s6341_s27, %s277_s11  }
  0x86   : > { %p6616_p10 = por %p8127_p6, %p132_p1  ;;  %s461_s25 = sand.u32 1, %s6353_s30  }
  0x87   : > { %s5033_s18 = sshll.u32 %s461_s25, 4  ;;  %s5504_s28 = sshll.u32 %s120_s22, 8 }
  0x88   : > { %s8129_s3 = sld [smem:[#allocation72_spill]]  ;;  %s465_s1 = scalar_lea.vmem [#allocation2], %s5033_s18 }
  0x89   : > { %s473_s4 = sshll.u32 %s465_s1, 4  ;;  %p6634_p12 = pnand %p5557_p11, %p6609_p4  ;;  %s6630_s4 = int_to_ptr.vmem [resolvable:$true] %s473_s4 }
  0x8a   : > { %s6638_s22 = scalar_lea.sflag [#allocation3], %s461_s25 }
  0x8b   : > { %p6139_p0 = pneg %p6634_p12 }
  0x8e   : > { %s6628_s23 = scalar_lea.hbm %s8129_s3, %s5504_s28  ;;  %s6142_s13 = scalar_lea.hbm %s8129_s3, 768 }
  0x8f   : > { %s6137_s9 = scalar_lea.hbm %s6628_s23, 256  ;;  %p6143_p2 = scmp.lt.u32.totalorder %s6628_s23, %s8129_s3 }
  0x90   : > { %p6138_p13 = scmp.ne.s32.totalorder %s6628_s23, %s6137_s9  ;;  %p6144_p7 = scmp.lt.u32.totalorder %s6142_s13, %s6137_s9 }
  0x91   : > { %p6146_p3 = scmp.lt.u32.totalorder %s6137_s9, %s6628_s23 }
  0x92   : > { %p6140_p8 = pnand %p6139_p0, %p6138_p13  ;;  %p6145_p1 = por %p6144_p7, %p6143_p2 }
  0x94   : > { %p6141_p9 = pneg %p6140_p8  ;;  %p6147_p4 = por %p6146_p3, %p6145_p1 }
  0x96   : > { %p6148_p5 = pnand %p6147_p4, %p6141_p9 }
  0x98   : > { %6151 = shalt.err (!%p6148_p5)
}
  0x99   : > { %s6152_s25 = scalar_lea.vmem %s6630_s4, 256  ;;  %s6364_s16 = smov [#allocation2]  }
  0x9a   : > { %p6153_p6 = scmp.ne.s32.totalorder %s6630_s4, %s6152_s25  ;;  %s6157_s1 = sshll.u32 %s6364_s16, 4  ;;  %s6158_s1 = int_to_ptr.vmem [resolvable:$false] %s6157_s1 }
  0x9b   : > { %s6159_s11 = scalar_lea.vmem %s6158_s1, 512  ;;  %p6160_p8 = scmp.lt.s32.totalorder %s6630_s4, %s6158_s1 }
  0x9c   : > { %p6155_p11 = pnand %p6153_p6, %p6139_p0  ;;  %p6161_p2 = scmp.lt.s32.totalorder %s6159_s11, %s6152_s25 }
  0x9e   : > { %p6156_p13 = pneg %p6155_p11  ;;  %p6162_p7 = por %p6161_p2, %p6160_p8 }
  0xa0   : > { %p6163_p1 = pnand %p6162_p7, %p6156_p13 }
  0xa2   : > { %6166 = shalt.err (!%p6163_p1)
}
  0xa3   : > { %s6365_s9 = smov 64   ;;  %s6366_s18 = smov 4  }
  0xa4   : > { %5546 = dma.hbm_to_vmem [thread:$0]  (!%p6634_p12), %s6628_s23, 256, %s6630_s4, %s6638_s22, %s6365_s9, %s6365_s9, %s6366_s18  }
  0xa5   : > { %p8131_p0 = scmp.ne.s32.totalorder %s8120_s21, 0 }
  0xa7   : > { %485 = sbr.rel (%p8131_p0) target bundleno = 1487 (0x5cf), region = 60 }
  0xae   : > { %s487_s13 = sand.u32 1, %s6349_s29   ;;  %p8132_p9 = scmp.ne.s32.totalorder %s8113_s17, 0 }
  0xaf   : > { %s5037_s28 = sshll.u32 %s487_s13, 4  ;;  %s488_s19 = scalar_lea.sflag [#allocation3], %s487_s13 }
  0xb0   : > { %s6669_s25 = scalar_lea.vmem [#allocation2], %s5037_s28 }
  0xb1   : > { %6304 = dma.done.wait (%p8132_p9), %s488_s19, 256  }
  0xb2   : > { %6306 = vsyncadd (%p8132_p9), %s488_s19, 4294967040  ;;  %p8133_p3 = scmp.eq.s32.totalorder %s6479_s15, 0 }
  0xb4   : > { %6308 = dma.done.wait (%p8133_p3), [#allocation6], 6144   ;;  %p8134_p12 = pmov %p8133_p3 }
  0xb5   : > { %p8135_p4 = pmov %p8133_p3 }
  0xb6   : > { %6310 = vsyncadd (%p8134_p12), [#allocation6], 4294961152 }
  0xb7   : > { %6312 = dma.done.wait (%p8135_p4), [#allocation9], 4096   ;;  %p8136_p5 = pmov %p8133_p3 }
  0xb8   : > { %s8016_s21 = sand.u32 1, %s6337_s26   ;;  %s5042_s17 = sshll.u32 %s487_s13, 5 }
  0xb9   : > { %6314 = vsyncadd (%p8136_p5), [#allocation9], 4294963200  ;;  %s5041_s23 = sshll.u32 %s8016_s21, 5  ;;  %s5043_s4 = sshll.u32 %s6479_s15, 2 }
  0xba   : > { %p568_p6 = scmp.lt.s32.totalorder %s5043_s4, 11  ;;  %s8017_s6 = ssub.s32 2, %s6479_s15 }
  0xbb   : > { %s5045_s22 = sshll.u32 %s8017_s6, 2  ;;  %s8137_s0 = sld [smem:[#allocation69_spill]] }
  0xbc   : > { %s8334_s4 = smov (!%p568_p6, %s5043_s4), 11  ;;  %p575_p11 = scmp.lt.s32.totalorder %s5045_s22, 11 }
  0xbd   : > { %s5044_s16 = sshll.u32 %s8334_s4, 3  ;;  %s5048_s1 = sshll.u32 %s8334_s4, 2 }
  0xbe   : > { %s8138_s2 = sld [smem:[#allocation71_spill]]  ;;  %s8336_s22 = smov (!%p575_p11, %s5045_s22), 11 }
  0xbf   : > { %s5046_s21 = sshll.u32 %s8336_s22, 3  ;;  %s8139_s7 = sld [smem:[#allocation70_spill]] }
  0xc0   : > { %s6705_s8 = scalar_lea.vmem [#allocation10], %s5041_s23  ;;  %s6707_s4 = scalar_lea.vmem [#allocation11], %s5042_s17 }
  0xc1   : > { %s6693_s18 = scalar_lea.vmem %s8137_s0, %s5044_s16  ;;  %p8140_p13 = scmp.ne.s32.totalorder %s6479_s15, 0 }
  0xc2   : > { %v6367_v0 = vmov (!%p8140_p13), 0.0  }
  0xc3   : > { %596 = sbr.rel (%p8140_p13) target bundleno = 202 (0xca), region = 80  ;;  %597 = vst [vmem:[#allocation13] sm:$0xff] (!%p8140_p13), %v6367_v0  ;;  %598 = vst [vmem:[#allocation13 + $0x8] sm:$0xff] (!%p8140_p13), %v6367_v0 }
  0xc4   : > { %s6698_s13 = scalar_lea.vmem %s8138_s2, %s5048_s1  ;;  %599 = vst [vmem:[#allocation14] sm:$0xff] (!%p8140_p13), %v6367_v0  ;;  %600 = vst [vmem:[#allocation14 + $0x8] sm:$0xff] (!%p8140_p13), %v6367_v0 }
  0xc5   : > { %s6703_s6 = scalar_lea.vmem %s8139_s7, %s5046_s21 }
  0xca PF: > { %v6711_v1 = vld [vmem:[#allocation5 + $0x4] ss:$16 sps:$4 sm:$0xff]   ;;  %v6713_v2 = vld [vmem:[#allocation5 + $0xc] ss:$16 sps:$4 sm:$0xff]   ;;  %v8019_v3 = vmov 0   ;;  %s8141_s7 = sld [smem:[#allocation73_spill]] }
  0xcb   : > { %851 = vmatprep.mubr.bf16.mxu0 %v8019_v3  ;;  %892 = vmatprep.mubr.bf16.mxu1 %v8019_v3  ;;  %v6718_v4 = vld [vmem:[#allocation5] ss:$16 sps:$4 sm:$0xff]   ;;  %v6720_v5 = vld [vmem:[#allocation5 + $0x8] ss:$16 sps:$4 sm:$0xff]   ;;  %v6724_v6 = vld [vmem:[#allocation5 + $0x24] ss:$16 sps:$4 sm:$0xff]  }
  0xcc   : > { %819 = vmatprep.subr.bf16.mxu0 %v6711_v1  ;;  %5635 = vset.pattern.permute.xlu0 %v8019_v3  ;;  %v6729_v7 = vld [vmem:[#allocation5 + $0x2c] ss:$16 sps:$4 sm:$0xff]   ;;  %v6731_v8 = vld [vmem:[#allocation5 + $0x20] ss:$16 sps:$4 sm:$0xff]   ;;  %v6734_v9 = vld [vmem:[#allocation5 + $0x28] ss:$16 sps:$4 sm:$0xff]  }
  0xcd   : > { %860 = vmatprep.subr.bf16.mxu1 %v6713_v2  ;;  %5636 = vset.pattern.permute.xlu1 %v8019_v3  ;;  %v6737_v10 = vld [vmem:[#allocation5 + $0x44] ss:$16 sps:$4 sm:$0xff]   ;;  %v6739_v11 = vld [vmem:[#allocation5 + $0x4c] ss:$16 sps:$4 sm:$0xff]   ;;  %v6741_v12 = vld [vmem:[#allocation5 + $0x40] ss:$16 sps:$4 sm:$0xff]  }
  0xce   : > { %820 = vmatpush1.bf16.msra.mxu0 %v6718_v4  ;;  %861 = vmatpush1.bf16.msra.mxu1 %v6720_v5  ;;  %v6743_v13 = vld [vmem:[#allocation5 + $0x48] ss:$16 sps:$4 sm:$0xff]   ;;  %v6747_v14 = vld [vmem:[#allocation5 + $0x64] ss:$16 sps:$4 sm:$0xff]   ;;  %v6751_v15 = vld [vmem:[#allocation5 + $0x6c] ss:$16 sps:$4 sm:$0xff]  }
  0xcf   : > { %821 = vmatprep.subr.bf16.mxu0 %v6724_v6  ;;  %862 = vmatprep.subr.bf16.mxu1 %v6729_v7  ;;  %v6753_v16 = vld [vmem:[#allocation5 + $0x60] ss:$16 sps:$4 sm:$0xff]   ;;  %v6757_v17 = vld [vmem:[#allocation5 + $0x68] ss:$16 sps:$4 sm:$0xff]   ;;  %v6759_v18 = vld [vmem:[#allocation5 + $0x84] ss:$16 sps:$4 sm:$0xff]  }
  0xd0   : > { %v6763_v19 = vld [vmem:[#allocation5 + $0x8c] ss:$16 sps:$4 sm:$0xff]   ;;  %v6765_v20 = vld [vmem:[#allocation5 + $0x80] ss:$16 sps:$4 sm:$0xff]   ;;  %v6767_v21 = vld [vmem:[#allocation5 + $0x88] ss:$16 sps:$4 sm:$0xff]  }
  0xd1   : > { %v6771_v22 = vld [vmem:[#allocation5 + $0xa4] ss:$16 sps:$4 sm:$0xff]   ;;  %v6775_v23 = vld [vmem:[#allocation5 + $0xac] ss:$16 sps:$4 sm:$0xff]   ;;  %v6779_v24 = vld [vmem:[#allocation5 + $0xa0] ss:$16 sps:$4 sm:$0xff]  }
  0xd2   : > { %822 = vmatpush1.bf16.msra.mxu0 %v6731_v8  ;;  %863 = vmatpush1.bf16.msra.mxu1 %v6734_v9  ;;  %v6781_v25 = vld [vmem:[#allocation5 + $0xa8] ss:$16 sps:$4 sm:$0xff]   ;;  %v6785_v26 = vld [vmem:[#allocation5 + $0xc4] ss:$16 sps:$4 sm:$0xff]   ;;  %v6787_v27 = vld [vmem:[#allocation5 + $0xcc] ss:$16 sps:$4 sm:$0xff]  }
  0xd3   : > { %823 = vmatprep.subr.bf16.mxu0 %v6737_v10  ;;  %864 = vmatprep.subr.bf16.mxu1 %v6739_v11  ;;  %v6789_v28 = vld [vmem:[#allocation5 + $0xc0] ss:$16 sps:$4 sm:$0xff]   ;;  %v6793_v29 = vld [vmem:[#allocation5 + $0xc8] ss:$16 sps:$4 sm:$0xff]   ;;  %v6797_v30 = vld [vmem:[#allocation5 + $0xe4] ss:$16 sps:$4 sm:$0xff]  }
  0xd4   : > { %v6799_v31 = vld [vmem:[#allocation5 + $0xec] ss:$16 sps:$4 sm:$0xff]   ;;  %v6801_v32 = vld [vmem:[#allocation5 + $0xe0] ss:$16 sps:$4 sm:$0xff]   ;;  %v6803_v33 = vld [vmem:[#allocation5 + $0xe8] ss:$16 sps:$4 sm:$0xff]  }
  0xd5   : > { %v6807_v34 = vld [vmem:[#allocation13] sm:$0xff]  ;;  %v6819_v36 = vld [vmem:[%s8141_s7 + $0xc] ss:$16 sps:$4 sm:$0xff]   ;;  %v6833_v39 = vld [vmem:[%s8141_s7 + $0x8] ss:$16 sps:$4 sm:$0xff]   ;;  %vm981_vm0 = vcmask 523264  }
  0xd6   : > { %824 = vmatpush1.bf16.msra.mxu0 %v6741_v12  ;;  %865 = vmatpush1.bf16.msra.mxu1 %v6743_v13  ;;  %v6814_v35 = vld [vmem:[%s8141_s7 + $0x4] ss:$16 sps:$4 sm:$0xff]   ;;  %v626_v37 = vpack.c.bf16 %v6807_v34, %v6807_v34  ;;  %v6828_v38 = vld [vmem:[%s8141_s7] ss:$16 sps:$4 sm:$0xff]   ;;  %v6845_v41 = vld [vmem:[%s8141_s7 + $0x2c] ss:$16 sps:$4 sm:$0xff]  }
  0xd7   : > { %825 = vmatprep.subr.bf16.mxu0 %v6747_v14  ;;  %866 = vmatprep.subr.bf16.mxu1 %v6751_v15  ;;  %v6840_v40 = vld [vmem:[%s8141_s7 + $0x24] ss:$16 sps:$4 sm:$0xff]   ;;  %v6852_v42 = vld [vmem:[%s8141_s7 + $0x20] ss:$16 sps:$4 sm:$0xff]   ;;  %v6857_v43 = vld [vmem:[%s8141_s7 + $0x28] ss:$16 sps:$4 sm:$0xff]  }
  0xd8   : > { %v6864_v44 = vld [vmem:[%s8141_s7 + $0x44] ss:$16 sps:$4 sm:$0xff]   ;;  %v6869_v45 = vld [vmem:[%s8141_s7 + $0x4c] ss:$16 sps:$4 sm:$0xff]   ;;  %v6878_v46 = vld [vmem:[%s8141_s7 + $0x40] ss:$16 sps:$4 sm:$0xff]  }
  0xd9   : > { %v6883_v47 = vld [vmem:[%s8141_s7 + $0x48] ss:$16 sps:$4 sm:$0xff]   ;;  %v6890_v48 = vld [vmem:[%s8141_s7 + $0x64] ss:$16 sps:$4 sm:$0xff]   ;;  %v6895_v49 = vld [vmem:[%s8141_s7 + $0x6c] ss:$16 sps:$4 sm:$0xff]  }
  0xda   : > { %826 = vmatpush1.bf16.msra.mxu0 %v6753_v16  ;;  %867 = vmatpush1.bf16.msra.mxu1 %v6757_v17  ;;  %8142 = vst [vmem:[#allocation27_spill] sm:$0xff] %v6895_v49  ;;  %v6902_v50 = vld [vmem:[%s8141_s7 + $0x60] ss:$16 sps:$4 sm:$0xff]   ;;  %v6907_v51 = vld [vmem:[%s8141_s7 + $0x68] ss:$16 sps:$4 sm:$0xff]   ;;  %s8179_s28 = sld [smem:[#allocation75_spill]] }
  0xdb   : > { %827 = vmatprep.subr.bf16.mxu0 %v6759_v18  ;;  %868 = vmatprep.subr.bf16.mxu1 %v6763_v19  ;;  %8143 = vst [vmem:[#allocation28_spill] sm:$0xff] %v6902_v50  ;;  %8144 = vst [vmem:[#allocation29_spill] sm:$0xff] %v6907_v51  ;;  %v6911_v52 = vld [vmem:[#allocation8 + $0x4] ss:$16 sps:$4 sm:$0xff]   ;;  %v6913_v53 = vld [vmem:[#allocation8 + $0xc] ss:$16 sps:$4 sm:$0xff]  }
  0xdc   : > { %8145 = vst [vmem:[#allocation30_spill] sm:$0xff] %v6911_v52  ;;  %8146 = vst [vmem:[#allocation31_spill] sm:$0xff] %v6913_v53  ;;  %v609_v54 = vld [vmem:[%s6698_s13] sm:$0xf]  ;;  %v6920_v56 = vld [vmem:[#allocation8 + $0x8] ss:$16 sps:$4 sm:$0xff]  }
  0xdd   : > { %v6918_v55 = vld [vmem:[#allocation8] ss:$16 sps:$4 sm:$0xff]   ;;  %8148 = vst [vmem:[#allocation33_spill] sm:$0xff] %v6920_v56  ;;  %v6924_v57 = vld [vmem:[#allocation8 + $0x24] ss:$16 sps:$4 sm:$0xff]   ;;  %s8181_s3 = sld [smem:[#allocation78_spill]] }
  0xde   : > { %828 = vmatpush1.bf16.msra.mxu0 %v6765_v20  ;;  %869 = vmatpush1.bf16.msra.mxu1 %v6767_v21  ;;  %8147 = vst [vmem:[#allocation32_spill] sm:$0xff] %v6918_v55  ;;  %8149 = vst [vmem:[#allocation34_spill] sm:$0xff] %v6924_v57  ;;  %v6926_v58 = vld [vmem:[#allocation8 + $0x2c] ss:$16 sps:$4 sm:$0xff]   ;;  %v6932_v59 = vld [vmem:[#allocation8 + $0x20] ss:$16 sps:$4 sm:$0xff]  }
  0xdf   : > { %829 = vmatprep.subr.bf16.mxu0 %v6771_v22  ;;  %870 = vmatprep.subr.bf16.mxu1 %v6775_v23  ;;  %8150 = vst [vmem:[#allocation35_spill] sm:$0xff] %v6926_v58  ;;  %8151 = vst [vmem:[#allocation36_spill] sm:$0xff] %v6932_v59  ;;  %v6934_v60 = vld [vmem:[#allocation8 + $0x28] ss:$16 sps:$4 sm:$0xff]   ;;  %v6938_v61 = vld [vmem:[#allocation8 + $0x44] ss:$16 sps:$4 sm:$0xff]  }
  0xe0   : > { %8152 = vst [vmem:[#allocation37_spill] sm:$0xff] %v6934_v60  ;;  %8153 = vst [vmem:[#allocation38_spill] sm:$0xff] %v6938_v61  ;;  %v6940_v62 = vld [vmem:[#allocation8 + $0x4c] ss:$16 sps:$4 sm:$0xff]   ;;  %v6944_v63 = vld [vmem:[#allocation8 + $0x40] ss:$16 sps:$4 sm:$0xff]   ;;  %s8180_s19 = smov %s8179_s28 }
  0xe1   : > { %8154 = vst [vmem:[#allocation39_spill] sm:$0xff] %v6940_v62  ;;  %8155 = vst [vmem:[#allocation40_spill] sm:$0xff] %v6944_v63  ;;  %v6948_v0 = vld [vmem:[#allocation8 + $0x48] ss:$16 sps:$4 sm:$0xff]   ;;  %s5505_s1 = sshll.u32 %s6479_s15, 9  ;;  %s4793_s11 = sshll.u32 %s6705_s8, 4  ;;  %s7813_s11 = int_to_ptr.vmem [resolvable:$true] %s4793_s11 }
  0xe2   : > { %830 = vmatpush1.bf16.msra.mxu0 %v6779_v24  ;;  %871 = vmatpush1.bf16.msra.mxu1 %v6781_v25  ;;  %8156 = vst [vmem:[#allocation41_spill] sm:$0xff] %v6948_v0  ;;  %s8303_s5 = sld [smem:[#allocation24_spill]]  ;;  %s8304_s21 = sand.u32 1, %s6337_s26  }
  0xe3   : > { %831 = vmatprep.subr.bf16.mxu0 %v6785_v26  ;;  %872 = vmatprep.subr.bf16.mxu1 %v6787_v27  ;;  %s7821_s17 = scalar_lea.sflag [#allocation4], %s8304_s21  ;;  %s6167_s23 = scalar_lea.vmem %s7813_s11, 512 }
  0xe4   : > { %p6168_p8 = scmp.ne.s32.totalorder %s7813_s11, %s6167_s23 }
  0xe6   : > { %832 = vmatpush1.bf16.msra.mxu0 %v6789_v28  ;;  %873 = vmatpush1.bf16.msra.mxu1 %v6793_v29 }
  0xe7   : > { %833 = vmatprep.subr.bf16.mxu0 %v6797_v30  ;;  %874 = vmatprep.subr.bf16.mxu1 %v6799_v31 }
  0xe8   : > { %p8305_p2 = scmp.ne.s32.totalorder %s8303_s5, 0 }
  0xea   : > { %834 = vmatpush1.bf16.msra.mxu0 %v6801_v32  ;;  %875 = vmatpush1.bf16.msra.mxu1 %v6803_v33  ;;  %p6169_p7 = pnand %p6168_p8, %p8305_p2 }
  0xeb   : > { %985 = vmatprep.subr.bf16.mxu0 %v6814_v35  ;;  %1026 = vmatprep.subr.bf16.mxu1 %v6819_v36 }
  0xec   : > { %p6170_p1 = pneg %p6169_p7 }
  0xed   : > { %852 = vmatmul.mubr.bf16.vlgmr.msra.gmra.mrb[0].mxu0 %v626_v37  ;;  %893 = vmatmul.mubr.bf16.vlgmr.msra.gmra.mrb[0].mxu1 %v626_v37  ;;  %v6950_v37 = vld [vmem:[#allocation8 + $0x64] ss:$16 sps:$4 sm:$0xff]  }
  0xee   : > { %986 = vmatpush1.bf16.msra.mxu0 %v6828_v38  ;;  %1027 = vmatpush1.bf16.msra.mxu1 %v6833_v39  ;;  %8157 = vst [vmem:[#allocation42_spill] sm:$0xff] %v6950_v37 }
  0xef   : > { %987 = vmatprep.subr.bf16.mxu0 %v6840_v40  ;;  %1028 = vmatprep.subr.bf16.mxu1 %v6845_v41 }
  0xf0   : > { %1017 = vmatprep.mubr.bf16.mxu0 %v8019_v3  ;;  %1058 = vmatprep.mubr.bf16.mxu1 %v8019_v3 }
  0xf2   : > { %988 = vmatpush1.bf16.msra.mxu0 %v6852_v42  ;;  %1029 = vmatpush1.bf16.msra.mxu1 %v6857_v43 }
  0xf3   : > { %989 = vmatprep.subr.bf16.mxu0 %v6864_v44  ;;  %1030 = vmatprep.subr.bf16.mxu1 %v6869_v45 }
  0xf6   : > { %990 = vmatpush1.bf16.msra.mxu0 %v6878_v46  ;;  %1031 = vmatpush1.bf16.msra.mxu1 %v6883_v47 }
  0xf7   : > { %991 = vmatprep.subr.bf16.mxu0 %v6890_v48  ;;  %1032 = vmatprep.subr.bf16.mxu1 %v6895_v49  ;;  %v4252_v49 = vld [vmem:[%s6703_s6] sm:$0xff] }
  0xf8   : > { %vm4253_vm4 = vcmp.gt.f32.partialorder %v4252_v49, 0.5  ;;  %v7040_v49 = vld [vmem:[#allocation7 + $0x20] ss:$16 sps:$4 sm:$0xff]  }
  0xfa   : > { %992 = vmatpush1.bf16.msra.mxu0 %v6902_v50  ;;  %1033 = vmatpush1.bf16.msra.mxu1 %v6907_v51  ;;  %v7002_v51 = vld [vmem:[#allocation8 + $0xec] ss:$16 sps:$4 sm:$0xff]  }
  0xfb   : > { %1340 = vmatprep.subr.bf16.mxu0 %v6911_v52  ;;  %1381 = vmatprep.subr.bf16.mxu1 %v6913_v53  ;;  %v5271_v52 = vld [vmem:[%s6693_s18 + $0x10] sm:$0xff]  ;;  %8172 = vst [vmem:[#allocation56_spill] sm:$0xff] %v7002_v51 }
  0xfc   : > { %vm2691_vm3 = vcmp.gt.f32.partialorder %v5271_v52, 0.5  ;;  %v7025_v52 = vld [vmem:[#allocation7] ss:$16 sps:$4 sm:$0xff]  }
  0xfd   : > { %5098 = vmatmul.mubr.msk.bf16.vlgmr.msra.gmra.mrb[4].mxu0 %vm981_vm0, %v609_v54  ;;  %5099 = vmatmul.mubr.msk.bf16.vlgmr.msra.gmra.mrb[4].mxu1 %vm981_vm0, %v609_v54  ;;  %v6954_v54 = vld [vmem:[#allocation8 + $0x6c] ss:$16 sps:$4 sm:$0xff]  }
  0xfe   : > { %1341 = vmatpush1.bf16.msra.mxu0 %v6918_v55  ;;  %1382 = vmatpush1.bf16.msra.mxu1 %v6920_v56  ;;  %8158 = vst [vmem:[#allocation43_spill] sm:$0xff] %v6954_v54  ;;  %v6984_v56 = vld [vmem:[#allocation8 + $0xa8] ss:$16 sps:$4 sm:$0xff]   ;;  %v8170_v55 = vmov 0  }
  0xff   : > { %1342 = vmatprep.subr.bf16.mxu0 %v6924_v57  ;;  %1383 = vmatprep.subr.bf16.mxu1 %v6926_v58  ;;  %v6956_v58 = vld [vmem:[#allocation8 + $0x60] ss:$16 sps:$4 sm:$0xff]   ;;  %8167 = vst [vmem:[#allocation52_spill] sm:$0xff] %v6984_v56 }
 0x100   : > { %1372 = vmatprep.mubr.bf16.mxu0 %v8019_v3  ;;  %1413 = vmatprep.mubr.bf16.mxu1 %v8019_v3  ;;  %8159 = vst [vmem:[#allocation44_spill] sm:$0xff] %v6956_v58  ;;  %v6960_v3 = vld [vmem:[#allocation8 + $0x68] ss:$16 sps:$4 sm:$0xff]   ;;  %v6982_v57 = vld [vmem:[#allocation8 + $0xa0] ss:$16 sps:$4 sm:$0xff]  }
 0x101   : > { %8160 = vst [vmem:[#allocation45_spill] sm:$0xff] %v6960_v3  ;;  %8166 = vst [vmem:[#allocation51_spill] sm:$0xff] %v6982_v57 }
 0x102   : > { %1343 = vmatpush1.bf16.msra.mxu0 %v6932_v59  ;;  %1384 = vmatpush1.bf16.msra.mxu1 %v6934_v60  ;;  %v6962_v60 = vld [vmem:[#allocation8 + $0x84] ss:$16 sps:$4 sm:$0xff]   ;;  %v5103_v59 = vld [vmem:[%s6703_s6 + $0x18] sm:$0xff] }
 0x103   : > { %1344 = vmatprep.subr.bf16.mxu0 %v6938_v61  ;;  %1385 = vmatprep.subr.bf16.mxu1 %v6940_v62  ;;  %8161 = vst [vmem:[#allocation46_spill] sm:$0xff] %v6962_v60  ;;  %v6966_v61 = vld [vmem:[#allocation8 + $0x8c] ss:$16 sps:$4 sm:$0xff]   ;;  %v6968_v62 = vld [vmem:[#allocation8 + $0x80] ss:$16 sps:$4 sm:$0xff]   ;;  %vm1128_vm2 = vcmp.gt.f32.partialorder %v5103_v59, 0.5 }
 0x104   : > { %8162 = vst [vmem:[#allocation47_spill] sm:$0xff] %v6966_v61  ;;  %v1637_v50 = vsel %vm1128_vm2, 1, %v8170_v55  ;;  %v7010_v59 = vld [vmem:[#allocation8 + $0xe0] ss:$16 sps:$4 sm:$0xff]  }
 0x106   : > { %1345 = vmatpush1.bf16.msra.mxu0 %v6944_v63  ;;  %1386 = vmatpush1.bf16.msra.mxu1 %v6948_v0  ;;  %v6972_v63 = vld [vmem:[#allocation8 + $0x88] ss:$16 sps:$4 sm:$0xff]   ;;  %v6974_v0 = vld [vmem:[#allocation8 + $0xa4] ss:$16 sps:$4 sm:$0xff]  }
 0x107   : > { %1346 = vmatprep.subr.bf16.mxu0 %v6950_v37  ;;  %1387 = vmatprep.subr.bf16.mxu1 %v6954_v54  ;;  %8163 = vst [vmem:[#allocation48_spill] sm:$0xff] %v6972_v63  ;;  %8164 = vst [vmem:[#allocation49_spill] sm:$0xff] %v6974_v0  ;;  %v6978_v37 = vld [vmem:[#allocation8 + $0xac] ss:$16 sps:$4 sm:$0xff]   ;;  %v607_v54 = vld [vmem:[%s6693_s18] sm:$0xff] }
 0x108   : > { %8165 = vst [vmem:[#allocation50_spill] sm:$0xff] %v6978_v37  ;;  %vm608_vm1 = vcmp.gt.f32.partialorder %v607_v54, 0.5  ;;  %v6998_v54 = vld [vmem:[#allocation8 + $0xc8] ss:$16 sps:$4 sm:$0xff]  }
 0x109   : > { %v1117_v53 = vsel %vm608_vm1, 1, %v8170_v55 }
 0x10a   : > { %1347 = vmatpush1.bf16.msra.mxu0 %v6956_v58  ;;  %1388 = vmatpush1.bf16.msra.mxu1 %v6960_v3  ;;  %v6986_v58 = vld [vmem:[#allocation8 + $0xc4] ss:$16 sps:$4 sm:$0xff]   ;;  %v6988_v3 = vld [vmem:[#allocation8 + $0xcc] ss:$16 sps:$4 sm:$0xff]  }
 0x10b   : > { %1348 = vmatprep.subr.bf16.mxu0 %v6962_v60  ;;  %1389 = vmatprep.subr.bf16.mxu1 %v6966_v61  ;;  %8168 = vst [vmem:[#allocation53_spill] sm:$0xff] %v6986_v58  ;;  %8169 = vst [vmem:[#allocation54_spill] sm:$0xff] %v6988_v3  ;;  %v6996_v61 = vld [vmem:[#allocation8 + $0xc0] ss:$16 sps:$4 sm:$0xff]   ;;  %v7000_v60 = vld [vmem:[#allocation8 + $0xe4] ss:$16 sps:$4 sm:$0xff]  }
 0x10c   : > { %8171 = vst [vmem:[#allocation55_spill] sm:$0xff] %v6996_v61  ;;  %1119 = vperm.xlu0 %5635, %v1117_v53   ;;  %v7014_v53 = vld [vmem:[#allocation13 + $0x8] sm:$0xff] }
 0x10d   : > { %8173 = vst [vmem:[#allocation57_spill] sm:$0xff] %v7014_v53 }
 0x10e   : > { %1349 = vmatpush1.bf16.msra.mxu0 %v6968_v62  ;;  %1390 = vmatpush1.bf16.msra.mxu1 %v6972_v63  ;;  %v7018_v63 = vld [vmem:[#allocation7 + $0xc] ss:$16 sps:$4 sm:$0xff]  }
 0x10f   : > { %1350 = vmatprep.subr.bf16.mxu0 %v6974_v0  ;;  %1391 = vmatprep.subr.bf16.mxu1 %v6978_v37  ;;  %v7012_v37 = vld [vmem:[#allocation8 + $0xe8] ss:$16 sps:$4 sm:$0xff]   ;;  %v7016_v0 = vld [vmem:[#allocation7 + $0x4] ss:$16 sps:$4 sm:$0xff]   ;;  %8175 = vst [vmem:[#allocation59_spill] sm:$0xff] %v7018_v63 }
 0x110   : > { %1639 = vperm.xlu0 %5635, %v1637_v50   ;;  %8174 = vst [vmem:[#allocation58_spill] sm:$0xff] %v7016_v0  ;;  %v1147_v50 = vpack.c.bf16 %v7014_v53, %v7014_v53  ;;  %v7044_v53 = vld [vmem:[#allocation7 + $0x44] ss:$16 sps:$4 sm:$0xff]  }
 0x112   : > { %1351 = vmatpush1.bf16.msra.mxu0 %v6982_v57  ;;  %1392 = vmatpush1.bf16.msra.mxu1 %v6984_v56  ;;  %v3200_v57 = vsel %vm2691_vm3, 1, %v8170_v55  ;;  %v7033_v56 = vld [vmem:[#allocation7 + $0x2c] ss:$16 sps:$4 sm:$0xff]  }
 0x113   : > { %1352 = vmatprep.subr.bf16.mxu0 %v6986_v58  ;;  %1393 = vmatprep.subr.bf16.mxu1 %v6988_v3  ;;  %v7027_v3 = vld [vmem:[#allocation7 + $0x8] ss:$16 sps:$4 sm:$0xff]   ;;  %v7031_v58 = vld [vmem:[#allocation7 + $0x24] ss:$16 sps:$4 sm:$0xff]   ;;  %8178 = vst [vmem:[#allocation62_spill] sm:$0xff] %v7033_v56 }
 0x114   : > { %8176 = vst [vmem:[#allocation60_spill] sm:$0xff] %v7027_v3  ;;  %3202 = vperm.xlu0 %5635, %v3200_v57   ;;  %8177 = vst [vmem:[#allocation61_spill] sm:$0xff] %v7031_v58  ;;  %v7042_v57 = vld [vmem:[#allocation7 + $0x28] ss:$16 sps:$4 sm:$0xff]  }
 0x116   : > { %1353 = vmatpush1.bf16.msra.mxu0 %v6996_v61  ;;  %1394 = vmatpush1.bf16.msra.mxu1 %v6998_v54  ;;  %v4761_v61 = vsel %vm4253_vm4, 1, %v8170_v55 }
 0x117   : > { %1354 = vmatprep.subr.bf16.mxu0 %v7000_v60  ;;  %1395 = vmatprep.subr.bf16.mxu1 %v7002_v51  ;;  %v7046_v51 = vld [vmem:[#allocation7 + $0x4c] ss:$16 sps:$4 sm:$0xff]  }
 0x118   : > { %4763 = vperm.xlu0 %5635, %v4761_v61   ;;  %v7058_v61 = vld [vmem:[#allocation7 + $0x64] ss:$16 sps:$4 sm:$0xff]  }
 0x11a   : > { %1355 = vmatpush1.bf16.msra.mxu0 %v7010_v59  ;;  %1396 = vmatpush1.bf16.msra.mxu1 %v7012_v37 }
 0x11b   : > { %1505 = vmatprep.subr.bf16.mxu0 %v7016_v0  ;;  %1546 = vmatprep.subr.bf16.mxu1 %v7018_v63  ;;  %v7052_v63 = vld [vmem:[#allocation7 + $0x40] ss:$16 sps:$4 sm:$0xff]   ;;  %v7054_v0 = vld [vmem:[#allocation7 + $0x48] ss:$16 sps:$4 sm:$0xff]  }
 0x11d   : > { %1373 = vmatmul.mubr.bf16.vlgmr.msra.gmra.mrb[8].mxu0 %v1147_v50  ;;  %1414 = vmatmul.mubr.bf16.vlgmr.msra.gmra.mrb[8].mxu1 %v1147_v50  ;;  %v7060_v50 = vld [vmem:[#allocation7 + $0x6c] ss:$16 sps:$4 sm:$0xff]  }
 0x11e   : > { %1506 = vmatpush1.bf16.msra.mxu0 %v7025_v52  ;;  %1547 = vmatpush1.bf16.msra.mxu1 %v7027_v3  ;;  %v5104_v3 = vld [vmem:[%s6669_s25 + $0xc] sm:$0xf] }
 0x11f   : > { %1507 = vmatprep.subr.bf16.mxu0 %v7031_v58  ;;  %1548 = vmatprep.subr.bf16.mxu1 %v7033_v56  ;;  %v7066_v56 = vld [vmem:[#allocation7 + $0x60] ss:$16 sps:$4 sm:$0xff]   ;;  %v7068_v58 = vld [vmem:[#allocation7 + $0x68] ss:$16 sps:$4 sm:$0xff]  }
 0x120   : > { %1537 = vmatprep.mubr.bf16.mxu0 %v8170_v55  ;;  %1578 = vmatprep.mubr.bf16.mxu1 %v8170_v55 }
 0x122   : > { %1508 = vmatpush1.bf16.msra.mxu0 %v7040_v49  ;;  %1549 = vmatpush1.bf16.msra.mxu1 %v7042_v57 }
 0x123   : > { %1509 = vmatprep.subr.bf16.mxu0 %v7044_v53  ;;  %1550 = vmatprep.subr.bf16.mxu1 %v7046_v51 }
 0x126   : > { %1510 = vmatpush1.bf16.msra.mxu0 %v7052_v63  ;;  %1551 = vmatpush1.bf16.msra.mxu1 %v7054_v0 }
 0x127   : > { %1511 = vmatprep.subr.bf16.mxu0 %v7058_v61  ;;  %1552 = vmatprep.subr.bf16.mxu1 %v7060_v50 }
 0x12a   : > { %1512 = vmatpush1.bf16.msra.mxu0 %v7066_v56  ;;  %1553 = vmatpush1.bf16.msra.mxu1 %v7068_v58 }
 0x12b   : > { %1861 = vmatprep.subr.bf16.mxu0 %v6711_v1  ;;  %1902 = vmatprep.subr.bf16.mxu1 %v6713_v2 }
 0x12d   : > { %5153 = vmatmul.mubr.msk.bf16.vlgmr.msra.gmra.mrb[12].mxu0 %vm981_vm0, %v5104_v3  ;;  %5154 = vmatmul.mubr.msk.bf16.vlgmr.msra.gmra.mrb[12].mxu1 %vm981_vm0, %v5104_v3 }
 0x12e   : > { %1862 = vmatpush1.bf16.msra.mxu0 %v6718_v4  ;;  %1903 = vmatpush1.bf16.msra.mxu1 %v6720_v5 }
 0x12f   : > { %1863 = vmatprep.subr.bf16.mxu0 %v6724_v6  ;;  %1904 = vmatprep.subr.bf16.mxu1 %v6729_v7 }
 0x130   : > { %1893 = vmatprep.mubr.bf16.mxu0 %v8170_v55  ;;  %1934 = vmatprep.mubr.bf16.mxu1 %v8170_v55 }
 0x132   : > { %1864 = vmatpush1.bf16.msra.mxu0 %v6731_v8  ;;  %1905 = vmatpush1.bf16.msra.mxu1 %v6734_v9  ;;  %v1069_v9 = vlaneseq }
 0x133   : > { %1865 = vmatprep.subr.bf16.mxu0 %v6737_v10  ;;  %1906 = vmatprep.subr.bf16.mxu1 %v6739_v11  ;;  %v5159_v10 = vld [vmem:[%s6693_s18 + $0x8] sm:$0xff]  ;;  %v5215_v11 = vld [vmem:[%s6703_s6 + $0x10] sm:$0xff] }
 0x134   : > { %vm1649_vm5 = vcmp.gt.f32.partialorder %v5159_v10, 0.5  ;;  %vm2170_vm6 = vcmp.gt.f32.partialorder %v5215_v11, 0.5 }
 0x136   : > { %1866 = vmatpush1.bf16.msra.mxu0 %v6741_v12  ;;  %1907 = vmatpush1.bf16.msra.mxu1 %v6743_v13  ;;  %v2158_v12 = vsel %vm1649_vm5, 1, %v8170_v55  ;;  %v5327_v13 = vld [vmem:[%s6703_s6 + $0x8] sm:$0xff]  ;;  %s8302_s6 = sld [smem:[#allocation79_spill]] }
 0x137   : > { %1867 = vmatprep.subr.bf16.mxu0 %v6747_v14  ;;  %1908 = vmatprep.subr.bf16.mxu1 %v6751_v15  ;;  %v1070_v14 = vshrl.u32 %v1069_v9, 7  ;;  %v2679_v15 = vsel %vm2170_vm6, 1, %v8170_v55  ;;  %vm3212_vm7 = vcmp.gt.f32.partialorder %v5327_v13, 0.5 }
 0x138   : > { %2160 = vperm.xlu1 %5636, %v2158_v12  }
 0x13a   : > { %1868 = vmatpush1.bf16.msra.mxu0 %v6753_v16  ;;  %1909 = vmatpush1.bf16.msra.mxu1 %v6757_v17  ;;  %v5383_v16 = vld [vmem:[%s6693_s18 + $0x18] sm:$0xff]  ;;  %v7121_v17 = vsub.s32 0, %v1070_v14 }
 0x13b   : > { %1869 = vmatprep.subr.bf16.mxu0 %v6759_v18  ;;  %1910 = vmatprep.subr.bf16.mxu1 %v6763_v19  ;;  %v1067_v18 = vld [vmem:[%s8179_s28] sm:$0xf]  ;;  %v7126_v19 = vsub.s32 1, %v1070_v14  ;;  %vm3733_vm8 = vcmp.gt.f32.partialorder %v5383_v16, 0.5 }
 0x13c   : > { %2681 = vperm.xlu1 %5636, %v2679_v15   ;;  %s7811_s18 = scalar_lea.hbm %s8302_s6, %s5505_s1 }
 0x13e   : > { %1870 = vmatpush1.bf16.msra.mxu0 %v6765_v20  ;;  %1911 = vmatpush1.bf16.msra.mxu1 %v6767_v21  ;;  %v3721_v20 = vsel %vm3212_vm7, 1, %v8170_v55  ;;  %v1072_v21 = vrot.slane %v1067_v18, %v7121_v17 }
 0x13f   : > { %1871 = vmatprep.subr.bf16.mxu0 %v6771_v22  ;;  %1912 = vmatprep.subr.bf16.mxu1 %v6775_v23 }
 0x140   : > { %3723 = vperm.xlu1 %5636, %v3721_v20  }
 0x142   : > { %1872 = vmatpush1.bf16.msra.mxu0 %v6779_v24  ;;  %1913 = vmatpush1.bf16.msra.mxu1 %v6781_v25  ;;  %v1076_v24 = vrot.slane %v1067_v18, %v7126_v19  ;;  %v4242_v25 = vsel %vm3733_vm8, 1, %v8170_v55 }
 0x143   : > { %1873 = vmatprep.subr.bf16.mxu0 %v6785_v26  ;;  %1914 = vmatprep.subr.bf16.mxu1 %v6787_v27 }
 0x144   : > { %4244 = vperm.xlu1 %5636, %v4242_v25  }
 0x146   : > { %1874 = vmatpush1.bf16.msra.mxu0 %v6789_v28  ;;  %1915 = vmatpush1.bf16.msra.mxu1 %v6793_v29 }
 0x147   : > { %1875 = vmatprep.subr.bf16.mxu0 %v6797_v30  ;;  %1916 = vmatprep.subr.bf16.mxu1 %v6799_v31 }
 0x14a   : > { %1876 = vmatpush1.bf16.msra.mxu0 %v6801_v32  ;;  %1917 = vmatpush1.bf16.msra.mxu1 %v6803_v33  ;;  %v7132_v32 = vsub.s32 3, %v1070_v14 }
 0x14b   : > { %2026 = vmatprep.subr.bf16.mxu0 %v6814_v35  ;;  %2067 = vmatprep.subr.bf16.mxu1 %v6819_v36 }
 0x14c   : > { %v1084_v10 = vrot.slane %v1067_v18, %v7132_v32 }
 0x1c0   : > { %v853_v1 = vpop.f32.mrb[0].mxu0  ;;  %v894_v2 = vpop.f32.mrb[0].mxu1 }
 0x1c1   : > { %v855_v3 = vpop.f32.mrb[1].mxu0  ;;  %v896_v4 = vpop.f32.mrb[1].mxu1 }
 0x1c2   : > { %v857_v5 = vpop.f32.mrb[2].mxu0  ;;  %v898_v6 = vpop.f32.mrb[2].mxu1 }
 0x1c3   : > { %v858_v7 = vpop.f32.mrb[3].mxu0  ;;  %v899_v8 = vpop.f32.mrb[3].mxu1 }
 0x1d0   : > { %v1019_v22 = vpop.f32.mrb[4].mxu0  ;;  %v1060_v23 = vpop.f32.mrb[4].mxu1 }
 0x1d1   : > { %v1020_v26 = vadd.f32 %v1019_v22, %v853_v1  ;;  %v1061_v27 = vadd.f32 %v1060_v23, %v894_v2  ;;  %v1021_v28 = vpop.f32.mrb[5].mxu0  ;;  %v1062_v29 = vpop.f32.mrb[5].mxu1  ;;  %v7135_v1 = vsub.s32 2, %v1070_v14  ;;  %v602_v22 = vld [vmem:[#allocation14] sm:$0xff] }
 0x1d2   : > { %v1022_v30 = vadd.f32 %v1021_v28, %v855_v3  ;;  %v1063_v31 = vadd.f32 %v1062_v29, %v896_v4  ;;  %v1023_v33 = vpop.f32.mrb[6].mxu0  ;;  %v1064_v35 = vpop.f32.mrb[6].mxu1 }
 0x1d3   : > { %v1089_v36 = vadd.f32 %v1072_v21, %v1020_v26  ;;  %v1024_v5 = vpop.f32.mrb[7].mxu0  ;;  %v1065_v6 = vpop.f32.mrb[7].mxu1  ;;  %v1080_v3 = vrot.slane %v1067_v18, %v7135_v1 }
 0x1d4   : > { %v1090_v7 = vadd.f32 %v1076_v24, %v1022_v30  ;;  %v1092_v2 = vadd.f32 %v1084_v10, %v1063_v31  ;;  %v1120_v14 = vpop.permute.xlu0 %1119 }
 0x1d5   : > { %v5100_v8 = vmul.f32 -1.442695, %v1089_v36  ;;  %v1091_v11 = vadd.f32 %v1080_v3, %v1061_v27  ;;  %vm1121_vm9 = vcmp.eq.s32.totalorder %v1120_v14, 1 }
 0x1d6   : > { %v5101_v9 = vmul.f32 -1.442695, %v1090_v7  ;;  %v5102_v4 = vmul.f32 -1.442695, %v1092_v2  ;;  %v1587_v7 = vld [vmem:[%s8181_s3] sm:$0xf] }
 0x1d7   : > { %5925 = vpow2.f32 %v5100_v8  ;;  %v1592_v2 = vrot.slane %v1587_v7, %v7121_v17 }
 0x1d8   : > { %5927 = vpow2.f32 %v5101_v9 }
 0x1d9   : > { %5929 = vpow2.f32 %v5102_v4 }
 0x1da   : > { %5931 = vtanh.f32 %v1091_v11  ;;  %v1596_v11 = vrot.slane %v1587_v7, %v7126_v19 }
 0x1e1   : > { %v5926_v12 = vpop.eup %5925 }
 0x1e2   : > { %v5928_v13 = vpop.eup %5927  ;;  %v1096_v15 = vadd.f32 1.0, %v5926_v12 }
 0x1e3   : > { %v1102_v16 = vadd.f32 1.0, %v5928_v13  ;;  %v5930_v20 = vpop.eup %5929 }
 0x1e4   : > { %5933 = vrcp.f32 %v1096_v15  ;;  %v5932_v21 = vpop.eup %5931  ;;  %v1109_v25 = vadd.f32 1.0, %v5930_v20 }
 0x1e5   : > { %5935 = vrcp.f32 %v1102_v16 }
 0x1e6   : > { %5937 = vrcp.f32 %v1109_v25 }
 0x1ee   : > { %v5934_v23 = vpop.eup %5933 }
 0x1ef   : > { %v5936_v24 = vpop.eup %5935  ;;  %v1113_v26 = vmul.f32 %v5934_v23, %v5932_v21 }
 0x1f0   : > { %v1374_v28 = vpop.f32.mrb[8].mxu0  ;;  %v1112_v18 = vmul.f32 %v5936_v24, %v602_v22  ;;  %v1415_v29 = vpop.f32.mrb[8].mxu1 }
 0x1f1   : > { %v1376_v27 = vpop.f32.mrb[9].mxu0  ;;  %v1417_v30 = vpop.f32.mrb[9].mxu1 }
 0x1f2   : > { %v1114_v31 = vadd.f32 %v1113_v26, %v1112_v18  ;;  %v1378_v33 = vpop.f32.mrb[10].mxu0  ;;  %v1419_v35 = vpop.f32.mrb[10].mxu1 }
 0x1f3   : > { %v1379_v36 = vpop.f32.mrb[11].mxu0  ;;  %v1420_v5 = vpop.f32.mrb[11].mxu1 }
 0x1f4   : > { %5939 = vtanh.f32 %v1114_v31  ;;  %v7139_v6 = vsel %vm1121_vm9, %v1114_v31, %v602_v22  ;;  %v5938_v8 = vpop.eup %5937  ;;  %v8185_v36 = vld [vmem:[#allocation30_spill] sm:$0xff]  ;;  %v8188_v5 = vld [vmem:[#allocation33_spill] sm:$0xff] }
 0x1fe   : > { %v5940_v9 = vpop.eup %5939 }
 0x1ff   : > { %v1116_v10 = vmul.f32 %v5940_v9, %v5938_v8  ;;  %v8190_v8 = vld [vmem:[#allocation35_spill] sm:$0xff]  ;;  %v8191_v9 = vld [vmem:[#allocation36_spill] sm:$0xff] }
 0x200   : > { %v1539_v3 = vpop.f32.mrb[12].mxu0  ;;  %v1580_v4 = vpop.f32.mrb[12].mxu1 }
 0x201   : > { %v1122_v12 = vsel %vm1121_vm9, %v1116_v10, 0.0  ;;  %v7149_v13 = vsel %vm1121_vm9, %v1116_v10, %v6807_v34  ;;  %v1540_v15 = vadd.f32 %v1539_v3, %v1374_v28  ;;  %v1581_v16 = vadd.f32 %v1580_v4, %v1415_v29  ;;  %v1541_v20 = vpop.f32.mrb[13].mxu0  ;;  %v1582_v21 = vpop.f32.mrb[13].mxu1  ;;  %v8192_v10 = vld [vmem:[#allocation37_spill] sm:$0xff]  ;;  %v8194_v3 = vld [vmem:[#allocation39_spill] sm:$0xff] }
 0x202   : > { %1123 = vst [vmem:[%s6705_s8] sm:$0xff] %v1122_v12  ;;  %v1668_v22 = vpack.c.bf16 %v7149_v13, %v7149_v13  ;;  %v1542_v23 = vadd.f32 %v1541_v20, %v1376_v27  ;;  %v1583_v24 = vadd.f32 %v1582_v21, %v1417_v30  ;;  %v1543_v25 = vpop.f32.mrb[14].mxu0  ;;  %v1584_v26 = vpop.f32.mrb[14].mxu1  ;;  %v1604_v28 = vrot.slane %v1587_v7, %v7132_v32  ;;  %v8183_v27 = vld [vmem:[#allocation28_spill] sm:$0xff]  ;;  %v606_v12 = vld [vmem:[#allocation14 + $0x8] sm:$0xff] }
 0x203   : > { %v1609_v18 = vadd.f32 %v1592_v2, %v1540_v15  ;;  %v1544_v31 = vpop.f32.mrb[15].mxu0  ;;  %v1585_v33 = vpop.f32.mrb[15].mxu1  ;;  %v8193_v2 = vld [vmem:[#allocation38_spill] sm:$0xff]  ;;  %v8195_v15 = vld [vmem:[#allocation40_spill] sm:$0xff] }
 0x204   : > { %v1610_v35 = vadd.f32 %v1596_v11, %v1542_v23  ;;  %1894 = vmatmul.mubr.bf16.vlgmr.msra.gmra.mrb[16].mxu0 %v1668_v22  ;;  %1935 = vmatmul.mubr.bf16.vlgmr.msra.gmra.mrb[16].mxu1 %v1668_v22  ;;  %v8197_v21 = vld [vmem:[#allocation42_spill] sm:$0xff]  ;;  %v8198_v22 = vld [vmem:[#allocation43_spill] sm:$0xff]  ;;  %v8200_v31 = vld [vmem:[#allocation45_spill] sm:$0xff]  ;;  %v1640_v33 = vpop.permute.xlu0 %1639 }
 0x205   : > { %v5155_v34 = vmul.f32 -1.442695, %v1609_v18  ;;  %2027 = vmatpush1.bf16.msra.mxu0 %v6828_v38  ;;  %2068 = vmatpush1.bf16.msra.mxu1 %v6833_v39  ;;  %v1612_v38 = vadd.f32 %v1604_v28, %v1583_v24  ;;  %v1600_v39 = vrot.slane %v1587_v7, %v7135_v1  ;;  %v8189_v7 = vld [vmem:[#allocation34_spill] sm:$0xff]  ;;  %v8199_v18 = vld [vmem:[#allocation44_spill] sm:$0xff]  ;;  %vm1641_vm10 = vcmp.eq.s32.totalorder %v1640_v33, 1 }
 0x206   : > { %v5156_v14 = vmul.f32 -1.442695, %v1610_v35  ;;  %2028 = vmatprep.subr.bf16.mxu0 %v6840_v40  ;;  %2069 = vmatprep.subr.bf16.mxu1 %v6845_v41  ;;  %v8182_v41 = vld [vmem:[#allocation27_spill] sm:$0xff] }
 0x207   : > { %5941 = vpow2.f32 %v5155_v34  ;;  %2058 = vmatprep.mubr.bf16.mxu0 %v8170_v55  ;;  %2099 = vmatprep.mubr.bf16.mxu1 %v8170_v55  ;;  %v5157_v40 = vmul.f32 -1.442695, %v1612_v38  ;;  %v1611_v29 = vadd.f32 %v1600_v39, %v1581_v16  ;;  %v8196_v16 = vld [vmem:[#allocation41_spill] sm:$0xff]  ;;  %v8201_v34 = vld [vmem:[#allocation46_spill] sm:$0xff]  ;;  %v8203_v38 = vld [vmem:[#allocation48_spill] sm:$0xff] }
 0x208   : > { %5943 = vpow2.f32 %v5156_v14  ;;  %v8202_v14 = vld [vmem:[#allocation47_spill] sm:$0xff]  ;;  %v8204_v39 = vld [vmem:[#allocation49_spill] sm:$0xff] }
 0x209   : > { %2029 = vmatpush1.bf16.msra.mxu0 %v6852_v42  ;;  %2070 = vmatpush1.bf16.msra.mxu1 %v6857_v43  ;;  %v8184_v43 = vld [vmem:[#allocation29_spill] sm:$0xff]  ;;  %5945 = vpow2.f32 %v5157_v40  ;;  %v8205_v40 = vld [vmem:[#allocation50_spill] sm:$0xff] }
 0x20a   : > { %2030 = vmatprep.subr.bf16.mxu0 %v6864_v44  ;;  %2071 = vmatprep.subr.bf16.mxu1 %v6869_v45  ;;  %v5160_v44 = vld [vmem:[%s6698_s13 + $0x4] sm:$0xf]  ;;  %5947 = vtanh.f32 %v1611_v29  ;;  %v8207_v29 = vld [vmem:[#allocation52_spill] sm:$0xff]  ;;  %v7331_v33 = vld [vmem:[#allocation5 + $0xe0] ss:$16 sps:$4 sm:$0xff]  }
 0x20b   : > { %8218 = vst [vmem:[#allocation27_spill] sm:$0xff] %v7331_v33 }
 0x20d   : > { %2031 = vmatpush1.bf16.msra.mxu0 %v6878_v46  ;;  %2072 = vmatpush1.bf16.msra.mxu1 %v6883_v47  ;;  %v8186_v46 = vld [vmem:[#allocation31_spill] sm:$0xff] }
 0x20e   : > { %2032 = vmatprep.subr.bf16.mxu0 %v6890_v48  ;;  %2073 = vmatprep.subr.bf16.mxu1 %v8182_v41  ;;  %v8187_v48 = vld [vmem:[#allocation32_spill] sm:$0xff]  ;;  %v8206_v41 = vld [vmem:[#allocation51_spill] sm:$0xff] }
 0x211   : > { %v5942_v42 = vpop.eup %5941  ;;  %2033 = vmatpush1.bf16.msra.mxu0 %v8183_v27  ;;  %2074 = vmatpush1.bf16.msra.mxu1 %v8184_v43  ;;  %v8209_v27 = vld [vmem:[#allocation54_spill] sm:$0xff] }
 0x212   : > { %v5944_v30 = vpop.eup %5943  ;;  %v1616_v45 = vadd.f32 1.0, %v5942_v42  ;;  %2382 = vmatprep.subr.bf16.mxu0 %v8185_v36  ;;  %2423 = vmatprep.subr.bf16.mxu1 %v8186_v46  ;;  %v8208_v42 = vld [vmem:[#allocation53_spill] sm:$0xff] }
 0x213   : > { %v1622_v47 = vadd.f32 1.0, %v5944_v30  ;;  %v5946_v4 = vpop.eup %5945  ;;  %v8211_v30 = vld [vmem:[#allocation56_spill] sm:$0xff]  ;;  %v8212_v46 = vld [vmem:[#allocation57_spill] sm:$0xff] }
 0x214   : > { %5949 = vrcp.f32 %v1616_v45  ;;  %5209 = vmatmul.mubr.msk.bf16.vlgmr.msra.gmra.mrb[20].mxu0 %vm981_vm0, %v5160_v44  ;;  %5210 = vmatmul.mubr.msk.bf16.vlgmr.msra.gmra.mrb[20].mxu1 %vm981_vm0, %v5160_v44  ;;  %v5948_v11 = vpop.eup %5947  ;;  %v1629_v25 = vadd.f32 1.0, %v5946_v4  ;;  %v8210_v44 = vld [vmem:[#allocation55_spill] sm:$0xff] }
 0x215   : > { %5951 = vrcp.f32 %v1622_v47  ;;  %2383 = vmatpush1.bf16.msra.mxu0 %v8187_v48  ;;  %2424 = vmatpush1.bf16.msra.mxu1 %v8188_v5  ;;  %v8213_v48 = vld [vmem:[#allocation58_spill] sm:$0xff]  ;;  %v8214_v5 = vld [vmem:[#allocation59_spill] sm:$0xff] }
 0x216   : > { %2384 = vmatprep.subr.bf16.mxu0 %v8189_v7  ;;  %2425 = vmatprep.subr.bf16.mxu1 %v8190_v8  ;;  %5953 = vrcp.f32 %v1629_v25  ;;  %v7270_v7 = vld [vmem:[#allocation5 + $0x40] ss:$16 sps:$4 sm:$0xff]   ;;  %v7274_v8 = vld [vmem:[#allocation5 + $0x48] ss:$16 sps:$4 sm:$0xff]   ;;  %v7291_v4 = vld [vmem:[#allocation5 + $0x84] ss:$16 sps:$4 sm:$0xff]  }
 0x217   : > { %2414 = vmatprep.mubr.bf16.mxu0 %v8170_v55  ;;  %2455 = vmatprep.mubr.bf16.mxu1 %v8170_v55  ;;  %v7319_v25 = vld [vmem:[#allocation5 + $0xc0] ss:$16 sps:$4 sm:$0xff]  }
 0x219   : > { %2385 = vmatpush1.bf16.msra.mxu0 %v8191_v9  ;;  %2426 = vmatpush1.bf16.msra.mxu1 %v8192_v10  ;;  %v7276_v9 = vld [vmem:[#allocation5 + $0x64] ss:$16 sps:$4 sm:$0xff]   ;;  %v7279_v10 = vld [vmem:[#allocation5 + $0x6c] ss:$16 sps:$4 sm:$0xff]  }
 0x21a   : > { %2386 = vmatprep.subr.bf16.mxu0 %v8193_v2  ;;  %2427 = vmatprep.subr.bf16.mxu1 %v8194_v3  ;;  %v7282_v2 = vld [vmem:[#allocation5 + $0x60] ss:$16 sps:$4 sm:$0xff]   ;;  %v7286_v3 = vld [vmem:[#allocation5 + $0x68] ss:$16 sps:$4 sm:$0xff]  }
 0x21d   : > { %2387 = vmatpush1.bf16.msra.mxu0 %v8195_v15  ;;  %2428 = vmatpush1.bf16.msra.mxu1 %v8196_v16  ;;  %v7297_v15 = vld [vmem:[#allocation5 + $0x88] ss:$16 sps:$4 sm:$0xff]   ;;  %v7303_v16 = vld [vmem:[#allocation5 + $0xa4] ss:$16 sps:$4 sm:$0xff]  }
 0x21e   : > { %v5950_v20 = vpop.eup %5949  ;;  %2388 = vmatprep.subr.bf16.mxu0 %v8197_v21  ;;  %2429 = vmatprep.subr.bf16.mxu1 %v8198_v22  ;;  %v7307_v21 = vld [vmem:[#allocation5 + $0xa0] ss:$16 sps:$4 sm:$0xff]   ;;  %v7309_v22 = vld [vmem:[#allocation5 + $0xa8] ss:$16 sps:$4 sm:$0xff]  }
 0x21f   : > { %v5952_v23 = vpop.eup %5951  ;;  %v1633_v24 = vmul.f32 %v5950_v20, %v5948_v11  ;;  %v7293_v11 = vld [vmem:[#allocation5 + $0x8c] ss:$16 sps:$4 sm:$0xff]  }
 0x220   : > { %v1632_v26 = vmul.f32 %v5952_v23, %v606_v12  ;;  %v5954_v43 = vpop.eup %5953  ;;  %v7305_v20 = vld [vmem:[#allocation5 + $0xac] ss:$16 sps:$4 sm:$0xff]   ;;  %v7315_v23 = vld [vmem:[#allocation5 + $0xc4] ss:$16 sps:$4 sm:$0xff]  }
 0x221   : > { %2389 = vmatpush1.bf16.msra.mxu0 %v8199_v18  ;;  %2430 = vmatpush1.bf16.msra.mxu1 %v8200_v31  ;;  %v7327_v18 = vld [vmem:[#allocation5 + $0xe4] ss:$16 sps:$4 sm:$0xff]   ;;  %v7329_v31 = vld [vmem:[#allocation5 + $0xec] ss:$16 sps:$4 sm:$0xff]  }
 0x222   : > { %v1634_v35 = vadd.f32 %v1633_v24, %v1632_v26  ;;  %2390 = vmatprep.subr.bf16.mxu0 %v8201_v34  ;;  %2431 = vmatprep.subr.bf16.mxu1 %v8202_v14  ;;  %v7317_v24 = vld [vmem:[#allocation5 + $0xcc] ss:$16 sps:$4 sm:$0xff]   ;;  %v7321_v26 = vld [vmem:[#allocation5 + $0xc8] ss:$16 sps:$4 sm:$0xff]   ;;  %v7342_v34 = vld [vmem:[%s8141_s7 + $0x4] ss:$16 sps:$4 sm:$0xff]  }
 0x223   : > { %8220 = vst [vmem:[#allocation29_spill] sm:$0xff] %v7342_v34  ;;  %v7347_v14 = vld [vmem:[%s8141_s7 + $0xc] ss:$16 sps:$4 sm:$0xff]  }
 0x224   : > { %5955 = vtanh.f32 %v1634_v35  ;;  %v7196_v28 = vsel %vm1641_vm10, %v1634_v35, %v606_v12  ;;  %v7295_v12 = vld [vmem:[#allocation5 + $0x80] ss:$16 sps:$4 sm:$0xff]   ;;  %v7333_v35 = vld [vmem:[#allocation5 + $0xe8] ss:$16 sps:$4 sm:$0xff]   ;;  %8221 = vst [vmem:[#allocation30_spill] sm:$0xff] %v7347_v14 }
 0x225   : > { %2391 = vmatpush1.bf16.msra.mxu0 %v6968_v62  ;;  %2432 = vmatpush1.bf16.msra.mxu1 %v8203_v38  ;;  %8219 = vst [vmem:[#allocation28_spill] sm:$0xff] %v7333_v35 }
 0x226   : > { %2392 = vmatprep.subr.bf16.mxu0 %v8204_v39  ;;  %2433 = vmatprep.subr.bf16.mxu1 %v8205_v40 }
 0x229   : > { %2393 = vmatpush1.bf16.msra.mxu0 %v8206_v41  ;;  %2434 = vmatpush1.bf16.msra.mxu1 %v8207_v29 }
 0x22a   : > { %2394 = vmatprep.subr.bf16.mxu0 %v8208_v42  ;;  %2435 = vmatprep.subr.bf16.mxu1 %v8209_v27 }
 0x22d   : > { %2395 = vmatpush1.bf16.msra.mxu0 %v8210_v44  ;;  %2436 = vmatpush1.bf16.msra.mxu1 %v6998_v54  ;;  %v8215_v54 = vld [vmem:[#allocation60_spill] sm:$0xff]  ;;  %v2108_v44 = vld [vmem:[%s8180_s19] sm:$0xf] }
 0x22e   : > { %v5956_v62 = vpop.eup %5955  ;;  %2396 = vmatprep.subr.bf16.mxu0 %v7000_v60  ;;  %2437 = vmatprep.subr.bf16.mxu1 %v8211_v30 }
 0x22f   : > { %v1636_v45 = vmul.f32 %v5956_v62, %v5954_v43  ;;  %v2113_v62 = vrot.slane %v2108_v44, %v7121_v17 }
 0x231   : > { %2397 = vmatpush1.bf16.msra.mxu0 %v7010_v59  ;;  %2438 = vmatpush1.bf16.msra.mxu1 %v7012_v37  ;;  %v1642_v36 = vsel %vm1641_vm10, %v1636_v45, 0.0  ;;  %v7215_v47 = vsel %vm1641_vm10, %v1636_v45, %v8212_v46  ;;  %v8216_v37 = vld [vmem:[#allocation61_spill] sm:$0xff]  ;;  %v8217_v59 = vld [vmem:[#allocation62_spill] sm:$0xff] }
 0x232   : > { %2547 = vmatprep.subr.bf16.mxu0 %v8213_v48  ;;  %2588 = vmatprep.subr.bf16.mxu1 %v8214_v5  ;;  %5158 = vst [vmem:[%s6707_s4 + $0x18] sm:$0xff] %v1642_v36  ;;  %v2189_v60 = vpack.c.bf16 %v7215_v47, %v7215_v47  ;;  %v2117_v36 = vrot.slane %v2108_v44, %v7126_v19 }
 0x234   : > { %2415 = vmatmul.mubr.bf16.vlgmr.msra.gmra.mrb[24].mxu0 %v2189_v60  ;;  %2456 = vmatmul.mubr.bf16.vlgmr.msra.gmra.mrb[24].mxu1 %v2189_v60 }
 0x235   : > { %2548 = vmatpush1.bf16.msra.mxu0 %v7025_v52  ;;  %2589 = vmatpush1.bf16.msra.mxu1 %v8215_v54  ;;  %v5216_v52 = vld [vmem:[%s6669_s25 + $0x8] sm:$0xf] }
 0x236   : > { %2549 = vmatprep.subr.bf16.mxu0 %v8216_v37  ;;  %2590 = vmatprep.subr.bf16.mxu1 %v8217_v59 }
 0x237   : > { %2579 = vmatprep.mubr.bf16.mxu0 %v8170_v55  ;;  %2620 = vmatprep.mubr.bf16.mxu1 %v8170_v55 }
 0x239   : > { %2550 = vmatpush1.bf16.msra.mxu0 %v7040_v49  ;;  %2591 = vmatpush1.bf16.msra.mxu1 %v7042_v57  ;;  %v7259_v49 = vld [vmem:[#allocation5 + $0x28] ss:$16 sps:$4 sm:$0xff]   ;;  %v7261_v57 = vld [vmem:[#allocation5 + $0x2c] ss:$16 sps:$4 sm:$0xff]  }
 0x23a   : > { %2551 = vmatprep.subr.bf16.mxu0 %v7044_v53  ;;  %2592 = vmatprep.subr.bf16.mxu1 %v7046_v51  ;;  %v7243_v51 = vld [vmem:[#allocation5 + $0x4] ss:$16 sps:$4 sm:$0xff]   ;;  %v7249_v53 = vld [vmem:[#allocation5 + $0x8] ss:$16 sps:$4 sm:$0xff]  }
 0x23d   : > { %2552 = vmatpush1.bf16.msra.mxu0 %v7052_v63  ;;  %2593 = vmatpush1.bf16.msra.mxu1 %v7054_v0  ;;  %v7245_v63 = vld [vmem:[#allocation5 + $0xc] ss:$16 sps:$4 sm:$0xff]   ;;  %v7247_v0 = vld [vmem:[#allocation5] ss:$16 sps:$4 sm:$0xff]  }
 0x23e   : > { %2553 = vmatprep.subr.bf16.mxu0 %v7058_v61  ;;  %2594 = vmatprep.subr.bf16.mxu1 %v7060_v50  ;;  %v7263_v61 = vld [vmem:[#allocation5 + $0x44] ss:$16 sps:$4 sm:$0xff]   ;;  %v7266_v50 = vld [vmem:[#allocation5 + $0x4c] ss:$16 sps:$4 sm:$0xff]  }
 0x241   : > { %2554 = vmatpush1.bf16.msra.mxu0 %v7066_v56  ;;  %2595 = vmatpush1.bf16.msra.mxu1 %v7068_v58  ;;  %v7255_v56 = vld [vmem:[#allocation5 + $0x20] ss:$16 sps:$4 sm:$0xff]   ;;  %v7257_v58 = vld [vmem:[#allocation5 + $0x24] ss:$16 sps:$4 sm:$0xff]  }
 0x242   : > { %2903 = vmatprep.subr.bf16.mxu0 %v7243_v51  ;;  %2944 = vmatprep.subr.bf16.mxu1 %v7245_v63 }
 0x244   : > { %5265 = vmatmul.mubr.msk.bf16.vlgmr.msra.gmra.mrb[28].mxu0 %vm981_vm0, %v5216_v52  ;;  %5266 = vmatmul.mubr.msk.bf16.vlgmr.msra.gmra.mrb[28].mxu1 %vm981_vm0, %v5216_v52 }
 0x245   : > { %2935 = vmatprep.mubr.bf16.mxu0 %v8170_v55  ;;  %2976 = vmatprep.mubr.bf16.mxu1 %v8170_v55 }
 0x246   : > { %2904 = vmatpush1.bf16.msra.mxu0 %v7247_v0  ;;  %2945 = vmatpush1.bf16.msra.mxu1 %v7249_v53 }
 0x247   : > { %2905 = vmatprep.subr.bf16.mxu0 %v7257_v58  ;;  %2946 = vmatprep.subr.bf16.mxu1 %v7261_v57 }
 0x24a   : > { %2906 = vmatpush1.bf16.msra.mxu0 %v7255_v56  ;;  %2947 = vmatpush1.bf16.msra.mxu1 %v7259_v49 }
 0x24b   : > { %2907 = vmatprep.subr.bf16.mxu0 %v7263_v61  ;;  %2948 = vmatprep.subr.bf16.mxu1 %v7266_v50 }
 0x24e   : > { %2908 = vmatpush1.bf16.msra.mxu0 %v7270_v7  ;;  %2949 = vmatpush1.bf16.msra.mxu1 %v7274_v8 }
 0x24f   : > { %2909 = vmatprep.subr.bf16.mxu0 %v7276_v9  ;;  %2950 = vmatprep.subr.bf16.mxu1 %v7279_v10 }
 0x252   : > { %2910 = vmatpush1.bf16.msra.mxu0 %v7282_v2  ;;  %2951 = vmatpush1.bf16.msra.mxu1 %v7286_v3 }
 0x253   : > { %2911 = vmatprep.subr.bf16.mxu0 %v7291_v4  ;;  %2952 = vmatprep.subr.bf16.mxu1 %v7293_v11 }
 0x256   : > { %2912 = vmatpush1.bf16.msra.mxu0 %v7295_v12  ;;  %2953 = vmatpush1.bf16.msra.mxu1 %v7297_v15 }
 0x257   : > { %2913 = vmatprep.subr.bf16.mxu0 %v7303_v16  ;;  %2954 = vmatprep.subr.bf16.mxu1 %v7305_v20 }
 0x25a   : > { %2914 = vmatpush1.bf16.msra.mxu0 %v7307_v21  ;;  %2955 = vmatpush1.bf16.msra.mxu1 %v7309_v22 }
 0x25b   : > { %2915 = vmatprep.subr.bf16.mxu0 %v7315_v23  ;;  %2956 = vmatprep.subr.bf16.mxu1 %v7317_v24 }
 0x25e   : > { %2916 = vmatpush1.bf16.msra.mxu0 %v7319_v25  ;;  %2957 = vmatpush1.bf16.msra.mxu1 %v7321_v26 }
 0x25f   : > { %2917 = vmatprep.subr.bf16.mxu0 %v7327_v18  ;;  %2958 = vmatprep.subr.bf16.mxu1 %v7329_v31 }
 0x262   : > { %2918 = vmatpush1.bf16.msra.mxu0 %v7331_v33  ;;  %2959 = vmatpush1.bf16.msra.mxu1 %v7333_v35  ;;  %v2125_v35 = vrot.slane %v2108_v44, %v7132_v32 }
 0x263   : > { %3068 = vmatprep.subr.bf16.mxu0 %v7342_v34  ;;  %3109 = vmatprep.subr.bf16.mxu1 %v7347_v14 }
 0x2d7   : > { %v1895_v38 = vpop.f32.mrb[16].mxu0  ;;  %v1936_v39 = vpop.f32.mrb[16].mxu1 }
 0x2d8   : > { %v1897_v40 = vpop.f32.mrb[17].mxu0  ;;  %v1938_v41 = vpop.f32.mrb[17].mxu1 }
 0x2d9   : > { %v1899_v29 = vpop.f32.mrb[18].mxu0  ;;  %v1940_v42 = vpop.f32.mrb[18].mxu1 }
 0x2da   : > { %v1900_v27 = vpop.f32.mrb[19].mxu0  ;;  %v1941_v43 = vpop.f32.mrb[19].mxu1 }
 0x2e7   : > { %v2060_v30 = vpop.f32.mrb[20].mxu0  ;;  %v2101_v45 = vpop.f32.mrb[20].mxu1 }
 0x2e8   : > { %v2061_v46 = vadd.f32 %v2060_v30, %v1895_v38  ;;  %v2102_v48 = vadd.f32 %v2101_v45, %v1936_v39  ;;  %v2062_v5 = vpop.f32.mrb[21].mxu0  ;;  %v2103_v60 = vpop.f32.mrb[21].mxu1  ;;  %v2121_v38 = vrot.slane %v2108_v44, %v7135_v1 }
 0x2e9   : > { %v2063_v54 = vadd.f32 %v2062_v5, %v1897_v40  ;;  %v2104_v37 = vadd.f32 %v2103_v60, %v1938_v41  ;;  %v2064_v59 = vpop.f32.mrb[22].mxu0  ;;  %v2105_v52 = vpop.f32.mrb[22].mxu1 }
 0x2ea   : > { %v2130_v29 = vadd.f32 %v2113_v62, %v2061_v46  ;;  %v2065_v42 = vpop.f32.mrb[23].mxu0  ;;  %v2106_v27 = vpop.f32.mrb[23].mxu1  ;;  %v2132_v30 = vadd.f32 %v2121_v38, %v2102_v48  ;;  %v7366_v38 = vld [vmem:[%s8181_s3] sm:$0xf] }
 0x2eb   : > { %v2131_v43 = vadd.f32 %v2117_v36, %v2063_v54  ;;  %v2133_v33 = vadd.f32 %v2125_v35, %v2104_v37  ;;  %v2161_v60 = vpop.permute.xlu1 %2160 }
 0x2ec   : > { %v5211_v14 = vmul.f32 -1.442695, %v2130_v29  ;;  %vm2162_vm11 = vcmp.eq.s32.totalorder %v2161_v60, 1  ;;  %v7398_v60 = vld [vmem:[%s8141_s7 + $0x2c] ss:$16 sps:$4 sm:$0xff]  }
 0x2ed   : > { %v5212_v34 = vmul.f32 -1.442695, %v2131_v43  ;;  %v5213_v39 = vmul.f32 -1.442695, %v2133_v33 }
 0x2ee   : > { %5957 = vpow2.f32 %v5211_v14 }
 0x2ef   : > { %5959 = vpow2.f32 %v5212_v34 }
 0x2f0   : > { %5961 = vpow2.f32 %v5213_v39 }
 0x2f1   : > { %5963 = vtanh.f32 %v2132_v30 }
 0x2f8   : > { %v5958_v45 = vpop.eup %5957 }
 0x2f9   : > { %v5960_v40 = vpop.eup %5959  ;;  %v2137_v41 = vadd.f32 1.0, %v5958_v45 }
 0x2fa   : > { %v2143_v62 = vadd.f32 1.0, %v5960_v40  ;;  %v5962_v36 = vpop.eup %5961  ;;  %v2634_v40 = vrot.slane %v7366_v38, %v7121_v17 }
 0x2fb   : > { %5965 = vrcp.f32 %v2137_v41  ;;  %v5964_v46 = vpop.eup %5963  ;;  %v2150_v14 = vadd.f32 1.0, %v5962_v36  ;;  %v2638_v36 = vrot.slane %v7366_v38, %v7126_v19 }
 0x2fc   : > { %5967 = vrcp.f32 %v2143_v62 }
 0x2fd   : > { %5969 = vrcp.f32 %v2150_v14 }
 0x305   : > { %v5966_v5 = vpop.eup %5965 }
 0x306   : > { %v5968_v54 = vpop.eup %5967  ;;  %v2154_v34 = vmul.f32 %v5966_v5, %v5964_v46 }
 0x307   : > { %v2416_v35 = vpop.f32.mrb[24].mxu0  ;;  %v2457_v37 = vpop.f32.mrb[24].mxu1  ;;  %v2153_v33 = vmul.f32 %v5968_v54, %v7139_v6 }
 0x308   : > { %v2418_v44 = vpop.f32.mrb[25].mxu0  ;;  %v2459_v48 = vpop.f32.mrb[25].mxu1 }
 0x309   : > { %v2155_v59 = vadd.f32 %v2154_v34, %v2153_v33  ;;  %v2420_v52 = vpop.f32.mrb[26].mxu0  ;;  %v2461_v29 = vpop.f32.mrb[26].mxu1 }
 0x30a   : > { %v2421_v42 = vpop.f32.mrb[27].mxu0  ;;  %v2462_v27 = vpop.f32.mrb[27].mxu1 }
 0x30b   : > { %5971 = vtanh.f32 %v2155_v59  ;;  %v7361_v43 = vsel %vm2162_vm11, %v2155_v59, %v7139_v6  ;;  %v5970_v39 = vpop.eup %5969  ;;  %v7375_v6 = vld [vmem:[%s8141_s7] ss:$16 sps:$4 sm:$0xff]   ;;  %v7385_v59 = vld [vmem:[%s8141_s7 + $0x8] ss:$16 sps:$4 sm:$0xff]  }
 0x315   : > { %v5972_v30 = vpop.eup %5971 }
 0x316   : > { %v2157_v45 = vmul.f32 %v5972_v30, %v5970_v39 }
 0x317   : > { %v2581_v41 = vpop.f32.mrb[28].mxu0  ;;  %v2622_v62 = vpop.f32.mrb[28].mxu1 }
 0x318   : > { %v2163_v46 = vsel %vm2162_vm11, %v2157_v45, 0.0  ;;  %v7380_v5 = vsel %vm2162_vm11, %v2157_v45, %v7149_v13  ;;  %v2582_v54 = vadd.f32 %v2581_v41, %v2416_v35  ;;  %v2623_v14 = vadd.f32 %v2622_v62, %v2457_v37  ;;  %v2583_v34 = vpop.f32.mrb[29].mxu0  ;;  %v2624_v33 = vpop.f32.mrb[29].mxu1  ;;  %v7393_v13 = vld [vmem:[%s8141_s7 + $0x24] ss:$16 sps:$4 sm:$0xff]  }
 0x319   : > { %5214 = vst [vmem:[%s6705_s8 + $0x8] sm:$0xff] %v2163_v46  ;;  %v2710_v52 = vpack.c.bf16 %v7380_v5, %v7380_v5  ;;  %v2584_v29 = vadd.f32 %v2583_v34, %v2418_v44  ;;  %v2625_v42 = vadd.f32 %v2624_v33, %v2459_v48  ;;  %v2585_v27 = vpop.f32.mrb[30].mxu0  ;;  %v2626_v35 = vpop.f32.mrb[30].mxu1  ;;  %v7405_v48 = vld [vmem:[%s8141_s7 + $0x20] ss:$16 sps:$4 sm:$0xff]   ;;  %v2646_v62 = vrot.slane %v7366_v38, %v7132_v32 }
 0x31a   : > { %v2651_v37 = vadd.f32 %v2634_v40, %v2582_v54  ;;  %v2586_v39 = vpop.f32.mrb[31].mxu0  ;;  %v2627_v30 = vpop.f32.mrb[31].mxu1  ;;  %v7410_v41 = vld [vmem:[%s8141_s7 + $0x28] ss:$16 sps:$4 sm:$0xff]   ;;  %v7424_v46 = vld [vmem:[%s8141_s7 + $0x4c] ss:$16 sps:$4 sm:$0xff]   ;;  %v2642_v27 = vrot.slane %v7366_v38, %v7135_v1 }
 0x31b   : > { %v2652_v45 = vadd.f32 %v2638_v36, %v2584_v29  ;;  %2936 = vmatmul.mubr.bf16.vlgmr.msra.gmra.mrb[32].mxu0 %v2710_v52  ;;  %2977 = vmatmul.mubr.bf16.vlgmr.msra.gmra.mrb[32].mxu1 %v2710_v52  ;;  %v7419_v36 = vld [vmem:[%s8141_s7 + $0x44] ss:$16 sps:$4 sm:$0xff]   ;;  %v7433_v54 = vld [vmem:[%s8141_s7 + $0x40] ss:$16 sps:$4 sm:$0xff]   ;;  %v7438_v34 = vld [vmem:[%s8141_s7 + $0x48] ss:$16 sps:$4 sm:$0xff]   ;;  %v2654_v33 = vadd.f32 %v2646_v62, %v2625_v42 }
 0x31c   : > { %v5267_v44 = vmul.f32 -1.442695, %v2651_v37  ;;  %3069 = vmatpush1.bf16.msra.mxu0 %v7375_v6  ;;  %3110 = vmatpush1.bf16.msra.mxu1 %v7385_v59  ;;  %8222 = vst [vmem:[#allocation31_spill] sm:$0xff] %v7438_v34  ;;  %v7445_v52 = vld [vmem:[%s8141_s7 + $0x64] ss:$16 sps:$4 sm:$0xff]   ;;  %v2653_v30 = vadd.f32 %v2642_v27, %v2623_v14 }
 0x31d   : > { %v5268_v40 = vmul.f32 -1.442695, %v2652_v45  ;;  %3070 = vmatprep.subr.bf16.mxu0 %v7393_v13  ;;  %3111 = vmatprep.subr.bf16.mxu1 %v7398_v60  ;;  %8223 = vst [vmem:[#allocation32_spill] sm:$0xff] %v7445_v52  ;;  %v7450_v29 = vld [vmem:[%s8141_s7 + $0x6c] ss:$16 sps:$4 sm:$0xff]  }
 0x31e   : > { %5973 = vpow2.f32 %v5267_v44  ;;  %3100 = vmatprep.mubr.bf16.mxu0 %v8170_v55  ;;  %3141 = vmatprep.mubr.bf16.mxu1 %v8170_v55  ;;  %8224 = vst [vmem:[#allocation33_spill] sm:$0xff] %v7450_v29  ;;  %v7459_v42 = vld [vmem:[%s8141_s7 + $0x60] ss:$16 sps:$4 sm:$0xff]   ;;  %v7464_v35 = vld [vmem:[%s8141_s7 + $0x68] ss:$16 sps:$4 sm:$0xff]  }
 0x31f   : > { %5975 = vpow2.f32 %v5268_v40  ;;  %8225 = vst [vmem:[#allocation34_spill] sm:$0xff] %v7459_v42  ;;  %8226 = vst [vmem:[#allocation35_spill] sm:$0xff] %v7464_v35  ;;  %v5269_v37 = vmul.f32 -1.442695, %v2654_v33  ;;  %v7468_v38 = vld [vmem:[#allocation8 + $0x4] ss:$16 sps:$4 sm:$0xff]  }
 0x320   : > { %3071 = vmatpush1.bf16.msra.mxu0 %v7405_v48  ;;  %3112 = vmatpush1.bf16.msra.mxu1 %v7410_v41  ;;  %8227 = vst [vmem:[#allocation36_spill] sm:$0xff] %v7468_v38  ;;  %v7470_v39 = vld [vmem:[#allocation8 + $0xc] ss:$16 sps:$4 sm:$0xff]   ;;  %v5272_v44 = vld [vmem:[%s6698_s13 + $0x8] sm:$0xf] }
 0x321   : > { %3072 = vmatprep.subr.bf16.mxu0 %v7419_v36  ;;  %3113 = vmatprep.subr.bf16.mxu1 %v7424_v46  ;;  %8228 = vst [vmem:[#allocation37_spill] sm:$0xff] %v7470_v39  ;;  %v7475_v40 = vld [vmem:[#allocation8] ss:$16 sps:$4 sm:$0xff]   ;;  %v7477_v62 = vld [vmem:[#allocation8 + $0x8] ss:$16 sps:$4 sm:$0xff]   ;;  %5977 = vpow2.f32 %v5269_v37 }
 0x322   : > { %8229 = vst [vmem:[#allocation38_spill] sm:$0xff] %v7475_v40  ;;  %8230 = vst [vmem:[#allocation39_spill] sm:$0xff] %v7477_v62  ;;  %v7483_v14 = vld [vmem:[#allocation8 + $0x2c] ss:$16 sps:$4 sm:$0xff]   ;;  %5979 = vtanh.f32 %v2653_v30  ;;  %v7489_v37 = vld [vmem:[#allocation8 + $0x20] ss:$16 sps:$4 sm:$0xff]  }
 0x323   : > { %8232 = vst [vmem:[#allocation41_spill] sm:$0xff] %v7483_v14  ;;  %8233 = vst [vmem:[#allocation42_spill] sm:$0xff] %v7489_v37  ;;  %v7495_v30 = vld [vmem:[#allocation8 + $0x44] ss:$16 sps:$4 sm:$0xff]  }
 0x324   : > { %3073 = vmatpush1.bf16.msra.mxu0 %v7433_v54  ;;  %3114 = vmatpush1.bf16.msra.mxu1 %v7438_v34  ;;  %8235 = vst [vmem:[#allocation44_spill] sm:$0xff] %v7495_v30 }
 0x325   : > { %3074 = vmatprep.subr.bf16.mxu0 %v7445_v52  ;;  %3115 = vmatprep.subr.bf16.mxu1 %v7450_v29  ;;  %v7481_v29 = vld [vmem:[#allocation8 + $0x24] ss:$16 sps:$4 sm:$0xff]  }
 0x326   : > { %8231 = vst [vmem:[#allocation40_spill] sm:$0xff] %v7481_v29 }
 0x328   : > { %v5974_v45 = vpop.eup %5973  ;;  %3075 = vmatpush1.bf16.msra.mxu0 %v7459_v42  ;;  %3116 = vmatpush1.bf16.msra.mxu1 %v7464_v35  ;;  %v7530_v42 = vld [vmem:[#allocation8 + $0x88] ss:$16 sps:$4 sm:$0xff]  }
 0x329   : > { %v5976_v33 = vpop.eup %5975  ;;  %v2658_v34 = vadd.f32 1.0, %v5974_v45  ;;  %3424 = vmatprep.subr.bf16.mxu0 %v7468_v38  ;;  %3465 = vmatprep.subr.bf16.mxu1 %v7470_v39  ;;  %v7491_v45 = vld [vmem:[#allocation8 + $0x28] ss:$16 sps:$4 sm:$0xff]   ;;  %8243 = vst [vmem:[#allocation52_spill] sm:$0xff] %v7530_v42 }
 0x32a   : > { %v2664_v27 = vadd.f32 1.0, %v5976_v33  ;;  %8234 = vst [vmem:[#allocation43_spill] sm:$0xff] %v7491_v45  ;;  %v7505_v33 = vld [vmem:[#allocation8 + $0x48] ss:$16 sps:$4 sm:$0xff]  }
 0x32b   : > { %5981 = vrcp.f32 %v2658_v34  ;;  %5321 = vmatmul.mubr.msk.bf16.vlgmr.msra.gmra.mrb[36].mxu0 %vm981_vm0, %v5272_v44  ;;  %5322 = vmatmul.mubr.msk.bf16.vlgmr.msra.gmra.mrb[36].mxu1 %vm981_vm0, %v5272_v44  ;;  %v7497_v34 = vld [vmem:[#allocation8 + $0x4c] ss:$16 sps:$4 sm:$0xff]   ;;  %v7503_v44 = vld [vmem:[#allocation8 + $0x40] ss:$16 sps:$4 sm:$0xff]   ;;  %8238 = vst [vmem:[#allocation47_spill] sm:$0xff] %v7505_v33 }
 0x32c   : > { %5983 = vrcp.f32 %v2664_v27  ;;  %3425 = vmatpush1.bf16.msra.mxu0 %v7475_v40  ;;  %3466 = vmatpush1.bf16.msra.mxu1 %v7477_v62  ;;  %8236 = vst [vmem:[#allocation45_spill] sm:$0xff] %v7497_v34  ;;  %8237 = vst [vmem:[#allocation46_spill] sm:$0xff] %v7503_v44  ;;  %v7509_v27 = vld [vmem:[#allocation8 + $0x64] ss:$16 sps:$4 sm:$0xff]  }
 0x32d   : > { %3426 = vmatprep.subr.bf16.mxu0 %v7481_v29  ;;  %3467 = vmatprep.subr.bf16.mxu1 %v7483_v14  ;;  %8239 = vst [vmem:[#allocation48_spill] sm:$0xff] %v7509_v27  ;;  %v7511_v14 = vld [vmem:[#allocation8 + $0x6c] ss:$16 sps:$4 sm:$0xff]   ;;  %v5978_v29 = vpop.eup %5977 }
 0x32e   : > { %3456 = vmatprep.mubr.bf16.mxu0 %v8170_v55  ;;  %3497 = vmatprep.mubr.bf16.mxu1 %v8170_v55  ;;  %8240 = vst [vmem:[#allocation49_spill] sm:$0xff] %v7511_v14  ;;  %v5980_v62 = vpop.eup %5979  ;;  %v2671_v35 = vadd.f32 1.0, %v5978_v29 }
 0x330   : > { %3427 = vmatpush1.bf16.msra.mxu0 %v7489_v37  ;;  %3468 = vmatpush1.bf16.msra.mxu1 %v7491_v45  ;;  %v7515_v37 = vld [vmem:[#allocation8 + $0x60] ss:$16 sps:$4 sm:$0xff]   ;;  %v7517_v45 = vld [vmem:[#allocation8 + $0x68] ss:$16 sps:$4 sm:$0xff]   ;;  %5985 = vrcp.f32 %v2671_v35  ;;  %v7552_v35 = vld [vmem:[#allocation8 + $0xcc] ss:$16 sps:$4 sm:$0xff]  }
 0x331   : > { %3428 = vmatprep.subr.bf16.mxu0 %v7495_v30  ;;  %3469 = vmatprep.subr.bf16.mxu1 %v7497_v34  ;;  %v7521_v34 = vld [vmem:[#allocation8 + $0x84] ss:$16 sps:$4 sm:$0xff]   ;;  %v7523_v30 = vld [vmem:[#allocation8 + $0x8c] ss:$16 sps:$4 sm:$0xff]   ;;  %8249 = vst [vmem:[#allocation58_spill] sm:$0xff] %v7552_v35 }
 0x332   : > { %8241 = vst [vmem:[#allocation50_spill] sm:$0xff] %v7523_v30 }
 0x334   : > { %3429 = vmatpush1.bf16.msra.mxu0 %v7503_v44  ;;  %3470 = vmatpush1.bf16.msra.mxu1 %v7505_v33  ;;  %v7528_v33 = vld [vmem:[#allocation8 + $0x80] ss:$16 sps:$4 sm:$0xff]  }
 0x335   : > { %v5982_v40 = vpop.eup %5981  ;;  %3430 = vmatprep.subr.bf16.mxu0 %v7509_v27  ;;  %3471 = vmatprep.subr.bf16.mxu1 %v7511_v14  ;;  %8242 = vst [vmem:[#allocation51_spill] sm:$0xff] %v7528_v33  ;;  %v2682_v27 = vpop.permute.xlu1 %2681  ;;  %v7534_v14 = vld [vmem:[#allocation8 + $0xa4] ss:$16 sps:$4 sm:$0xff]  }
 0x336   : > { %v5984_v39 = vpop.eup %5983  ;;  %v2675_v38 = vmul.f32 %v5982_v40, %v5980_v62  ;;  %8244 = vst [vmem:[#allocation53_spill] sm:$0xff] %v7534_v14  ;;  %v7536_v40 = vld [vmem:[#allocation8 + $0xac] ss:$16 sps:$4 sm:$0xff]   ;;  %vm2683_vm12 = vcmp.eq.s32.totalorder %v2682_v27, 1  ;;  %v7550_v62 = vld [vmem:[#allocation8 + $0xc4] ss:$16 sps:$4 sm:$0xff]  }
 0x337   : > { %v2674_v44 = vmul.f32 %v5984_v39, %v7196_v28  ;;  %8245 = vst [vmem:[#allocation54_spill] sm:$0xff] %v7536_v40  ;;  %v7546_v39 = vld [vmem:[#allocation8 + $0xa8] ss:$16 sps:$4 sm:$0xff]   ;;  %8248 = vst [vmem:[#allocation57_spill] sm:$0xff] %v7550_v62  ;;  %v7608_v27 = vld [vmem:[#allocation7 + $0x4c] ss:$16 sps:$4 sm:$0xff]  }
 0x338   : > { %3431 = vmatpush1.bf16.msra.mxu0 %v7515_v37  ;;  %3472 = vmatpush1.bf16.msra.mxu1 %v7517_v45  ;;  %8247 = vst [vmem:[#allocation56_spill] sm:$0xff] %v7546_v39  ;;  %8259 = vst [vmem:[#allocation68_spill] sm:$0xff] %v7608_v27 }
 0x339   : > { %v2676_v52 = vadd.f32 %v2675_v38, %v2674_v44  ;;  %3432 = vmatprep.subr.bf16.mxu0 %v7521_v34  ;;  %3473 = vmatprep.subr.bf16.mxu1 %v7523_v30  ;;  %v7544_v38 = vld [vmem:[#allocation8 + $0xa0] ss:$16 sps:$4 sm:$0xff]   ;;  %v7562_v44 = vld [vmem:[#allocation8 + $0xe4] ss:$16 sps:$4 sm:$0xff]  }
 0x33a   : > { %8246 = vst [vmem:[#allocation55_spill] sm:$0xff] %v7544_v38  ;;  %8252 = vst [vmem:[#allocation61_spill] sm:$0xff] %v7562_v44 }
 0x33b   : > { %5987 = vtanh.f32 %v2676_v52  ;;  %v7540_v29 = vsel %vm2683_vm12, %v2676_v52, %v7196_v28  ;;  %v7556_v28 = vld [vmem:[#allocation8 + $0xc0] ss:$16 sps:$4 sm:$0xff]   ;;  %v7558_v52 = vld [vmem:[#allocation8 + $0xc8] ss:$16 sps:$4 sm:$0xff]  }
 0x33c   : > { %3433 = vmatpush1.bf16.msra.mxu0 %v7528_v33  ;;  %3474 = vmatpush1.bf16.msra.mxu1 %v7530_v42  ;;  %8250 = vst [vmem:[#allocation59_spill] sm:$0xff] %v7556_v28  ;;  %8251 = vst [vmem:[#allocation60_spill] sm:$0xff] %v7558_v52 }
 0x33d   : > { %3434 = vmatprep.subr.bf16.mxu0 %v7534_v14  ;;  %3475 = vmatprep.subr.bf16.mxu1 %v7536_v40  ;;  %v7564_v14 = vld [vmem:[#allocation8 + $0xec] ss:$16 sps:$4 sm:$0xff]   ;;  %v5986_v40 = vpop.eup %5985 }
 0x340   : > { %3435 = vmatpush1.bf16.msra.mxu0 %v7544_v38  ;;  %3476 = vmatpush1.bf16.msra.mxu1 %v7546_v39  ;;  %v7568_v38 = vld [vmem:[#allocation8 + $0xe0] ss:$16 sps:$4 sm:$0xff]   ;;  %v7570_v39 = vld [vmem:[#allocation8 + $0xe8] ss:$16 sps:$4 sm:$0xff]  }
 0x341   : > { %3436 = vmatprep.subr.bf16.mxu0 %v7550_v62  ;;  %3477 = vmatprep.subr.bf16.mxu1 %v7552_v35  ;;  %8253 = vst [vmem:[#allocation62_spill] sm:$0xff] %v7570_v39  ;;  %v7574_v35 = vld [vmem:[#allocation7 + $0x4] ss:$16 sps:$4 sm:$0xff]   ;;  %v7576_v62 = vld [vmem:[#allocation7 + $0xc] ss:$16 sps:$4 sm:$0xff]  }
 0x344   : > { %3437 = vmatpush1.bf16.msra.mxu0 %v7556_v28  ;;  %3478 = vmatpush1.bf16.msra.mxu1 %v7558_v52  ;;  %v7580_v52 = vld [vmem:[#allocation7] ss:$16 sps:$4 sm:$0xff]   ;;  %v7582_v28 = vld [vmem:[#allocation7 + $0x8] ss:$16 sps:$4 sm:$0xff]  }
 0x345   : > { %v5988_v42 = vpop.eup %5987  ;;  %3438 = vmatprep.subr.bf16.mxu0 %v7562_v44  ;;  %3479 = vmatprep.subr.bf16.mxu1 %v7564_v14  ;;  %8254 = vst [vmem:[#allocation63_spill] sm:$0xff] %v7580_v52  ;;  %8255 = vst [vmem:[#allocation64_spill] sm:$0xff] %v7582_v28 }
 0x346   : > { %v2678_v33 = vmul.f32 %v5988_v42, %v5986_v40  ;;  %v7594_v40 = vld [vmem:[#allocation7 + $0x24] ss:$16 sps:$4 sm:$0xff]  }
 0x347   : > { %8256 = vst [vmem:[#allocation65_spill] sm:$0xff] %v7594_v40 }
 0x348   : > { %3439 = vmatpush1.bf16.msra.mxu0 %v7568_v38  ;;  %3480 = vmatpush1.bf16.msra.mxu1 %v7570_v39  ;;  %v2684_v30 = vsel %vm2683_vm12, %v2678_v33, 0.0  ;;  %v7587_v44 = vsel %vm2683_vm12, %v2678_v33, %v7215_v47  ;;  %v7596_v39 = vld [vmem:[#allocation7 + $0x2c] ss:$16 sps:$4 sm:$0xff]   ;;  %v7600_v47 = vld [vmem:[#allocation7 + $0x20] ss:$16 sps:$4 sm:$0xff]  }
 0x349   : > { %3589 = vmatprep.subr.bf16.mxu0 %v7574_v35  ;;  %3630 = vmatprep.subr.bf16.mxu1 %v7576_v62  ;;  %5270 = vst [vmem:[%s6707_s4 + $0x10] sm:$0xff] %v2684_v30  ;;  %v3231_v42 = vpack.c.bf16 %v7587_v44, %v7587_v44  ;;  %8257 = vst [vmem:[#allocation66_spill] sm:$0xff] %v7596_v39  ;;  %v7602_v33 = vld [vmem:[#allocation7 + $0x28] ss:$16 sps:$4 sm:$0xff]   ;;  %v7606_v30 = vld [vmem:[#allocation7 + $0x44] ss:$16 sps:$4 sm:$0xff]  }
 0x34a   : > { %8258 = vst [vmem:[#allocation67_spill] sm:$0xff] %v7600_v47 }
 0x34b   : > { %3457 = vmatmul.mubr.bf16.vlgmr.msra.gmra.mrb[40].mxu0 %v3231_v42  ;;  %3498 = vmatmul.mubr.bf16.vlgmr.msra.gmra.mrb[40].mxu1 %v3231_v42  ;;  %v7614_v42 = vld [vmem:[#allocation7 + $0x40] ss:$16 sps:$4 sm:$0xff]  }
 0x34c   : > { %3590 = vmatpush1.bf16.msra.mxu0 %v7580_v52  ;;  %3631 = vmatpush1.bf16.msra.mxu1 %v7582_v28  ;;  %v7616_v28 = vld [vmem:[#allocation7 + $0x48] ss:$16 sps:$4 sm:$0xff]  }
 0x34d   : > { %3591 = vmatprep.subr.bf16.mxu0 %v7594_v40  ;;  %3632 = vmatprep.subr.bf16.mxu1 %v7596_v39  ;;  %v7620_v39 = vld [vmem:[#allocation7 + $0x64] ss:$16 sps:$4 sm:$0xff]   ;;  %v7622_v40 = vld [vmem:[#allocation7 + $0x6c] ss:$16 sps:$4 sm:$0xff]   ;;  %v7628_v52 = vld [vmem:[#allocation7 + $0x68] ss:$16 sps:$4 sm:$0xff]  }
 0x34e   : > { %3621 = vmatprep.mubr.bf16.mxu0 %v8170_v55  ;;  %3662 = vmatprep.mubr.bf16.mxu1 %v8170_v55 }
 0x350   : > { %3592 = vmatpush1.bf16.msra.mxu0 %v7600_v47  ;;  %3633 = vmatpush1.bf16.msra.mxu1 %v7602_v33  ;;  %v7626_v47 = vld [vmem:[#allocation7 + $0x60] ss:$16 sps:$4 sm:$0xff]  }
 0x351   : > { %3593 = vmatprep.subr.bf16.mxu0 %v7606_v30  ;;  %3634 = vmatprep.subr.bf16.mxu1 %v7608_v27  ;;  %v5328_v27 = vld [vmem:[%s6669_s25 + $0x4] sm:$0xf] }
 0x354   : > { %3594 = vmatpush1.bf16.msra.mxu0 %v7614_v42  ;;  %3635 = vmatpush1.bf16.msra.mxu1 %v7616_v28 }
 0x355   : > { %3595 = vmatprep.subr.bf16.mxu0 %v7620_v39  ;;  %3636 = vmatprep.subr.bf16.mxu1 %v7622_v40 }
 0x358   : > { %3596 = vmatpush1.bf16.msra.mxu0 %v7626_v47  ;;  %3637 = vmatpush1.bf16.msra.mxu1 %v7628_v52 }
 0x359   : > { %3945 = vmatprep.subr.bf16.mxu0 %v7243_v51  ;;  %3986 = vmatprep.subr.bf16.mxu1 %v7245_v63  ;;  %v8260_v51 = vld [vmem:[#allocation27_spill] sm:$0xff]  ;;  %v8261_v63 = vld [vmem:[#allocation28_spill] sm:$0xff] }
 0x35b   : > { %5377 = vmatmul.mubr.msk.bf16.vlgmr.msra.gmra.mrb[44].mxu0 %vm981_vm0, %v5328_v27  ;;  %5378 = vmatmul.mubr.msk.bf16.vlgmr.msra.gmra.mrb[44].mxu1 %vm981_vm0, %v5328_v27 }
 0x35c   : > { %3946 = vmatpush1.bf16.msra.mxu0 %v7247_v0  ;;  %3987 = vmatpush1.bf16.msra.mxu1 %v7249_v53  ;;  %v8262_v0 = vld [vmem:[#allocation29_spill] sm:$0xff]  ;;  %v8263_v53 = vld [vmem:[#allocation30_spill] sm:$0xff] }
 0x35d   : > { %3947 = vmatprep.subr.bf16.mxu0 %v7257_v58  ;;  %3988 = vmatprep.subr.bf16.mxu1 %v7261_v57 }
 0x35e   : > { %3977 = vmatprep.mubr.bf16.mxu0 %v8170_v55  ;;  %4018 = vmatprep.mubr.bf16.mxu1 %v8170_v55 }
 0x360   : > { %3948 = vmatpush1.bf16.msra.mxu0 %v7255_v56  ;;  %3989 = vmatpush1.bf16.msra.mxu1 %v7259_v49 }
 0x361   : > { %3949 = vmatprep.subr.bf16.mxu0 %v7263_v61  ;;  %3990 = vmatprep.subr.bf16.mxu1 %v7266_v50 }
 0x364   : > { %3950 = vmatpush1.bf16.msra.mxu0 %v7270_v7  ;;  %3991 = vmatpush1.bf16.msra.mxu1 %v7274_v8 }
 0x365   : > { %3951 = vmatprep.subr.bf16.mxu0 %v7276_v9  ;;  %3992 = vmatprep.subr.bf16.mxu1 %v7279_v10  ;;  %v3150_v9 = vld [vmem:[%s8180_s19] sm:$0xf] }
 0x366   : > { %v3155_v10 = vrot.slane %v3150_v9, %v7121_v17 }
 0x368   : > { %3952 = vmatpush1.bf16.msra.mxu0 %v7282_v2  ;;  %3993 = vmatpush1.bf16.msra.mxu1 %v7286_v3 }
 0x369   : > { %3953 = vmatprep.subr.bf16.mxu0 %v7291_v4  ;;  %3994 = vmatprep.subr.bf16.mxu1 %v7293_v11  ;;  %v3159_v4 = vrot.slane %v3150_v9, %v7126_v19 }
 0x36c   : > { %3954 = vmatpush1.bf16.msra.mxu0 %v7295_v12  ;;  %3995 = vmatpush1.bf16.msra.mxu1 %v7297_v15 }
 0x36d   : > { %3955 = vmatprep.subr.bf16.mxu0 %v7303_v16  ;;  %3996 = vmatprep.subr.bf16.mxu1 %v7305_v20 }
 0x370   : > { %3956 = vmatpush1.bf16.msra.mxu0 %v7307_v21  ;;  %3997 = vmatpush1.bf16.msra.mxu1 %v7309_v22 }
 0x371   : > { %3957 = vmatprep.subr.bf16.mxu0 %v7315_v23  ;;  %3998 = vmatprep.subr.bf16.mxu1 %v7317_v24 }
 0x374   : > { %3958 = vmatpush1.bf16.msra.mxu0 %v7319_v25  ;;  %3999 = vmatpush1.bf16.msra.mxu1 %v7321_v26 }
 0x375   : > { %3959 = vmatprep.subr.bf16.mxu0 %v7327_v18  ;;  %4000 = vmatprep.subr.bf16.mxu1 %v7329_v31 }
 0x378   : > { %3960 = vmatpush1.bf16.msra.mxu0 %v8260_v51  ;;  %4001 = vmatpush1.bf16.msra.mxu1 %v8261_v63  ;;  %v3167_v51 = vrot.slane %v3150_v9, %v7132_v32 }
 0x379   : > { %4110 = vmatprep.subr.bf16.mxu0 %v8262_v0  ;;  %4151 = vmatprep.subr.bf16.mxu1 %v8263_v53  ;;  %v3163_v0 = vrot.slane %v3150_v9, %v7135_v1 }
 0x3ee   : > { %v2937_v56 = vpop.f32.mrb[32].mxu0  ;;  %v2978_v58 = vpop.f32.mrb[32].mxu1 }
 0x3ef   : > { %v2939_v49 = vpop.f32.mrb[33].mxu0  ;;  %v2980_v57 = vpop.f32.mrb[33].mxu1 }
 0x3f0   : > { %v2941_v61 = vpop.f32.mrb[34].mxu0  ;;  %v2982_v50 = vpop.f32.mrb[34].mxu1 }
 0x3f1   : > { %v2942_v7 = vpop.f32.mrb[35].mxu0  ;;  %v2983_v8 = vpop.f32.mrb[35].mxu1 }
 0x3fe   : > { %v3102_v2 = vpop.f32.mrb[36].mxu0  ;;  %v3143_v3 = vpop.f32.mrb[36].mxu1 }
 0x3ff   : > { %v3103_v11 = vadd.f32 %v3102_v2, %v2937_v56  ;;  %v3144_v12 = vadd.f32 %v3143_v3, %v2978_v58  ;;  %v3104_v15 = vpop.f32.mrb[37].mxu0  ;;  %v3145_v16 = vpop.f32.mrb[37].mxu1 }
 0x400   : > { %v3105_v20 = vadd.f32 %v3104_v15, %v2939_v49  ;;  %v3146_v21 = vadd.f32 %v3145_v16, %v2980_v57  ;;  %v3106_v22 = vpop.f32.mrb[38].mxu0  ;;  %v3147_v23 = vpop.f32.mrb[38].mxu1 }
 0x401   : > { %v3172_v24 = vadd.f32 %v3155_v10, %v3103_v11  ;;  %v3107_v25 = vpop.f32.mrb[39].mxu0  ;;  %v3148_v26 = vpop.f32.mrb[39].mxu1  ;;  %v3174_v56 = vadd.f32 %v3163_v0, %v3144_v12 }
 0x402   : > { %v3173_v18 = vadd.f32 %v3159_v4, %v3105_v20  ;;  %v3175_v63 = vadd.f32 %v3167_v51, %v3146_v21  ;;  %v3203_v2 = vpop.permute.xlu0 %3202  ;;  %v3671_v26 = vld [vmem:[%s8181_s3] sm:$0xf] }
 0x403   : > { %v5323_v31 = vmul.f32 -1.442695, %v3172_v24  ;;  %vm3204_vm13 = vcmp.eq.s32.totalorder %v3203_v2, 1  ;;  %v3688_v2 = vrot.slane %v3671_v26, %v7132_v32 }
 0x404   : > { %v5324_v27 = vmul.f32 -1.442695, %v3173_v18  ;;  %v5325_v53 = vmul.f32 -1.442695, %v3175_v63 }
 0x405   : > { %5989 = vpow2.f32 %v5323_v31 }
 0x406   : > { %5991 = vpow2.f32 %v5324_v27  ;;  %v3676_v27 = vrot.slane %v3671_v26, %v7121_v17 }
 0x407   : > { %5993 = vpow2.f32 %v5325_v53  ;;  %v3680_v53 = vrot.slane %v3671_v26, %v7126_v19 }
 0x408   : > { %5995 = vtanh.f32 %v3174_v56 }
 0x40f   : > { %v5990_v58 = vpop.eup %5989 }
 0x410   : > { %v5992_v49 = vpop.eup %5991  ;;  %v3179_v57 = vadd.f32 1.0, %v5990_v58 }
 0x411   : > { %v3185_v61 = vadd.f32 1.0, %v5992_v49  ;;  %v5994_v50 = vpop.eup %5993 }
 0x412   : > { %5997 = vrcp.f32 %v3179_v57  ;;  %v5996_v7 = vpop.eup %5995  ;;  %v3192_v4 = vadd.f32 1.0, %v5994_v50 }
 0x413   : > { %5999 = vrcp.f32 %v3185_v61 }
 0x414   : > { %6001 = vrcp.f32 %v3192_v4 }
 0x41c   : > { %v5998_v8 = vpop.eup %5997 }
 0x41d   : > { %v6000_v10 = vpop.eup %5999  ;;  %v3196_v3 = vmul.f32 %v5998_v8, %v5996_v7 }
 0x41e   : > { %v3195_v11 = vmul.f32 %v6000_v10, %v7361_v43  ;;  %v3458_v9 = vpop.f32.mrb[40].mxu0  ;;  %v3499_v15 = vpop.f32.mrb[40].mxu1 }
 0x41f   : > { %v3460_v12 = vpop.f32.mrb[41].mxu0  ;;  %v3501_v16 = vpop.f32.mrb[41].mxu1 }
 0x420   : > { %v3197_v20 = vadd.f32 %v3196_v3, %v3195_v11  ;;  %v3462_v21 = vpop.f32.mrb[42].mxu0  ;;  %v3503_v22 = vpop.f32.mrb[42].mxu1 }
 0x421   : > { %v3463_v23 = vpop.f32.mrb[43].mxu0  ;;  %v3504_v24 = vpop.f32.mrb[43].mxu1  ;;  %v8267_v22 = vld [vmem:[#allocation34_spill] sm:$0xff] }
 0x422   : > { %6003 = vtanh.f32 %v3197_v20  ;;  %v7683_v25 = vsel %vm3204_vm13, %v3197_v20, %v7361_v43  ;;  %v6002_v18 = vpop.eup %6001  ;;  %v8269_v24 = vld [vmem:[#allocation36_spill] sm:$0xff] }
 0x42c   : > { %v6004_v31 = vpop.eup %6003 }
 0x42d   : > { %v3199_v51 = vmul.f32 %v6004_v31, %v6002_v18  ;;  %v8271_v18 = vld [vmem:[#allocation38_spill] sm:$0xff]  ;;  %v8272_v31 = vld [vmem:[#allocation39_spill] sm:$0xff] }
 0x42e   : > { %v3623_v63 = vpop.f32.mrb[44].mxu0  ;;  %v3664_v0 = vpop.f32.mrb[44].mxu1 }
 0x42f   : > { %v3624_v56 = vadd.f32 %v3623_v63, %v3458_v9  ;;  %v3665_v58 = vadd.f32 %v3664_v0, %v3499_v15  ;;  %v3625_v49 = vpop.f32.mrb[45].mxu0  ;;  %v3666_v57 = vpop.f32.mrb[45].mxu1  ;;  %v3205_v43 = vsel %vm3204_vm13, %v3199_v51, 0.0  ;;  %v7693_v61 = vsel %vm3204_vm13, %v3199_v51, %v7380_v5  ;;  %v8274_v51 = vld [vmem:[#allocation41_spill] sm:$0xff]  ;;  %v8275_v63 = vld [vmem:[#allocation42_spill] sm:$0xff]  ;;  %v8276_v0 = vld [vmem:[#allocation43_spill] sm:$0xff] }
 0x430   : > { %v3626_v50 = vadd.f32 %v3625_v49, %v3460_v12  ;;  %v3667_v7 = vadd.f32 %v3666_v57, %v3501_v16  ;;  %v3627_v8 = vpop.f32.mrb[46].mxu0  ;;  %5326 = vst [vmem:[%s6705_s8 + $0x10] sm:$0xff] %v3205_v43  ;;  %v3752_v10 = vpack.c.bf16 %v7693_v61, %v7693_v61  ;;  %v3668_v3 = vpop.f32.mrb[46].mxu1  ;;  %v8265_v12 = vld [vmem:[#allocation32_spill] sm:$0xff]  ;;  %v8266_v16 = vld [vmem:[#allocation33_spill] sm:$0xff]  ;;  %v8279_v57 = vld [vmem:[#allocation46_spill] sm:$0xff] }
 0x431   : > { %v3693_v4 = vadd.f32 %v3676_v27, %v3624_v56  ;;  %v3628_v11 = vpop.f32.mrb[47].mxu0  ;;  %v3669_v9 = vpop.f32.mrb[47].mxu1  ;;  %v8273_v27 = vld [vmem:[#allocation40_spill] sm:$0xff]  ;;  %v8278_v56 = vld [vmem:[#allocation45_spill] sm:$0xff]  ;;  %v8280_v43 = vld [vmem:[#allocation47_spill] sm:$0xff] }
 0x432   : > { %v3694_v15 = vadd.f32 %v3680_v53, %v3626_v50  ;;  %3978 = vmatmul.mubr.bf16.vlgmr.msra.gmra.mrb[48].mxu0 %v3752_v10  ;;  %4019 = vmatmul.mubr.bf16.vlgmr.msra.gmra.mrb[48].mxu1 %v3752_v10  ;;  %v8277_v53 = vld [vmem:[#allocation44_spill] sm:$0xff]  ;;  %v8282_v8 = vld [vmem:[#allocation49_spill] sm:$0xff]  ;;  %v3724_v9 = vpop.permute.xlu1 %3723 }
 0x433   : > { %v5379_v20 = vmul.f32 -1.442695, %v3693_v4  ;;  %4111 = vmatpush1.bf16.msra.mxu0 %v7375_v6  ;;  %4152 = vmatpush1.bf16.msra.mxu1 %v7385_v59  ;;  %v3696_v6 = vadd.f32 %v3688_v2, %v3667_v7  ;;  %v3684_v59 = vrot.slane %v3671_v26, %v7135_v1  ;;  %v8281_v7 = vld [vmem:[#allocation48_spill] sm:$0xff]  ;;  %vm3725_vm14 = vcmp.eq.s32.totalorder %v3724_v9, 1  ;;  %v8284_v2 = vld [vmem:[#allocation51_spill] sm:$0xff] }
 0x434   : > { %v5380_v5 = vmul.f32 -1.442695, %v3694_v15  ;;  %4112 = vmatprep.subr.bf16.mxu0 %v7393_v13  ;;  %4153 = vmatprep.subr.bf16.mxu1 %v7398_v60  ;;  %v8264_v13 = vld [vmem:[#allocation31_spill] sm:$0xff] }
 0x435   : > { %6005 = vpow2.f32 %v5379_v20  ;;  %4142 = vmatprep.mubr.bf16.mxu0 %v8170_v55  ;;  %4183 = vmatprep.mubr.bf16.mxu1 %v8170_v55  ;;  %v5381_v60 = vmul.f32 -1.442695, %v3696_v6  ;;  %v3695_v21 = vadd.f32 %v3684_v59, %v3665_v58  ;;  %v8283_v20 = vld [vmem:[#allocation50_spill] sm:$0xff]  ;;  %v8285_v6 = vld [vmem:[#allocation52_spill] sm:$0xff]  ;;  %v8288_v59 = vld [vmem:[#allocation55_spill] sm:$0xff] }
 0x436   : > { %6007 = vpow2.f32 %v5380_v5 }
 0x437   : > { %4113 = vmatpush1.bf16.msra.mxu0 %v7405_v48  ;;  %4154 = vmatpush1.bf16.msra.mxu1 %v7410_v41  ;;  %v8268_v41 = vld [vmem:[#allocation35_spill] sm:$0xff]  ;;  %6009 = vpow2.f32 %v5381_v60  ;;  %v8291_v60 = vld [vmem:[#allocation58_spill] sm:$0xff] }
 0x438   : > { %4114 = vmatprep.subr.bf16.mxu0 %v7419_v36  ;;  %4155 = vmatprep.subr.bf16.mxu1 %v7424_v46  ;;  %v5384_v36 = vld [vmem:[%s6698_s13 + $0xc] sm:$0xf]  ;;  %6011 = vtanh.f32 %v3695_v21  ;;  %s6369_s13 = smov [#allocation10]  }
 0x439   : > { %s6171_s22 = sshll.u32 %s6369_s13, 4  ;;  %s6172_s22 = int_to_ptr.vmem [resolvable:$false] %s6171_s22 }
 0x43a   : > { %p6174_p0 = scmp.lt.s32.totalorder %s7813_s11, %s6172_s22 }
 0x43b   : > { %4115 = vmatpush1.bf16.msra.mxu0 %v7433_v54  ;;  %4156 = vmatpush1.bf16.msra.mxu1 %v8264_v13  ;;  %v8270_v54 = vld [vmem:[#allocation37_spill] sm:$0xff] }
 0x43c   : > { %4116 = vmatprep.subr.bf16.mxu0 %v8265_v12  ;;  %4157 = vmatprep.subr.bf16.mxu1 %v8266_v16  ;;  %v8290_v13 = vld [vmem:[#allocation57_spill] sm:$0xff]  ;;  %v8293_v16 = vld [vmem:[#allocation60_spill] sm:$0xff] }
 0x43f   : > { %v6006_v48 = vpop.eup %6005  ;;  %4117 = vmatpush1.bf16.msra.mxu0 %v8267_v22  ;;  %4158 = vmatpush1.bf16.msra.mxu1 %v8268_v41  ;;  %v8295_v41 = vld [vmem:[#allocation62_spill] sm:$0xff] }
 0x440   : > { %v6008_v23 = vpop.eup %6007  ;;  %v3700_v46 = vadd.f32 1.0, %v6006_v48  ;;  %4464 = vmatprep.subr.bf16.mxu0 %v8269_v24  ;;  %4505 = vmatprep.subr.bf16.mxu1 %v8270_v54  ;;  %v8294_v48 = vld [vmem:[#allocation61_spill] sm:$0xff]  ;;  %v8299_v54 = vld [vmem:[#allocation66_spill] sm:$0xff] }
 0x441   : > { %v3706_v26 = vadd.f32 1.0, %v6008_v23  ;;  %v6010_v58 = vpop.eup %6009  ;;  %v8298_v24 = vld [vmem:[#allocation65_spill] sm:$0xff] }
 0x442   : > { %6013 = vrcp.f32 %v3700_v46  ;;  %5433 = vmatmul.mubr.msk.bf16.vlgmr.msra.gmra.mrb[52].mxu0 %vm981_vm0, %v5384_v36  ;;  %5434 = vmatmul.mubr.msk.bf16.vlgmr.msra.gmra.mrb[52].mxu1 %vm981_vm0, %v5384_v36  ;;  %v6012_v49 = vpop.eup %6011  ;;  %v3713_v4 = vadd.f32 1.0, %v6010_v58 }
 0x443   : > { %6015 = vrcp.f32 %v3706_v26  ;;  %4465 = vmatpush1.bf16.msra.mxu0 %v8271_v18  ;;  %4506 = vmatpush1.bf16.msra.mxu1 %v8272_v31 }
 0x444   : > { %4466 = vmatprep.subr.bf16.mxu0 %v8273_v27  ;;  %4507 = vmatprep.subr.bf16.mxu1 %v8274_v51  ;;  %6017 = vrcp.f32 %v3713_v4 }
 0x445   : > { %4496 = vmatprep.mubr.bf16.mxu0 %v8170_v55  ;;  %4537 = vmatprep.mubr.bf16.mxu1 %v8170_v55 }
 0x447   : > { %4467 = vmatpush1.bf16.msra.mxu0 %v8275_v63  ;;  %4508 = vmatpush1.bf16.msra.mxu1 %v8276_v0 }
 0x448   : > { %4468 = vmatprep.subr.bf16.mxu0 %v8277_v53  ;;  %4509 = vmatprep.subr.bf16.mxu1 %v8278_v56 }
 0x44b   : > { %4469 = vmatpush1.bf16.msra.mxu0 %v8279_v57  ;;  %4510 = vmatpush1.bf16.msra.mxu1 %v8280_v43 }
 0x44c   : > { %v6014_v50 = vpop.eup %6013  ;;  %4470 = vmatprep.subr.bf16.mxu0 %v8281_v7  ;;  %4511 = vmatprep.subr.bf16.mxu1 %v8282_v8 }
 0x44d   : > { %v6016_v10 = vpop.eup %6015  ;;  %v3717_v3 = vmul.f32 %v6014_v50, %v6012_v49 }
 0x44e   : > { %v3716_v11 = vmul.f32 %v6016_v10, %v7540_v29  ;;  %v6018_v12 = vpop.eup %6017 }
 0x44f   : > { %4471 = vmatpush1.bf16.msra.mxu0 %v7515_v37  ;;  %4512 = vmatpush1.bf16.msra.mxu1 %v7517_v45  ;;  %v8286_v37 = vld [vmem:[#allocation53_spill] sm:$0xff]  ;;  %v8287_v45 = vld [vmem:[#allocation54_spill] sm:$0xff] }
 0x450   : > { %v3718_v15 = vadd.f32 %v3717_v3, %v3716_v11  ;;  %4472 = vmatprep.subr.bf16.mxu0 %v7521_v34  ;;  %4513 = vmatprep.subr.bf16.mxu1 %v8283_v20  ;;  %v8289_v34 = vld [vmem:[#allocation56_spill] sm:$0xff] }
 0x452   : > { %6019 = vtanh.f32 %v3718_v15  ;;  %v7742_v5 = vsel %vm3725_vm14, %v3718_v15, %v7540_v29  ;;  %v8292_v29 = vld [vmem:[#allocation59_spill] sm:$0xff] }
 0x453   : > { %4473 = vmatpush1.bf16.msra.mxu0 %v8284_v2  ;;  %4514 = vmatpush1.bf16.msra.mxu1 %v8285_v6 }
 0x454   : > { %4474 = vmatprep.subr.bf16.mxu0 %v8286_v37  ;;  %4515 = vmatprep.subr.bf16.mxu1 %v8287_v45 }
 0x457   : > { %4475 = vmatpush1.bf16.msra.mxu0 %v8288_v59  ;;  %4516 = vmatpush1.bf16.msra.mxu1 %v8289_v34 }
 0x458   : > { %4476 = vmatprep.subr.bf16.mxu0 %v8290_v13  ;;  %4517 = vmatprep.subr.bf16.mxu1 %v8291_v60 }
 0x45b   : > { %4477 = vmatpush1.bf16.msra.mxu0 %v8292_v29  ;;  %4518 = vmatpush1.bf16.msra.mxu1 %v8293_v16 }
 0x45c   : > { %v6020_v21 = vpop.eup %6019  ;;  %4478 = vmatprep.subr.bf16.mxu0 %v8294_v48  ;;  %4519 = vmatprep.subr.bf16.mxu1 %v7564_v14  ;;  %v8296_v14 = vld [vmem:[#allocation63_spill] sm:$0xff] }
 0x45d   : > { %v3720_v22 = vmul.f32 %v6020_v21, %v6018_v12  ;;  %v4245_v12 = vpop.permute.xlu1 %4244 }
 0x45e   : > { %vm4246_vm15 = vcmp.eq.s32.totalorder %v4245_v12, 1 }
 0x45f   : > { %4479 = vmatpush1.bf16.msra.mxu0 %v7568_v38  ;;  %4520 = vmatpush1.bf16.msra.mxu1 %v8295_v41  ;;  %v3726_v36 = vsel %vm3725_vm14, %v3720_v22, 0.0  ;;  %v7761_v23 = vsel %vm3725_vm14, %v3720_v22, %v7587_v44  ;;  %v8297_v38 = vld [vmem:[#allocation64_spill] sm:$0xff] }
 0x460   : > { %4629 = vmatprep.subr.bf16.mxu0 %v7574_v35  ;;  %4670 = vmatprep.subr.bf16.mxu1 %v7576_v62  ;;  %5382 = vst [vmem:[%s6707_s4 + $0x8] sm:$0xff] %v3726_v36  ;;  %v4271_v46 = vpack.c.bf16 %v7761_v23, %v7761_v23  ;;  %v8300_v62 = vld [vmem:[#allocation67_spill] sm:$0xff]  ;;  %v8301_v35 = vld [vmem:[#allocation68_spill] sm:$0xff] }
 0x462   : > { %4497 = vmatmul.mubr.bf16.vlgmr.msra.gmra.mrb[56].mxu0 %v4271_v46  ;;  %4538 = vmatmul.mubr.bf16.vlgmr.msra.gmra.mrb[56].mxu1 %v4271_v46 }
 0x463   : > { %4630 = vmatpush1.bf16.msra.mxu0 %v8296_v14  ;;  %4671 = vmatpush1.bf16.msra.mxu1 %v8297_v38 }
 0x464   : > { %4631 = vmatprep.subr.bf16.mxu0 %v8298_v24  ;;  %4672 = vmatprep.subr.bf16.mxu1 %v8299_v54 }
 0x465   : > { %4661 = vmatprep.mubr.bf16.mxu0 %v8170_v55  ;;  %4702 = vmatprep.mubr.bf16.mxu1 %v8170_v55  ;;  %v4254_v55 = vld [vmem:[%s6669_s25] sm:$0xf] }
 0x467   : > { %4632 = vmatpush1.bf16.msra.mxu0 %v8300_v62  ;;  %4673 = vmatpush1.bf16.msra.mxu1 %v7602_v33 }
 0x468   : > { %4633 = vmatprep.subr.bf16.mxu0 %v7606_v30  ;;  %4674 = vmatprep.subr.bf16.mxu1 %v8301_v35  ;;  %v7800_v35 = vld [vmem:[%s8181_s3] sm:$0xf] }
 0x46b   : > { %4634 = vmatpush1.bf16.msra.mxu0 %v7614_v42  ;;  %4675 = vmatpush1.bf16.msra.mxu1 %v7616_v28 }
 0x46c   : > { %4635 = vmatprep.subr.bf16.mxu0 %v7620_v39  ;;  %4676 = vmatprep.subr.bf16.mxu1 %v7622_v40  ;;  %v4192_v39 = vld [vmem:[%s8180_s19] sm:$0xf] }
 0x46d   : > { %v4197_v40 = vrot.slane %v4192_v39, %v7121_v17  ;;  %v4201_v27 = vrot.slane %v4192_v39, %v7126_v19  ;;  %v4209_v4 = vrot.slane %v4192_v39, %v7132_v32  ;;  %v4205_v9 = vrot.slane %v4192_v39, %v7135_v1 }
 0x46f   : > { %4636 = vmatpush1.bf16.msra.mxu0 %v7626_v47  ;;  %4677 = vmatpush1.bf16.msra.mxu1 %v7628_v52 }
 0x472   : > { %5487 = vmatmul.mubr.msk.bf16.vlgmr.msra.gmra.mrb[60].mxu0 %vm981_vm0, %v4254_v55  ;;  %5488 = vmatmul.mubr.msk.bf16.vlgmr.msra.gmra.mrb[60].mxu1 %vm981_vm0, %v4254_v55 }
 0x505   : > { %v3979_v44 = vpop.f32.mrb[48].mxu0  ;;  %v4020_v33 = vpop.f32.mrb[48].mxu1 }
 0x506   : > { %v3981_v30 = vpop.f32.mrb[49].mxu0  ;;  %v4022_v26 = vpop.f32.mrb[49].mxu1 }
 0x507   : > { %v3983_v42 = vpop.f32.mrb[50].mxu0  ;;  %v4024_v18 = vpop.f32.mrb[50].mxu1 }
 0x508   : > { %v3984_v28 = vpop.f32.mrb[51].mxu0  ;;  %v4025_v31 = vpop.f32.mrb[51].mxu1 }
 0x515   : > { %v4144_v52 = vpop.f32.mrb[52].mxu0  ;;  %v4185_v47 = vpop.f32.mrb[52].mxu1 }
 0x516   : > { %v4145_v51 = vadd.f32 %v4144_v52, %v3979_v44  ;;  %v4186_v63 = vadd.f32 %v4185_v47, %v4020_v33  ;;  %v4146_v0 = vpop.f32.mrb[53].mxu0  ;;  %v4187_v53 = vpop.f32.mrb[53].mxu1 }
 0x517   : > { %v4147_v56 = vadd.f32 %v4146_v0, %v3981_v30  ;;  %v4188_v58 = vadd.f32 %v4187_v53, %v4022_v26  ;;  %v4148_v49 = vpop.f32.mrb[54].mxu0  ;;  %v4189_v57 = vpop.f32.mrb[54].mxu1  ;;  %v4716_v30 = vrot.slane %v7800_v35, %v7121_v17 }
 0x518   : > { %v4214_v43 = vadd.f32 %v4197_v40, %v4145_v51  ;;  %v4149_v50 = vpop.f32.mrb[55].mxu0  ;;  %v4190_v7 = vpop.f32.mrb[55].mxu1  ;;  %v4216_v20 = vadd.f32 %v4205_v9, %v4186_v63 }
 0x519   : > { %v4215_v8 = vadd.f32 %v4201_v27, %v4147_v56  ;;  %v4217_v11 = vadd.f32 %v4209_v4, %v4188_v58 }
 0x51a   : > { %v5435_v10 = vmul.f32 -1.442695, %v4214_v43 }
 0x51b   : > { %v5436_v3 = vmul.f32 -1.442695, %v4215_v8  ;;  %v5437_v15 = vmul.f32 -1.442695, %v4217_v11 }
 0x51c   : > { %6021 = vpow2.f32 %v5435_v10 }
 0x51d   : > { %6023 = vpow2.f32 %v5436_v3 }
 0x51e   : > { %6025 = vpow2.f32 %v5437_v15 }
 0x51f   : > { %6027 = vtanh.f32 %v4216_v20 }
 0x526   : > { %v6022_v2 = vpop.eup %6021 }
 0x527   : > { %v6024_v6 = vpop.eup %6023  ;;  %v4221_v37 = vadd.f32 1.0, %v6022_v2 }
 0x528   : > { %v4227_v45 = vadd.f32 1.0, %v6024_v6  ;;  %v6026_v59 = vpop.eup %6025 }
 0x529   : > { %6029 = vrcp.f32 %v4221_v37  ;;  %v6028_v34 = vpop.eup %6027  ;;  %v4234_v16 = vadd.f32 1.0, %v6026_v59 }
 0x52a   : > { %6031 = vrcp.f32 %v4227_v45 }
 0x52b   : > { %6033 = vrcp.f32 %v4234_v16 }
 0x533   : > { %v6030_v13 = vpop.eup %6029 }
 0x534   : > { %v6032_v60 = vpop.eup %6031  ;;  %v4238_v29 = vmul.f32 %v6030_v13, %v6028_v34 }
 0x535   : > { %v4237_v21 = vmul.f32 %v6032_v60, %v7683_v25  ;;  %v4498_v48 = vpop.f32.mrb[56].mxu0  ;;  %v4539_v22 = vpop.f32.mrb[56].mxu1 }
 0x536   : > { %v4500_v41 = vpop.f32.mrb[57].mxu0  ;;  %v4541_v36 = vpop.f32.mrb[57].mxu1 }
 0x537   : > { %v4239_v46 = vadd.f32 %v4238_v29, %v4237_v21  ;;  %v4502_v14 = vpop.f32.mrb[58].mxu0  ;;  %v4543_v38 = vpop.f32.mrb[58].mxu1 }
 0x538   : > { %v4503_v24 = vpop.f32.mrb[59].mxu0  ;;  %v4544_v54 = vpop.f32.mrb[59].mxu1 }
 0x539   : > { %6035 = vtanh.f32 %v4239_v46  ;;  %v4251_v62 = vsel %vm4246_vm15, %v4239_v46, %v7683_v25  ;;  %v6034_v55 = vpop.eup %6033  ;;  %v4720_v25 = vrot.slane %v7800_v35, %v7126_v19 }
 0x53a   : > { %4772 = vst [vmem:[#allocation14] sm:$0xff] %v4251_v62 }
 0x543   : > { %v6036_v44 = vpop.eup %6035 }
 0x544   : > { %v4241_v33 = vmul.f32 %v6036_v44, %v6034_v55 }
 0x545   : > { %v4663_v26 = vpop.f32.mrb[60].mxu0  ;;  %v4704_v42 = vpop.f32.mrb[60].mxu1 }
 0x546   : > { %v4247_v18 = vsel %vm4246_vm15, %v4241_v33, 0.0  ;;  %v4664_v28 = vadd.f32 %v4663_v26, %v4498_v48  ;;  %v4705_v31 = vadd.f32 %v4704_v42, %v4539_v22  ;;  %v4665_v17 = vpop.f32.mrb[61].mxu0  ;;  %v4706_v39 = vpop.f32.mrb[61].mxu1  ;;  %v4250_v19 = vsel %vm4246_vm15, %v4241_v33, %v7693_v61 }
 0x547   : > { %5438 = vst [vmem:[%s6705_s8 + $0x18] sm:$0xff] %v4247_v18  ;;  %v4666_v40 = vadd.f32 %v4665_v17, %v4500_v41  ;;  %v4707_v52 = vadd.f32 %v4706_v39, %v4541_v36  ;;  %v4667_v47 = vpop.f32.mrb[62].mxu0  ;;  %v4708_v27 = vpop.f32.mrb[62].mxu1  ;;  %4770 = vst [vmem:[#allocation13] sm:$0xff] %v4250_v19  ;;  %s6173_s8 = scalar_lea.vmem %s6172_s22, 1024 }
 0x548   : > { %v4733_v51 = vadd.f32 %v4716_v30, %v4664_v28  ;;  %v4668_v63 = vpop.f32.mrb[63].mxu0  ;;  %v4709_v0 = vpop.f32.mrb[63].mxu1  ;;  %p6175_p9 = scmp.lt.s32.totalorder %s6173_s8, %s6167_s23 }
 0x54a   : > { %p6176_p3 = por %p6175_p9, %p6174_p0 }
 0x54c   : > { %p6177_p12 = pnand %p6176_p3, %p6170_p1 }
 0x54e   : > { %6180 = shalt.err (!%p6177_p12)
}
 0x54f   : > { %s6181_s25 = scalar_lea.hbm %s7811_s18, 512  ;;  %s6185_s9 = scalar_lea.hbm %s8302_s6, 1536 }
 0x550   : > { %p6182_p4 = scmp.ne.s32.totalorder %s7811_s18, %s6181_s25  ;;  %p6186_p11 = scmp.lt.u32.totalorder %s7811_s18, %s8302_s6 }
 0x551   : > { %p6187_p13 = scmp.lt.u32.totalorder %s6185_s9, %s6181_s25  ;;  %p6189_p7 = scmp.lt.u32.totalorder %s6181_s25, %s7811_s18 }
 0x552   : > { %p6183_p5 = pnand %p6182_p4, %p8305_p2 }
 0x553   : > { %p6188_p8 = por %p6187_p13, %p6186_p11 }
 0x554   : > { %p6184_p6 = pneg %p6183_p5 }
 0x555   : > { %p6190_p1 = por %p6189_p7, %p6188_p8 }
 0x557   : > { %p6191_p0 = pnand %p6190_p1, %p6184_p6 }
 0x559   : > { %6194 = shalt.err (!%p6191_p0)
}
 0x55a   : > { %s6370_s23 = smov 128   ;;  %s6371_s13 = smov 8   ;;  %v4734_v61 = vadd.f32 %v4720_v25, %v4666_v40  ;;  %v5489_v53 = vmul.f32 -1.442695, %v4733_v51  ;;  %v4728_v58 = vrot.slane %v7800_v35, %v7132_v32  ;;  %v4724_v57 = vrot.slane %v7800_v35, %v7135_v1  ;;  %v4764_v2 = vpop.permute.xlu0 %4763 }
 0x55b   : > { %5521 = dma.vmem_to_hbm [thread:$0]  (%p8305_p2), %s7813_s11, 512, %s7811_s18, %s7821_s17, %s6370_s23, %s6370_s23, %s6371_s13   ;;  %vm4765_vm0 = vcmp.eq.s32.totalorder %v4764_v2, 1 }
 0x55c   : > { %v5490_v56 = vmul.f32 -1.442695, %v4734_v61  ;;  %6037 = vpow2.f32 %v5489_v53  ;;  %v4736_v49 = vadd.f32 %v4728_v58, %v4707_v52  ;;  %v4735_v50 = vadd.f32 %v4724_v57, %v4705_v31  ;;  %s6372_s11 = smov [#allocation14]   ;;  %p8306_p9 = scmp.eq.s32.totalorder %s6479_s15, 2 }
 0x55d   : > { %s4836_s18 = sshll.u32 %s6372_s11, 4  ;;  %s4837_s18 = int_to_ptr.vmem [resolvable:$true] %s4836_s18 }
 0x55e   : > { %6039 = vpow2.f32 %v5490_v56  ;;  %v5491_v43 = vmul.f32 -1.442695, %v4736_v49  ;;  %s6195_s5 = scalar_lea.vmem %s4837_s18, 256  ;;  %p6202_p4 = scmp.lt.s32.totalorder %s4837_s18, %s4837_s18 }
 0x55f   : > { %p6196_p2 = scmp.ne.s32.totalorder %s4837_s18, %s6195_s5  ;;  %p6203_p5 = scmp.lt.s32.totalorder %s6195_s5, %s6195_s5 }
 0x560   : > { %6041 = vpow2.f32 %v5491_v43 }
 0x561   : > { %6043 = vtanh.f32 %v4735_v50  ;;  %p6197_p3 = pnand %p6196_p2, %p8306_p9  ;;  %p6204_p6 = por %p6203_p5, %p6202_p4 }
 0x563   : > { %p6198_p12 = pneg %p6197_p3 }
 0x565   : > { %p6205_p11 = pnand %p6204_p6, %p6198_p12 }
 0x566   : > { %v6038_v7 = vpop.eup %6037 }
 0x567   : > { %v4740_v10 = vadd.f32 1.0, %v6038_v7 }
 0x568   : > { %v6040_v8 = vpop.eup %6039 }
 0x569   : > { %v4746_v3 = vadd.f32 1.0, %v6040_v8  ;;  %6045 = vrcp.f32 %v4740_v10 }
 0x56a   : > { %v6042_v4 = vpop.eup %6041 }
 0x56b   : > { %6047 = vrcp.f32 %v4746_v3  ;;  %v6044_v11 = vpop.eup %6043  ;;  %v4753_v20 = vadd.f32 1.0, %v6042_v4 }
 0x56d   : > { %6049 = vrcp.f32 %v4753_v20 }
 0x573   : > { %v6046_v9 = vpop.eup %6045 }
 0x574   : > { %v4757_v15 = vmul.f32 %v6046_v9, %v6044_v11 }
 0x575   : > { %v6048_v32 = vpop.eup %6047 }
 0x576   : > { %v4756_v1 = vmul.f32 %v6048_v32, %v7742_v5 }
 0x578   : > { %v4758_v6 = vadd.f32 %v4757_v15, %v4756_v1 }
 0x57a   : > { %6051 = vtanh.f32 %v4758_v6  ;;  %v4769_v37 = vsel %vm4765_vm0, %v4758_v6, %v7742_v5 }
 0x57b   : > { %4773 = vst [vmem:[#allocation14 + $0x8] sm:$0xff] %v4769_v37 }
 0x57c   : > { %6208 = shalt.err (!%p6205_p11)
}
 0x57d   : > { %s8307_s8 = sld [smem:[#allocation82_spill]]  ;;  %p8308_p8 = pmov %p8306_p9 }
 0x583   : > { %s6209_s25 = scalar_lea.hbm %s8307_s8, 256 }
 0x584   : > { %p6210_p13 = scmp.ne.s32.totalorder %s8307_s8, %s6209_s25  ;;  %p6215_p0 = scmp.lt.u32.totalorder %s6209_s25, %s8307_s8 }
 0x586   : > { %p6211_p7 = pnand %p6210_p13, %p8308_p8 }
 0x588   : > { %p6212_p1 = pneg %p6211_p7 }
 0x58a   : > { %p6217_p2 = pnand %p6215_p0, %p6212_p1 }
 0x58c   : > { %6220 = shalt.err (!%p6217_p2)
}
 0x58d   : > { %p8309_p9 = pmov %p8308_p8  ;;  %s4779_s5 = sand.u32 1, %s6479_s15   ;;  %v6050_v5 = vpop.eup %6049 }
 0x58e   : > { %s8310_s17 = ssub.s32 2, %s6479_s15  ;;  %s4810_s25 = sshll.u32 %s6707_s4, 4  ;;  %v6052_v45 = vpop.eup %6051  ;;  %s7885_s25 = int_to_ptr.vmem [resolvable:$true] %s4810_s25 }
 0x58f   : > { %5526 = dma.vmem_to_hbm [thread:$0]  (%p8309_p9), %s4837_s18, 256, %s8307_s8, [#allocation15], %s6370_s23, %s6370_s23, %s6371_s13   ;;  %v4760_v59 = vmul.f32 %v6052_v45, %v6050_v5 }
 0x590   : > { %s5506_s22 = sshll.u32 %s8310_s17, 9  ;;  %s6373_s16 = smov [#allocation13]  }
 0x591   : > { %s4823_s1 = sshll.u32 %s6373_s16, 4  ;;  %s8311_s0 = sld [smem:[#allocation80_spill]]  ;;  %v4766_v34 = vsel %vm4765_vm0, %v4760_v59, 0.0  ;;  %v4768_v13 = vsel %vm4765_vm0, %v4760_v59, %v7761_v23  ;;  %s7890_s1 = int_to_ptr.vmem [resolvable:$true] %s4823_s1 }
 0x592   : > { %4767 = vst [vmem:[%s6707_s4] sm:$0xff] %v4766_v34  ;;  %4771 = vst [vmem:[#allocation13 + $0x8] sm:$0xff] %v4768_v13  ;;  %s7893_s18 = scalar_lea.sflag [#allocation12], %s4779_s5  ;;  %s6221_s21 = scalar_lea.vmem %s7885_s25, 512 }
 0x593   : > { %p6222_p3 = scmp.ne.s32.totalorder %s7885_s25, %s6221_s21  ;;  %s6374_s11 = smov [#allocation11]  }
 0x594   : > { %s6225_s17 = sshll.u32 %s6374_s11, 4  ;;  %s6226_s17 = int_to_ptr.vmem [resolvable:$false] %s6225_s17 }
 0x595   : > { %p6223_p12 = pnand %p6222_p3, %p6616_p10  ;;  %p6228_p5 = scmp.lt.s32.totalorder %s7885_s25, %s6226_s17 }
 0x597   : > { %s7883_s2 = scalar_lea.hbm %s8311_s0, %s5506_s22  ;;  %p6224_p4 = pneg %p6223_p12 }
 0x598   : > { %s6227_s22 = scalar_lea.vmem %s6226_s17, 1024 }
 0x599   : > { %p6229_p6 = scmp.lt.s32.totalorder %s6227_s22, %s6221_s21 }
 0x59b   : > { %p6230_p11 = por %p6229_p6, %p6228_p5 }
 0x59d   : > { %p6231_p13 = pnand %p6230_p11, %p6224_p4 }
 0x59f   : > { %6234 = shalt.err (!%p6231_p13)
}
 0x5a0   : > { %s6235_s4 = scalar_lea.hbm %s7883_s2, 512  ;;  %s6239_s9 = scalar_lea.hbm %s8311_s0, 1536 }
 0x5a1   : > { %p6236_p8 = scmp.ne.s32.totalorder %s7883_s2, %s6235_s4  ;;  %p6240_p0 = scmp.lt.u32.totalorder %s7883_s2, %s8311_s0 }
 0x5a2   : > { %p6241_p2 = scmp.lt.u32.totalorder %s6239_s9, %s6235_s4  ;;  %p6243_p3 = scmp.lt.u32.totalorder %s6235_s4, %s7883_s2 }
 0x5a3   : > { %p6237_p7 = pnand %p6236_p8, %p6616_p10 }
 0x5a4   : > { %p6242_p9 = por %p6241_p2, %p6240_p0 }
 0x5a5   : > { %p6238_p1 = pneg %p6237_p7 }
 0x5a6   : > { %p6244_p12 = por %p6243_p3, %p6242_p9 }
 0x5a8   : > { %p6245_p4 = pnand %p6244_p12, %p6238_p1 }
 0x5aa   : > { %6248 = shalt.err (!%p6245_p4)
}
 0x5ab   : > { %5522 = dma.vmem_to_hbm [thread:$0]  (%p6616_p10), %s7885_s25, 512, %s7883_s2, %s7893_s18, %s6370_s23, %s6370_s23, %s6371_s13  }
 0x5ac   : > { %s6249_s21 = scalar_lea.vmem %s7890_s1, 256  ;;  %p8312_p6 = scmp.eq.s32.totalorder %s6479_s15, 2 }
 0x5ad   : > { %p6250_p5 = scmp.ne.s32.totalorder %s7890_s1, %s6249_s21  ;;  %p6256_p8 = scmp.lt.s32.totalorder %s7890_s1, %s7890_s1 }
 0x5ae   : > { %p6257_p7 = scmp.lt.s32.totalorder %s6249_s21, %s6249_s21 }
 0x5af   : > { %p6251_p11 = pnand %p6250_p5, %p8312_p6 }
 0x5b0   : > { %p6258_p1 = por %p6257_p7, %p6256_p8 }
 0x5b1   : > { %p6252_p13 = pneg %p6251_p11 }
 0x5b3   : > { %p6259_p0 = pnand %p6258_p1, %p6252_p13 }
 0x5b5   : > { %6262 = shalt.err (!%p6259_p0)
}
 0x5b6   : > { %s8313_s22 = sld [smem:[#allocation81_spill]]  ;;  %p8314_p2 = pmov %p8312_p6 }
 0x5bc   : > { %s6263_s4 = scalar_lea.hbm %s8313_s22, 256 }
 0x5bd   : > { %p6264_p10 = scmp.ne.s32.totalorder %s8313_s22, %s6263_s4  ;;  %p6269_p12 = scmp.lt.u32.totalorder %s6263_s4, %s8313_s22 }
 0x5bf   : > { %p6265_p9 = pnand %p6264_p10, %p8314_p2 }
 0x5c1   : > { %p6266_p3 = pneg %p6265_p9 }
 0x5c3   : > { %p6271_p4 = pnand %p6269_p12, %p6266_p3 }
 0x5c5   : > { %6274 = shalt.err (!%p6271_p4)
}
 0x5c6   : > { %p8315_p5 = pmov %p8314_p2  ;;  %p8316_p6 = pmov %p8314_p2 }
 0x5c8   : > { %5524 = dma.vmem_to_hbm [thread:$0]  (%p8315_p5), %s7890_s1, 256, %s8313_s22, [#allocation12], %s6370_s23, %s6370_s23, %s6371_s13  }
 0x5c9   : > { %6316 = dma.done.wait (%p8316_p6), [#allocation12], 256   ;;  %p8317_p11 = pmov %p8314_p2 }
 0x5ca   : > { %p8318_p13 = pmov %p8314_p2 }
 0x5cb   : > { %6318 = vsyncadd (%p8317_p11), [#allocation12], 4294967040 }
 0x5cc   : > { %6320 = dma.done.wait (%p8318_p13), [#allocation15], 256   ;;  %p8319_p8 = pmov %p8314_p2 }
 0x5ce   : > { %6322 = vsyncadd (%p8319_p8), [#allocation15], 4294967040 }
 0x5cf PF: > { %s8320_s28 = sld [smem:[#allocation23_spill]]  ;;  %s8321_s11 = sld [smem:[#allocation25_spill]] }
 0x5d0   : > { %p5565_p7 = scmp.ge.s32.totalorder %s6357_s14, 2 }
 0x5d5   : > { %s4859_s21 = sand.u32 1, %s8320_s28   ;;  %p8322_p1 = scmp.ne.s32.totalorder %s8321_s11, 0 }
 0x5d6   : > { %s4860_s23 = scalar_lea.sflag [#allocation4], %s4859_s21 }
 0x5d7   : > { %p5548_p0 = pnand %p5565_p7, %p8322_p1 }
 0x5d9   : > { %6324 = dma.done.wait (!%p5548_p0), %s4860_s23, 512  }
 0x5da   : > { %6326 = vsyncadd (!%p5548_p0), %s4860_s23, 4294966784  ;;  %s8323_s13 = sadd.s32 4294967294, %s6357_s14   ;;  %s8324_s1 = sld [smem:[#allocation26_spill]] }
 0x5db   : > { %s4868_s12 = sand.u32 1, %s8323_s13  }
 0x5dc   : > { %s4869_s17 = scalar_lea.sflag [#allocation12], %s4868_s12 }
 0x5e0   : > { %p8325_p10 = scmp.ne.s32.totalorder %s8324_s1, 0 }
 0x5e2   : > { %p5551_p2 = pnand %p5565_p7, %p8325_p10 }
 0x5e4   : > { %6328 = dma.done.wait (!%p5551_p2), %s4869_s17, 512  }
 0x5e5   : > { %6330 = vsyncadd (!%p5551_p2), %s4869_s17, 4294966784  ;;  %p33_p9 = scmp.ge.s32.totalorder %s6596_s24, 5   ;;  %s8326_s25 = smov %s6337_s26 }
 0x5e6   : > { %s8327_s26 = smov %s6341_s27  ;;  %s8328_s27 = smov %s6621_s20 }
 0x5e7   : > { %s8329_s28 = smov %s6349_s29  ;;  %s8330_s29 = smov %s6353_s30 }
 0x5e8   : > { %s8331_s30 = smov %s6607_s10  ;;  %s8332_s14 = smov %s6596_s24 }
 0x5e9   :  { %35 = sbr.rel (!%p33_p9) target bundleno = 27 (0x1b), region = 183 }
 0x5f0   :  { %4874 = vsyncpa [#allocation3], 1 }
 0x5f1   :  { %4876 = vsyncpa [#allocation3 + $0x1], 1 }
 0x5f2   :  { %4877 = vsyncpa [#allocation6], 1 }
 0x5f3   :  { %4878 = vsyncpa [#allocation9], 1 }
 0x5f4   :  { %4879 = vsyncpa [#allocation4], 1 }
 0x5f5   :  { %4881 = vsyncpa [#allocation4 + $0x1], 1 }
 0x5f6   :  { %4882 = vsyncpa [#allocation12], 1 }
 0x5f7   :  { %4884 = vsyncpa [#allocation12 + $0x1], 1 }
 0x5f8   :  { %4885 = vsyncpa [#allocation15], 1 }

</bundles_post_ra>
